<compile_context>
chip_gen: v7x
topology: tpu7x:2x2x1
jax: 0.10.0
libtpu: 0.0.40
codegen_flags: <defaults>
</compile_context>

<pallas_src>
import jax
import jax.numpy as jnp
import numpy as np
from jax.experimental import pallas as pl
from jax.experimental.pallas import tpu as pltpu

E = 64        # LSTM hidden size (as in the module)
E_EMB = 50    # embedding dim (as in the module)
E_PAD = 64    # padded embedding dim used inside the kernel
NEG_BIG = 1000000000000.0


def wbw_kernel(embed1_ref, embed2_ref,
               wih1_ref, whh1_ref, b1_ref,
               wih2_ref, whh2_ref, b2_ref,
               wyh_ref, wrt_ref, wpx_ref, wv_ref,
               oh1_ref, oh2_ref, s1s_ref,
               out_ref):
    B, S, EP = embed1_ref.shape
    _, S2, _ = embed2_ref.shape
    H4 = 4 * E
    H3 = 3 * E

    # ---- hoisted input projections: one MXU matmul per LSTM, bias folded ----
    xp1 = (jnp.dot(embed1_ref[...].reshape(B * S, EP), wih1_ref[...],
                   preferred_element_type=jnp.float32)
           + b1_ref[...]).reshape(B, S, H4)
    xp2 = (jnp.dot(embed2_ref[...].reshape(B * S2, EP), wih2_ref[...],
                   preferred_element_type=jnp.float32)
           + b2_ref[...]).reshape(B, S2, H4)

    whh1 = whh1_ref[...]
    whh2 = whh2_ref[...]
    oh1 = oh1_ref[...]                                   # (B, S)  one-hot(s1_last)
    oh2 = oh2_ref[...]                                   # (B, S2) one-hot(s2_last)

    def cell(xw_t, h, c, whh):
        # Gate order permuted host-side to (i, f, o, g): sigmoid on the
        # leading 3E lanes only, tanh only on the trailing E (g) slice --
        # trims the per-step EUP work on the serial recurrent path.
        gates = xw_t + jnp.dot(h, whh, preferred_element_type=jnp.float32)
        sg = jax.nn.sigmoid(gates[:, :H3])
        g = jnp.tanh(gates[:, H3:])
        i = sg[:, 0 * E:1 * E]
        f = sg[:, 1 * E:2 * E]
        o = sg[:, 2 * E:3 * E]
        c_new = f * c + i * g
        h_new = o * jnp.tanh(c_new)
        return h_new, c_new

    # iota row masks for the in-vreg select-scatter of per-step outputs
    row_ids1 = jax.lax.broadcasted_iota(jnp.int32, (1, S, 1), 1)
    row_ids2 = jax.lax.broadcasted_iota(jnp.int32, (1, S2, 1), 1)

    # ---- lstm1 (nn.LSTMCell) over sentence1 ----
    h = jnp.zeros((B, E), jnp.float32)
    c = jnp.zeros((B, E), jnp.float32)
    c2 = jnp.zeros((B, E), jnp.float32)                  # == c.gather(1, s1_len)
    h_all = jnp.zeros((B, S, E), jnp.float32)            # stays in vregs
    for t in range(S):
        h, c = cell(xp1[:, t, :], h, c, whh1)
        h_all = jnp.where(row_ids1 == t, h[:, None, :], h_all)
        c2 = c2 + oh1[:, t:t + 1] * c
    # one-hot "gather" moved off the serial loop (h is stored, c is not)
    h2 = jnp.sum(oh1[:, :, None] * h_all, axis=1)        # == h.gather(1, s1_len)

    # ---- lstm2 (nn.LSTM, batch_first, 1 layer, eval mode) over sentence2 ----
    out_seq = jnp.zeros((B, S2, E), jnp.float32)         # stays in vregs
    for t in range(S2):
        h2, c2 = cell(xp2[:, t, :], h2, c2, whh2)
        out_seq = jnp.where(row_ids2 == t, h2[:, None, :], out_seq)
    hn = jnp.sum(oh2[:, :, None] * out_seq, axis=1)      # == out.gather(1, s2_len)

    # ---- word-by-word attention ----
    wrt = wrt_ref[...]                                   # (E, 2E) == [wr | wt]
    s1s = s1s_ref[...]                                   # (B, S)

    # hoisted loop invariants
    neg_mask = (1.0 - s1s) * NEG_BIG                     # (B, S)
    wv_b = jnp.broadcast_to(wv_ref[...].reshape(1, 1, E), (B, S, E))

    # fused loop-invariant: [h_all | out_seq] @ [wy ; wh]  (K = 128, one pass)
    # (S2 == S so torch's .expand is the identity)
    ho = jnp.concatenate([h_all, out_seq], axis=-1)      # (B, S, 2E)
    yh = jnp.dot(ho.reshape(B * S, 2 * E), wyh_ref[...],
                 preferred_element_type=jnp.float32).reshape(B, S, E)

    r = jnp.zeros((B, E), jnp.float32)
    rn = jnp.zeros((B, E), jnp.float32)                  # == Rt.gather(1, s2_len)
    for i in range(S2):
        rw = jnp.dot(r, wrt, preferred_element_type=jnp.float32)   # (B, 2E)
        wrrt = rw[:, 0:E]
        wtrt = rw[:, E:2 * E]
        M = jnp.tanh(yh + wrrt[:, None, :])              # (B, S, E)
        wtm = jnp.sum(M * wv_b, axis=-1)                 # (B, S)
        masked = s1s * wtm - neg_mask
        soft = jax.nn.softmax(masked, axis=1)            # nn.Softmax() -> dim=1
        r = jnp.sum(h_all * soft[:, :, None], axis=1) + jnp.tanh(wtrt)
        rn = rn + oh2[:, i:i + 1] * r
    # TODO(synk): if the bundle shows this loop VALU/XLU-bound, switch the
    # softmax divide to pl.reciprocal(..., approx=True) (re-check tolerance).

    # ---- fused final projection: tanh([rn | hn] @ [wp ; wx]) ----
    rh = jnp.concatenate([rn, hn], axis=-1)              # (B, 2E)
    out_ref[...] = jnp.tanh(jnp.dot(rh, wpx_ref[...],
                                    preferred_element_type=jnp.float32))


def wbw_attention_two_way(params, sentence1, sentence2, s1_last, s2_last, s1_mask):
    """JAX/Pallas equivalent of Wbw_Attenion_two_way.forward (eval mode)."""
    emb = params["embedding"]
    embed1 = emb[sentence1].astype(jnp.float32)          # (B, S, 50)
    embed2 = emb[sentence2].astype(jnp.float32)          # (B, S2, 50)
    B, S, EDIM = embed1.shape
    _, S2, _ = embed2.shape
    assert S == S2, "out.expand(b, s, e) in the reference requires S2 == S"

    # Pad embedding dim 50 -> 64 (zero-padded); zero rows appended to W_ih
    # keep the math identical while giving MXU/lane-friendly shapes.
    pad = E_PAD - EDIM
    embed1 = jnp.pad(embed1, ((0, 0), (0, 0), (0, pad)))
    embed2 = jnp.pad(embed2, ((0, 0), (0, 0), (0, pad)))

    oh1 = jax.nn.one_hot(s1_last, S, dtype=jnp.float32)  # gather index -> one-hot
    oh2 = jax.nn.one_hot(s2_last, S2, dtype=jnp.float32)

    def permute_gates(w):
        # torch gate block order (i, f, g, o) -> kernel order (i, f, o, g)
        i, f, g, o = jnp.split(w, 4, axis=0)
        return jnp.concatenate([i, f, o, g], axis=0)

    wih1 = jnp.pad(permute_gates(params["w_ih1"]).T, ((0, pad), (0, 0)))  # (64, 256)
    whh1 = permute_gates(params["w_hh1"]).T
    b1 = permute_gates(params["b_ih1"] + params["b_hh1"]).reshape(1, 4 * E)
    wih2 = jnp.pad(permute_gates(params["w_ih2"]).T, ((0, pad), (0, 0)))  # (64, 256)
    whh2 = permute_gates(params["w_hh2"]).T
    b2 = permute_gates(params["b_ih2"] + params["b_hh2"]).reshape(1, 4 * E)

    wyh = jnp.concatenate([params["wy"], params["wh"]], axis=0)   # (2E, E)
    wrt = jnp.concatenate([params["wr"], params["wt"]], axis=1)   # (E, 2E)
    wpx = jnp.concatenate([params["wp"], params["wx"]], axis=0)   # (2E, E)
    wv = params["w"].reshape(1, E)

    inputs = (embed1, embed2, wih1, whh1, b1, wih2, whh2, b2,
              wyh, wrt, wpx, wv, oh1, oh2, s1_mask.astype(jnp.float32))

    vmem_spec = lambda: pl.BlockSpec(memory_space=pltpu.MemorySpace.VMEM)
    # TODO(synk): at realistic batch sizes add a batch grid with
    # dimension_semantics=("parallel",) (2x on v7x's two TensorCores) and an
    # explicit vmem_limit_bytes budget (v7x has 64 MiB physical VMEM).
    return pl.pallas_call(
        wbw_kernel,
        out_shape=jax.ShapeDtypeStruct((B, E), jnp.float32),
        in_specs=[vmem_spec() for _ in inputs],
        out_specs=vmem_spec(),
    )(*inputs)


def reference_forward(params, sentence1, sentence2, s1_last, s2_last, s1_mask):
    """Pure-JAX mirror of the PyTorch forward, for correctness checking."""
    emb1 = params["embedding"][sentence1].astype(jnp.float32)
    emb2 = params["embedding"][sentence2].astype(jnp.float32)
    B, S, _ = emb1.shape
    _, S2, _ = emb2.shape
    wih1, whh1 = params["w_ih1"].T, params["w_hh1"].T
    b1 = params["b_ih1"] + params["b_hh1"]
    wih2, whh2 = params["w_ih2"].T, params["w_hh2"].T
    b2 = params["b_ih2"] + params["b_hh2"]

    def step(x, h, c, wih, whh, b):
        g = x @ wih + h @ whh + b
        i = jax.nn.sigmoid(g[:, :E]); f = jax.nn.sigmoid(g[:, E:2 * E])
        gg = jnp.tanh(g[:, 2 * E:3 * E]); o = jax.nn.sigmoid(g[:, 3 * E:])
        c = f * c + i * gg
        return o * jnp.tanh(c), c

    h = jnp.zeros((B, E)); c = jnp.zeros((B, E))
    hs, cs = [], []
    for t in range(S):
        h, c = step(emb1[:, t, :], h, c, wih1, whh1, b1)
        hs.append(h); cs.append(c)
    h_all = jnp.stack(hs, 1); c_all = jnp.stack(cs, 1)
    bidx = jnp.arange(B)
    h2 = h_all[bidx, s1_last, :]
    c2 = c_all[bidx, s1_last, :]

    outs = []
    for t in range(S2):
        h2, c2 = step(emb2[:, t, :], h2, c2, wih2, whh2, b2)
        outs.append(h2)
    out_seq = jnp.stack(outs, 1)

    r = jnp.zeros((B, E))
    rts = []
    for _ in range(S2):
        wyy = h_all @ params["wy"]
        whhn = out_seq @ params["wh"]
        wrrt = (r @ params["wr"])[:, None, :]
        M = jnp.tanh(wyy + whhn + wrrt)
        wtm = M @ params["w"]
        masked = s1_mask * wtm - (1.0 - s1_mask) * NEG_BIG
        soft = jax.nn.softmax(masked, axis=1)
        wtrt = r @ params["wt"]
        r = jnp.sum(h_all * soft[:, :, None], axis=1) + jnp.tanh(wtrt)
        rts.append(r)
    Rt = jnp.stack(rts, 1)
    rn = Rt[bidx, s2_last, :]
    hn = out_seq[bidx, s2_last, :]
    return jnp.tanh(rn @ params["wp"] + hn @ params["wx"])


if __name__ == "__main__":
    key = jax.random.PRNGKey(0)
    keys = jax.random.split(key, 20)
    vect_len = 20
    V = vect_len + 4          # nn.Embedding(vect_len + 4, 50)

    def kaiming(k, shape):
        return jax.random.normal(k, shape, jnp.float32) * jnp.sqrt(2.0 / shape[0])

    params = {
        "embedding": jax.random.normal(keys[0], (V, E_EMB), jnp.float32) * 0.3,
        "w_ih1": jax.random.normal(keys[1], (4 * E, E_EMB), jnp.float32) * 0.1,
        "w_hh1": jax.random.normal(keys[2], (4 * E, E), jnp.float32) * 0.1,
        "b_ih1": jax.random.normal(keys[3], (4 * E,), jnp.float32) * 0.1,
        "b_hh1": jax.random.normal(keys[4], (4 * E,), jnp.float32) * 0.1,
        "w_ih2": jax.random.normal(keys[5], (4 * E, E_EMB), jnp.float32) * 0.1,
        "w_hh2": jax.random.normal(keys[6], (4 * E, E), jnp.float32) * 0.1,
        "b_ih2": jax.random.normal(keys[7], (4 * E,), jnp.float32) * 0.1,
        "b_hh2": jax.random.normal(keys[8], (4 * E,), jnp.float32) * 0.1,
        "wy": kaiming(keys[9], (E, E)),
        "wh": kaiming(keys[10], (E, E)),
        "wp": kaiming(keys[11], (E, E)),
        "wx": kaiming(keys[12], (E, E)),
        "wr": kaiming(keys[13], (E, E)),
        "wt": kaiming(keys[14], (E, E)),
        "w": jax.random.normal(keys[15], (E,), jnp.float32),
    }

    B, S = 2, 8
    sentence1 = jax.random.randint(keys[16], (B, S), 0, V, dtype=jnp.int32)
    sentence2 = jax.random.randint(keys[17], (B, S), 0, V, dtype=jnp.int32)
    s1_lengths = jnp.array([8, 5], jnp.int32)
    s2_lengths = jnp.array([6, 8], jnp.int32)
    s1_last = s1_lengths - 1      # role of torch's s1_len gather index
    s2_last = s2_lengths - 1      # role of torch's s2_len gather index
    s1_mask = (jnp.arange(S)[None, :] < s1_lengths[:, None]).astype(jnp.float32)

    out = wbw_attention_two_way(params, sentence1, sentence2,
                                s1_last, s2_last, s1_mask)
    out = jax.block_until_ready(out)

    ref = reference_forward(params, sentence1, sentence2,
                            s1_last, s2_last, s1_mask)
    np.testing.assert_allclose(np.asarray(out), np.asarray(ref),
                               rtol=2e-3, atol=2e-3)
    print("KERNEL_OK")
</pallas_src>

<mosaic_0001>
module attributes {stable_mosaic.version = 11 : i64} {
  func.func @wbw_kernel(%arg0: memref<2x8x64xf32, #tpu.memory_space<vmem>>, %arg1: memref<2x8x64xf32, #tpu.memory_space<vmem>>, %arg2: memref<64x256xf32, #tpu.memory_space<vmem>>, %arg3: memref<64x256xf32, #tpu.memory_space<vmem>>, %arg4: memref<1x256xf32, #tpu.memory_space<vmem>>, %arg5: memref<64x256xf32, #tpu.memory_space<vmem>>, %arg6: memref<64x256xf32, #tpu.memory_space<vmem>>, %arg7: memref<1x256xf32, #tpu.memory_space<vmem>>, %arg8: memref<128x64xf32, #tpu.memory_space<vmem>>, %arg9: memref<64x128xf32, #tpu.memory_space<vmem>>, %arg10: memref<128x64xf32, #tpu.memory_space<vmem>>, %arg11: memref<1x64xf32, #tpu.memory_space<vmem>>, %arg12: memref<2x8xf32, #tpu.memory_space<vmem>>, %arg13: memref<2x8xf32, #tpu.memory_space<vmem>>, %arg14: memref<2x8xf32, #tpu.memory_space<vmem>>, %arg15: memref<2x64xf32, #tpu.memory_space<vmem>>) attributes {dimension_semantics = [], scalar_prefetch = 0 : i64, scratch_operands = 0 : i64, tpu.core_type = #tpu.core_type<tc>} {
    %c0 = arith.constant 0 : index
    %c0_0 = arith.constant 0 : index
    %c0_1 = arith.constant 0 : index
    %0 = vector.load %arg0[%c0, %c0_0, %c0_1] : memref<2x8x64xf32, #tpu.memory_space<vmem>>, vector<2x8x64xf32>
    %1 = vector.shape_cast %0 : vector<2x8x64xf32> to vector<16x64xf32>
    %c0_2 = arith.constant 0 : index
    %c0_3 = arith.constant 0 : index
    %2 = vector.load %arg2[%c0_2, %c0_3] : memref<64x256xf32, #tpu.memory_space<vmem>>, vector<64x256xf32>
    %cst = arith.constant dense<0.000000e+00> : vector<16x256xf32>
    %3 = tpu.matmul %1, %2, %cst {dimension_numbers = #tpu.dot_dimension_numbers<[1], [0], [0], [1], [0, 0, 1, 1], [], []>} : vector<16x64xf32>, vector<64x256xf32>, vector<16x256xf32> -> vector<16x256xf32>
    %c0_4 = arith.constant 0 : index
    %c0_5 = arith.constant 0 : index
    %4 = vector.load %arg4[%c0_4, %c0_5] : memref<1x256xf32, #tpu.memory_space<vmem>>, vector<1x256xf32>
    %5 = vector.broadcast %4 : vector<1x256xf32> to vector<16x256xf32>
    %6 = arith.addf %3, %5 : vector<16x256xf32>
    %7 = vector.shape_cast %6 : vector<16x256xf32> to vector<2x8x256xf32>
    %c0_6 = arith.constant 0 : index
    %c0_7 = arith.constant 0 : index
    %c0_8 = arith.constant 0 : index
    %8 = vector.load %arg1[%c0_6, %c0_7, %c0_8] : memref<2x8x64xf32, #tpu.memory_space<vmem>>, vector<2x8x64xf32>
    %9 = vector.shape_cast %8 : vector<2x8x64xf32> to vector<16x64xf32>
    %c0_9 = arith.constant 0 : index
    %c0_10 = arith.constant 0 : index
    %10 = vector.load %arg5[%c0_9, %c0_10] : memref<64x256xf32, #tpu.memory_space<vmem>>, vector<64x256xf32>
    %cst_11 = arith.constant dense<0.000000e+00> : vector<16x256xf32>
    %11 = tpu.matmul %9, %10, %cst_11 {dimension_numbers = #tpu.dot_dimension_numbers<[1], [0], [0], [1], [0, 0, 1, 1], [], []>} : vector<16x64xf32>, vector<64x256xf32>, vector<16x256xf32> -> vector<16x256xf32>
    %c0_12 = arith.constant 0 : index
    %c0_13 = arith.constant 0 : index
    %12 = vector.load %arg7[%c0_12, %c0_13] : memref<1x256xf32, #tpu.memory_space<vmem>>, vector<1x256xf32>
    %13 = vector.broadcast %12 : vector<1x256xf32> to vector<16x256xf32>
    %14 = arith.addf %11, %13 : vector<16x256xf32>
    %15 = vector.shape_cast %14 : vector<16x256xf32> to vector<2x8x256xf32>
    %c0_14 = arith.constant 0 : index
    %c0_15 = arith.constant 0 : index
    %16 = vector.load %arg3[%c0_14, %c0_15] : memref<64x256xf32, #tpu.memory_space<vmem>>, vector<64x256xf32>
    %c0_16 = arith.constant 0 : index
    %c0_17 = arith.constant 0 : index
    %17 = vector.load %arg6[%c0_16, %c0_17] : memref<64x256xf32, #tpu.memory_space<vmem>>, vector<64x256xf32>
    %c0_18 = arith.constant 0 : index
    %c0_19 = arith.constant 0 : index
    %18 = vector.load %arg12[%c0_18, %c0_19] : memref<2x8xf32, #tpu.memory_space<vmem>>, vector<2x8xf32>
    %c0_20 = arith.constant 0 : index
    %c0_21 = arith.constant 0 : index
    %19 = vector.load %arg13[%c0_20, %c0_21] : memref<2x8xf32, #tpu.memory_space<vmem>>, vector<2x8xf32>
    %20 = tpu.iota {dimensions = array<i32: 1>} : vector<1x8x1xi32>
    %21 = tpu.iota {dimensions = array<i32: 1>} : vector<1x8x1xi32>
    %cst_22 = arith.constant 0.000000e+00 : f32
    %22 = vector.broadcast %cst_22 : f32 to vector<2x64xf32>
    %cst_23 = arith.constant 0.000000e+00 : f32
    %23 = vector.broadcast %cst_23 : f32 to vector<2x64xf32>
    %cst_24 = arith.constant 0.000000e+00 : f32
    %24 = vector.broadcast %cst_24 : f32 to vector<2x64xf32>
    %cst_25 = arith.constant 0.000000e+00 : f32
    %25 = vector.broadcast %cst_25 : f32 to vector<2x8x64xf32>
    %26 = vector.extract_strided_slice %7 {offsets = [0, 0, 0], sizes = [2, 1, 256], strides = [1, 1, 1]} : vector<2x8x256xf32> to vector<2x1x256xf32>
    %27 = vector.shape_cast %26 : vector<2x1x256xf32> to vector<2x256xf32>
    %cst_26 = arith.constant dense<0.000000e+00> : vector<2x256xf32>
    %28 = tpu.matmul %22, %16, %cst_26 {dimension_numbers = #tpu.dot_dimension_numbers<[1], [0], [0], [1], [0, 0, 1, 1], [], []>} : vector<2x64xf32>, vector<64x256xf32>, vector<2x256xf32> -> vector<2x256xf32>
    %29 = arith.addf %27, %28 : vector<2x256xf32>
    %30 = vector.extract_strided_slice %29 {offsets = [0, 0], sizes = [2, 192], strides = [1, 1]} : vector<2x256xf32> to vector<2x192xf32>
    %31 = arith.negf %30 : vector<2x192xf32>
    %32 = math.exp %31 : vector<2x192xf32>
    %cst_27 = arith.constant 1.000000e+00 : f32
    %33 = vector.broadcast %cst_27 : f32 to vector<2x192xf32>
    %34 = arith.addf %33, %32 : vector<2x192xf32>
    %35 = arith.divf %33, %34 : vector<2x192xf32>
    %36 = vector.extract_strided_slice %29 {offsets = [0, 192], sizes = [2, 64], strides = [1, 1]} : vector<2x256xf32> to vector<2x64xf32>
    %37 = math.tanh %36 : vector<2x64xf32>
    %38 = vector.extract_strided_slice %35 {offsets = [0, 0], sizes = [2, 64], strides = [1, 1]} : vector<2x192xf32> to vector<2x64xf32>
    %39 = vector.extract_strided_slice %35 {offsets = [0, 64], sizes = [2, 64], strides = [1, 1]} : vector<2x192xf32> to vector<2x64xf32>
    %40 = vector.extract_strided_slice %35 {offsets = [0, 128], sizes = [2, 64], strides = [1, 1]} : vector<2x192xf32> to vector<2x64xf32>
    %41 = arith.mulf %39, %23 : vector<2x64xf32>
    %42 = arith.mulf %38, %37 : vector<2x64xf32>
    %43 = arith.addf %41, %42 : vector<2x64xf32>
    %44 = math.tanh %43 : vector<2x64xf32>
    %45 = arith.mulf %40, %44 : vector<2x64xf32>
    %c0_i32 = arith.constant 0 : i32
    %46 = vector.broadcast %c0_i32 : i32 to vector<1x8x1xi32>
    %47 = arith.cmpi eq, %20, %46 : vector<1x8x1xi32>
    %48 = vector.shape_cast %45 : vector<2x64xf32> to vector<2x1x64xf32>
    %49 = vector.shape_cast %47 : vector<1x8x1xi1> to vector<1x8x1xi1>
    %50 = vector.broadcast %49 : vector<1x8x1xi1> to vector<2x8x64xi1>
    %51 = vector.shape_cast %48 : vector<2x1x64xf32> to vector<2x1x64xf32>
    %52 = vector.broadcast %51 : vector<2x1x64xf32> to vector<2x8x64xf32>
    %53 = arith.select %50, %52, %25 : vector<2x8x64xi1>, vector<2x8x64xf32>
    %54 = vector.extract_strided_slice %18 {offsets = [0, 0], sizes = [2, 1], strides = [1, 1]} : vector<2x8xf32> to vector<2x1xf32>
    %55 = vector.broadcast %54 : vector<2x1xf32> to vector<2x64xf32>
    %56 = arith.mulf %55, %43 : vector<2x64xf32>
    %57 = arith.addf %24, %56 : vector<2x64xf32>
    %58 = vector.extract_strided_slice %7 {offsets = [0, 1, 0], sizes = [2, 1, 256], strides = [1, 1, 1]} : vector<2x8x256xf32> to vector<2x1x256xf32>
    %59 = vector.shape_cast %58 : vector<2x1x256xf32> to vector<2x256xf32>
    %cst_28 = arith.constant dense<0.000000e+00> : vector<2x256xf32>
    %60 = tpu.matmul %45, %16, %cst_28 {dimension_numbers = #tpu.dot_dimension_numbers<[1], [0], [0], [1], [0, 0, 1, 1], [], []>} : vector<2x64xf32>, vector<64x256xf32>, vector<2x256xf32> -> vector<2x256xf32>
    %61 = arith.addf %59, %60 : vector<2x256xf32>
    %62 = vector.extract_strided_slice %61 {offsets = [0, 0], sizes = [2, 192], strides = [1, 1]} : vector<2x256xf32> to vector<2x192xf32>
    %63 = arith.negf %62 : vector<2x192xf32>
    %64 = math.exp %63 : vector<2x192xf32>
    %cst_29 = arith.constant 1.000000e+00 : f32
    %65 = vector.broadcast %cst_29 : f32 to vector<2x192xf32>
    %66 = arith.addf %65, %64 : vector<2x192xf32>
    %67 = arith.divf %65, %66 : vector<2x192xf32>
    %68 = vector.extract_strided_slice %61 {offsets = [0, 192], sizes = [2, 64], strides = [1, 1]} : vector<2x256xf32> to vector<2x64xf32>
    %69 = math.tanh %68 : vector<2x64xf32>
    %70 = vector.extract_strided_slice %67 {offsets = [0, 0], sizes = [2, 64], strides = [1, 1]} : vector<2x192xf32> to vector<2x64xf32>
    %71 = vector.extract_strided_slice %67 {offsets = [0, 64], sizes = [2, 64], strides = [1, 1]} : vector<2x192xf32> to vector<2x64xf32>
    %72 = vector.extract_strided_slice %67 {offsets = [0, 128], sizes = [2, 64], strides = [1, 1]} : vector<2x192xf32> to vector<2x64xf32>
    %73 = arith.mulf %71, %43 : vector<2x64xf32>
    %74 = arith.mulf %70, %69 : vector<2x64xf32>
    %75 = arith.addf %73, %74 : vector<2x64xf32>
    %76 = math.tanh %75 : vector<2x64xf32>
    %77 = arith.mulf %72, %76 : vector<2x64xf32>
    %c1_i32 = arith.constant 1 : i32
    %78 = vector.broadcast %c1_i32 : i32 to vector<1x8x1xi32>
    %79 = arith.cmpi eq, %20, %78 : vector<1x8x1xi32>
    %80 = vector.shape_cast %77 : vector<2x64xf32> to vector<2x1x64xf32>
    %81 = vector.shape_cast %79 : vector<1x8x1xi1> to vector<1x8x1xi1>
    %82 = vector.broadcast %81 : vector<1x8x1xi1> to vector<2x8x64xi1>
    %83 = vector.shape_cast %80 : vector<2x1x64xf32> to vector<2x1x64xf32>
    %84 = vector.broadcast %83 : vector<2x1x64xf32> to vector<2x8x64xf32>
    %85 = arith.select %82, %84, %53 : vector<2x8x64xi1>, vector<2x8x64xf32>
    %86 = vector.extract_strided_slice %18 {offsets = [0, 1], sizes = [2, 1], strides = [1, 1]} : vector<2x8xf32> to vector<2x1xf32>
    %87 = vector.broadcast %86 : vector<2x1xf32> to vector<2x64xf32>
    %88 = arith.mulf %87, %75 : vector<2x64xf32>
    %89 = arith.addf %57, %88 : vector<2x64xf32>
    %90 = vector.extract_strided_slice %7 {offsets = [0, 2, 0], sizes = [2, 1, 256], strides = [1, 1, 1]} : vector<2x8x256xf32> to vector<2x1x256xf32>
    %91 = vector.shape_cast %90 : vector<2x1x256xf32> to vector<2x256xf32>
    %cst_30 = arith.constant dense<0.000000e+00> : vector<2x256xf32>
    %92 = tpu.matmul %77, %16, %cst_30 {dimension_numbers = #tpu.dot_dimension_numbers<[1], [0], [0], [1], [0, 0, 1, 1], [], []>} : vector<2x64xf32>, vector<64x256xf32>, vector<2x256xf32> -> vector<2x256xf32>
    %93 = arith.addf %91, %92 : vector<2x256xf32>
    %94 = vector.extract_strided_slice %93 {offsets = [0, 0], sizes = [2, 192], strides = [1, 1]} : vector<2x256xf32> to vector<2x192xf32>
    %95 = arith.negf %94 : vector<2x192xf32>
    %96 = math.exp %95 : vector<2x192xf32>
    %cst_31 = arith.constant 1.000000e+00 : f32
    %97 = vector.broadcast %cst_31 : f32 to vector<2x192xf32>
    %98 = arith.addf %97, %96 : vector<2x192xf32>
    %99 = arith.divf %97, %98 : vector<2x192xf32>
    %100 = vector.extract_strided_slice %93 {offsets = [0, 192], sizes = [2, 64], strides = [1, 1]} : vector<2x256xf32> to vector<2x64xf32>
    %101 = math.tanh %100 : vector<2x64xf32>
    %102 = vector.extract_strided_slice %99 {offsets = [0, 0], sizes = [2, 64], strides = [1, 1]} : vector<2x192xf32> to vector<2x64xf32>
    %103 = vector.extract_strided_slice %99 {offsets = [0, 64], sizes = [2, 64], strides = [1, 1]} : vector<2x192xf32> to vector<2x64xf32>
    %104 = vector.extract_strided_slice %99 {offsets = [0, 128], sizes = [2, 64], strides = [1, 1]} : vector<2x192xf32> to vector<2x64xf32>
    %105 = arith.mulf %103, %75 : vector<2x64xf32>
    %106 = arith.mulf %102, %101 : vector<2x64xf32>
    %107 = arith.addf %105, %106 : vector<2x64xf32>
    %108 = math.tanh %107 : vector<2x64xf32>
    %109 = arith.mulf %104, %108 : vector<2x64xf32>
    %c2_i32 = arith.constant 2 : i32
    %110 = vector.broadcast %c2_i32 : i32 to vector<1x8x1xi32>
    %111 = arith.cmpi eq, %20, %110 : vector<1x8x1xi32>
    %112 = vector.shape_cast %109 : vector<2x64xf32> to vector<2x1x64xf32>
    %113 = vector.shape_cast %111 : vector<1x8x1xi1> to vector<1x8x1xi1>
    %114 = vector.broadcast %113 : vector<1x8x1xi1> to vector<2x8x64xi1>
    %115 = vector.shape_cast %112 : vector<2x1x64xf32> to vector<2x1x64xf32>
    %116 = vector.broadcast %115 : vector<2x1x64xf32> to vector<2x8x64xf32>
    %117 = arith.select %114, %116, %85 : vector<2x8x64xi1>, vector<2x8x64xf32>
    %118 = vector.extract_strided_slice %18 {offsets = [0, 2], sizes = [2, 1], strides = [1, 1]} : vector<2x8xf32> to vector<2x1xf32>
    %119 = vector.broadcast %118 : vector<2x1xf32> to vector<2x64xf32>
    %120 = arith.mulf %119, %107 : vector<2x64xf32>
    %121 = arith.addf %89, %120 : vector<2x64xf32>
    %122 = vector.extract_strided_slice %7 {offsets = [0, 3, 0], sizes = [2, 1, 256], strides = [1, 1, 1]} : vector<2x8x256xf32> to vector<2x1x256xf32>
    %123 = vector.shape_cast %122 : vector<2x1x256xf32> to vector<2x256xf32>
    %cst_32 = arith.constant dense<0.000000e+00> : vector<2x256xf32>
    %124 = tpu.matmul %109, %16, %cst_32 {dimension_numbers = #tpu.dot_dimension_numbers<[1], [0], [0], [1], [0, 0, 1, 1], [], []>} : vector<2x64xf32>, vector<64x256xf32>, vector<2x256xf32> -> vector<2x256xf32>
    %125 = arith.addf %123, %124 : vector<2x256xf32>
    %126 = vector.extract_strided_slice %125 {offsets = [0, 0], sizes = [2, 192], strides = [1, 1]} : vector<2x256xf32> to vector<2x192xf32>
    %127 = arith.negf %126 : vector<2x192xf32>
    %128 = math.exp %127 : vector<2x192xf32>
    %cst_33 = arith.constant 1.000000e+00 : f32
    %129 = vector.broadcast %cst_33 : f32 to vector<2x192xf32>
    %130 = arith.addf %129, %128 : vector<2x192xf32>
    %131 = arith.divf %129, %130 : vector<2x192xf32>
    %132 = vector.extract_strided_slice %125 {offsets = [0, 192], sizes = [2, 64], strides = [1, 1]} : vector<2x256xf32> to vector<2x64xf32>
    %133 = math.tanh %132 : vector<2x64xf32>
    %134 = vector.extract_strided_slice %131 {offsets = [0, 0], sizes = [2, 64], strides = [1, 1]} : vector<2x192xf32> to vector<2x64xf32>
    %135 = vector.extract_strided_slice %131 {offsets = [0, 64], sizes = [2, 64], strides = [1, 1]} : vector<2x192xf32> to vector<2x64xf32>
    %136 = vector.extract_strided_slice %131 {offsets = [0, 128], sizes = [2, 64], strides = [1, 1]} : vector<2x192xf32> to vector<2x64xf32>
    %137 = arith.mulf %135, %107 : vector<2x64xf32>
    %138 = arith.mulf %134, %133 : vector<2x64xf32>
    %139 = arith.addf %137, %138 : vector<2x64xf32>
    %140 = math.tanh %139 : vector<2x64xf32>
    %141 = arith.mulf %136, %140 : vector<2x64xf32>
    %c3_i32 = arith.constant 3 : i32
    %142 = vector.broadcast %c3_i32 : i32 to vector<1x8x1xi32>
    %143 = arith.cmpi eq, %20, %142 : vector<1x8x1xi32>
    %144 = vector.shape_cast %141 : vector<2x64xf32> to vector<2x1x64xf32>
    %145 = vector.shape_cast %143 : vector<1x8x1xi1> to vector<1x8x1xi1>
    %146 = vector.broadcast %145 : vector<1x8x1xi1> to vector<2x8x64xi1>
    %147 = vector.shape_cast %144 : vector<2x1x64xf32> to vector<2x1x64xf32>
    %148 = vector.broadcast %147 : vector<2x1x64xf32> to vector<2x8x64xf32>
    %149 = arith.select %146, %148, %117 : vector<2x8x64xi1>, vector<2x8x64xf32>
    %150 = vector.extract_strided_slice %18 {offsets = [0, 3], sizes = [2, 1], strides = [1, 1]} : vector<2x8xf32> to vector<2x1xf32>
    %151 = vector.broadcast %150 : vector<2x1xf32> to vector<2x64xf32>
    %152 = arith.mulf %151, %139 : vector<2x64xf32>
    %153 = arith.addf %121, %152 : vector<2x64xf32>
    %154 = vector.extract_strided_slice %7 {offsets = [0, 4, 0], sizes = [2, 1, 256], strides = [1, 1, 1]} : vector<2x8x256xf32> to vector<2x1x256xf32>
    %155 = vector.shape_cast %154 : vector<2x1x256xf32> to vector<2x256xf32>
    %cst_34 = arith.constant dense<0.000000e+00> : vector<2x256xf32>
    %156 = tpu.matmul %141, %16, %cst_34 {dimension_numbers = #tpu.dot_dimension_numbers<[1], [0], [0], [1], [0, 0, 1, 1], [], []>} : vector<2x64xf32>, vector<64x256xf32>, vector<2x256xf32> -> vector<2x256xf32>
    %157 = arith.addf %155, %156 : vector<2x256xf32>
    %158 = vector.extract_strided_slice %157 {offsets = [0, 0], sizes = [2, 192], strides = [1, 1]} : vector<2x256xf32> to vector<2x192xf32>
    %159 = arith.negf %158 : vector<2x192xf32>
    %160 = math.exp %159 : vector<2x192xf32>
    %cst_35 = arith.constant 1.000000e+00 : f32
    %161 = vector.broadcast %cst_35 : f32 to vector<2x192xf32>
    %162 = arith.addf %161, %160 : vector<2x192xf32>
    %163 = arith.divf %161, %162 : vector<2x192xf32>
    %164 = vector.extract_strided_slice %157 {offsets = [0, 192], sizes = [2, 64], strides = [1, 1]} : vector<2x256xf32> to vector<2x64xf32>
    %165 = math.tanh %164 : vector<2x64xf32>
    %166 = vector.extract_strided_slice %163 {offsets = [0, 0], sizes = [2, 64], strides = [1, 1]} : vector<2x192xf32> to vector<2x64xf32>
    %167 = vector.extract_strided_slice %163 {offsets = [0, 64], sizes = [2, 64], strides = [1, 1]} : vector<2x192xf32> to vector<2x64xf32>
    %168 = vector.extract_strided_slice %163 {offsets = [0, 128], sizes = [2, 64], strides = [1, 1]} : vector<2x192xf32> to vector<2x64xf32>
    %169 = arith.mulf %167, %139 : vector<2x64xf32>
    %170 = arith.mulf %166, %165 : vector<2x64xf32>
    %171 = arith.addf %169, %170 : vector<2x64xf32>
    %172 = math.tanh %171 : vector<2x64xf32>
    %173 = arith.mulf %168, %172 : vector<2x64xf32>
    %c4_i32 = arith.constant 4 : i32
    %174 = vector.broadcast %c4_i32 : i32 to vector<1x8x1xi32>
    %175 = arith.cmpi eq, %20, %174 : vector<1x8x1xi32>
    %176 = vector.shape_cast %173 : vector<2x64xf32> to vector<2x1x64xf32>
    %177 = vector.shape_cast %175 : vector<1x8x1xi1> to vector<1x8x1xi1>
    %178 = vector.broadcast %177 : vector<1x8x1xi1> to vector<2x8x64xi1>
    %179 = vector.shape_cast %176 : vector<2x1x64xf32> to vector<2x1x64xf32>
    %180 = vector.broadcast %179 : vector<2x1x64xf32> to vector<2x8x64xf32>
    %181 = arith.select %178, %180, %149 : vector<2x8x64xi1>, vector<2x8x64xf32>
    %182 = vector.extract_strided_slice %18 {offsets = [0, 4], sizes = [2, 1], strides = [1, 1]} : vector<2x8xf32> to vector<2x1xf32>
    %183 = vector.broadcast %182 : vector<2x1xf32> to vector<2x64xf32>
    %184 = arith.mulf %183, %171 : vector<2x64xf32>
    %185 = arith.addf %153, %184 : vector<2x64xf32>
    %186 = vector.extract_strided_slice %7 {offsets = [0, 5, 0], sizes = [2, 1, 256], strides = [1, 1, 1]} : vector<2x8x256xf32> to vector<2x1x256xf32>
    %187 = vector.shape_cast %186 : vector<2x1x256xf32> to vector<2x256xf32>
    %cst_36 = arith.constant dense<0.000000e+00> : vector<2x256xf32>
    %188 = tpu.matmul %173, %16, %cst_36 {dimension_numbers = #tpu.dot_dimension_numbers<[1], [0], [0], [1], [0, 0, 1, 1], [], []>} : vector<2x64xf32>, vector<64x256xf32>, vector<2x256xf32> -> vector<2x256xf32>
    %189 = arith.addf %187, %188 : vector<2x256xf32>
    %190 = vector.extract_strided_slice %189 {offsets = [0, 0], sizes = [2, 192], strides = [1, 1]} : vector<2x256xf32> to vector<2x192xf32>
    %191 = arith.negf %190 : vector<2x192xf32>
    %192 = math.exp %191 : vector<2x192xf32>
    %cst_37 = arith.constant 1.000000e+00 : f32
    %193 = vector.broadcast %cst_37 : f32 to vector<2x192xf32>
    %194 = arith.addf %193, %192 : vector<2x192xf32>
    %195 = arith.divf %193, %194 : vector<2x192xf32>
    %196 = vector.extract_strided_slice %189 {offsets = [0, 192], sizes = [2, 64], strides = [1, 1]} : vector<2x256xf32> to vector<2x64xf32>
    %197 = math.tanh %196 : vector<2x64xf32>
    %198 = vector.extract_strided_slice %195 {offsets = [0, 0], sizes = [2, 64], strides = [1, 1]} : vector<2x192xf32> to vector<2x64xf32>
    %199 = vector.extract_strided_slice %195 {offsets = [0, 64], sizes = [2, 64], strides = [1, 1]} : vector<2x192xf32> to vector<2x64xf32>
    %200 = vector.extract_strided_slice %195 {offsets = [0, 128], sizes = [2, 64], strides = [1, 1]} : vector<2x192xf32> to vector<2x64xf32>
    %201 = arith.mulf %199, %171 : vector<2x64xf32>
    %202 = arith.mulf %198, %197 : vector<2x64xf32>
    %203 = arith.addf %201, %202 : vector<2x64xf32>
    %204 = math.tanh %203 : vector<2x64xf32>
    %205 = arith.mulf %200, %204 : vector<2x64xf32>
    %c5_i32 = arith.constant 5 : i32
    %206 = vector.broadcast %c5_i32 : i32 to vector<1x8x1xi32>
    %207 = arith.cmpi eq, %20, %206 : vector<1x8x1xi32>
    %208 = vector.shape_cast %205 : vector<2x64xf32> to vector<2x1x64xf32>
    %209 = vector.shape_cast %207 : vector<1x8x1xi1> to vector<1x8x1xi1>
    %210 = vector.broadcast %209 : vector<1x8x1xi1> to vector<2x8x64xi1>
    %211 = vector.shape_cast %208 : vector<2x1x64xf32> to vector<2x1x64xf32>
    %212 = vector.broadcast %211 : vector<2x1x64xf32> to vector<2x8x64xf32>
    %213 = arith.select %210, %212, %181 : vector<2x8x64xi1>, vector<2x8x64xf32>
    %214 = vector.extract_strided_slice %18 {offsets = [0, 5], sizes = [2, 1], strides = [1, 1]} : vector<2x8xf32> to vector<2x1xf32>
    %215 = vector.broadcast %214 : vector<2x1xf32> to vector<2x64xf32>
    %216 = arith.mulf %215, %203 : vector<2x64xf32>
    %217 = arith.addf %185, %216 : vector<2x64xf32>
    %218 = vector.extract_strided_slice %7 {offsets = [0, 6, 0], sizes = [2, 1, 256], strides = [1, 1, 1]} : vector<2x8x256xf32> to vector<2x1x256xf32>
    %219 = vector.shape_cast %218 : vector<2x1x256xf32> to vector<2x256xf32>
    %cst_38 = arith.constant dense<0.000000e+00> : vector<2x256xf32>
    %220 = tpu.matmul %205, %16, %cst_38 {dimension_numbers = #tpu.dot_dimension_numbers<[1], [0], [0], [1], [0, 0, 1, 1], [], []>} : vector<2x64xf32>, vector<64x256xf32>, vector<2x256xf32> -> vector<2x256xf32>
    %221 = arith.addf %219, %220 : vector<2x256xf32>
    %222 = vector.extract_strided_slice %221 {offsets = [0, 0], sizes = [2, 192], strides = [1, 1]} : vector<2x256xf32> to vector<2x192xf32>
    %223 = arith.negf %222 : vector<2x192xf32>
    %224 = math.exp %223 : vector<2x192xf32>
    %cst_39 = arith.constant 1.000000e+00 : f32
    %225 = vector.broadcast %cst_39 : f32 to vector<2x192xf32>
    %226 = arith.addf %225, %224 : vector<2x192xf32>
    %227 = arith.divf %225, %226 : vector<2x192xf32>
    %228 = vector.extract_strided_slice %221 {offsets = [0, 192], sizes = [2, 64], strides = [1, 1]} : vector<2x256xf32> to vector<2x64xf32>
    %229 = math.tanh %228 : vector<2x64xf32>
    %230 = vector.extract_strided_slice %227 {offsets = [0, 0], sizes = [2, 64], strides = [1, 1]} : vector<2x192xf32> to vector<2x64xf32>
    %231 = vector.extract_strided_slice %227 {offsets = [0, 64], sizes = [2, 64], strides = [1, 1]} : vector<2x192xf32> to vector<2x64xf32>
    %232 = vector.extract_strided_slice %227 {offsets = [0, 128], sizes = [2, 64], strides = [1, 1]} : vector<2x192xf32> to vector<2x64xf32>
    %233 = arith.mulf %231, %203 : vector<2x64xf32>
    %234 = arith.mulf %230, %229 : vector<2x64xf32>
    %235 = arith.addf %233, %234 : vector<2x64xf32>
    %236 = math.tanh %235 : vector<2x64xf32>
    %237 = arith.mulf %232, %236 : vector<2x64xf32>
    %c6_i32 = arith.constant 6 : i32
    %238 = vector.broadcast %c6_i32 : i32 to vector<1x8x1xi32>
    %239 = arith.cmpi eq, %20, %238 : vector<1x8x1xi32>
    %240 = vector.shape_cast %237 : vector<2x64xf32> to vector<2x1x64xf32>
    %241 = vector.shape_cast %239 : vector<1x8x1xi1> to vector<1x8x1xi1>
    %242 = vector.broadcast %241 : vector<1x8x1xi1> to vector<2x8x64xi1>
    %243 = vector.shape_cast %240 : vector<2x1x64xf32> to vector<2x1x64xf32>
    %244 = vector.broadcast %243 : vector<2x1x64xf32> to vector<2x8x64xf32>
    %245 = arith.select %242, %244, %213 : vector<2x8x64xi1>, vector<2x8x64xf32>
    %246 = vector.extract_strided_slice %18 {offsets = [0, 6], sizes = [2, 1], strides = [1, 1]} : vector<2x8xf32> to vector<2x1xf32>
    %247 = vector.broadcast %246 : vector<2x1xf32> to vector<2x64xf32>
    %248 = arith.mulf %247, %235 : vector<2x64xf32>
    %249 = arith.addf %217, %248 : vector<2x64xf32>
    %250 = vector.extract_strided_slice %7 {offsets = [0, 7, 0], sizes = [2, 1, 256], strides = [1, 1, 1]} : vector<2x8x256xf32> to vector<2x1x256xf32>
    %251 = vector.shape_cast %250 : vector<2x1x256xf32> to vector<2x256xf32>
    %cst_40 = arith.constant dense<0.000000e+00> : vector<2x256xf32>
    %252 = tpu.matmul %237, %16, %cst_40 {dimension_numbers = #tpu.dot_dimension_numbers<[1], [0], [0], [1], [0, 0, 1, 1], [], []>} : vector<2x64xf32>, vector<64x256xf32>, vector<2x256xf32> -> vector<2x256xf32>
    %253 = arith.addf %251, %252 : vector<2x256xf32>
    %254 = vector.extract_strided_slice %253 {offsets = [0, 0], sizes = [2, 192], strides = [1, 1]} : vector<2x256xf32> to vector<2x192xf32>
    %255 = arith.negf %254 : vector<2x192xf32>
    %256 = math.exp %255 : vector<2x192xf32>
    %cst_41 = arith.constant 1.000000e+00 : f32
    %257 = vector.broadcast %cst_41 : f32 to vector<2x192xf32>
    %258 = arith.addf %257, %256 : vector<2x192xf32>
    %259 = arith.divf %257, %258 : vector<2x192xf32>
    %260 = vector.extract_strided_slice %253 {offsets = [0, 192], sizes = [2, 64], strides = [1, 1]} : vector<2x256xf32> to vector<2x64xf32>
    %261 = math.tanh %260 : vector<2x64xf32>
    %262 = vector.extract_strided_slice %259 {offsets = [0, 0], sizes = [2, 64], strides = [1, 1]} : vector<2x192xf32> to vector<2x64xf32>
    %263 = vector.extract_strided_slice %259 {offsets = [0, 64], sizes = [2, 64], strides = [1, 1]} : vector<2x192xf32> to vector<2x64xf32>
    %264 = vector.extract_strided_slice %259 {offsets = [0, 128], sizes = [2, 64], strides = [1, 1]} : vector<2x192xf32> to vector<2x64xf32>
    %265 = arith.mulf %263, %235 : vector<2x64xf32>
    %266 = arith.mulf %262, %261 : vector<2x64xf32>
    %267 = arith.addf %265, %266 : vector<2x64xf32>
    %268 = math.tanh %267 : vector<2x64xf32>
    %269 = arith.mulf %264, %268 : vector<2x64xf32>
    %c7_i32 = arith.constant 7 : i32
    %270 = vector.broadcast %c7_i32 : i32 to vector<1x8x1xi32>
    %271 = arith.cmpi eq, %20, %270 : vector<1x8x1xi32>
    %272 = vector.shape_cast %269 : vector<2x64xf32> to vector<2x1x64xf32>
    %273 = vector.shape_cast %271 : vector<1x8x1xi1> to vector<1x8x1xi1>
    %274 = vector.broadcast %273 : vector<1x8x1xi1> to vector<2x8x64xi1>
    %275 = vector.shape_cast %272 : vector<2x1x64xf32> to vector<2x1x64xf32>
    %276 = vector.broadcast %275 : vector<2x1x64xf32> to vector<2x8x64xf32>
    %277 = arith.select %274, %276, %245 : vector<2x8x64xi1>, vector<2x8x64xf32>
    %278 = vector.extract_strided_slice %18 {offsets = [0, 7], sizes = [2, 1], strides = [1, 1]} : vector<2x8xf32> to vector<2x1xf32>
    %279 = vector.broadcast %278 : vector<2x1xf32> to vector<2x64xf32>
    %280 = arith.mulf %279, %267 : vector<2x64xf32>
    %281 = arith.addf %249, %280 : vector<2x64xf32>
    %282 = vector.shape_cast %18 : vector<2x8xf32> to vector<2x8x1xf32>
    %283 = vector.broadcast %282 : vector<2x8x1xf32> to vector<2x8x64xf32>
    %284 = arith.mulf %283, %277 : vector<2x8x64xf32>
    %cst_42 = arith.constant dense<0.000000e+00> : vector<2x64xf32>
    %285 = vector.multi_reduction <add>, %284, %cst_42 [1] : vector<2x8x64xf32> to vector<2x64xf32>
    %cst_43 = arith.constant 0.000000e+00 : f32
    %286 = vector.broadcast %cst_43 : f32 to vector<2x8x64xf32>
    %287 = vector.extract_strided_slice %15 {offsets = [0, 0, 0], sizes = [2, 1, 256], strides = [1, 1, 1]} : vector<2x8x256xf32> to vector<2x1x256xf32>
    %288 = vector.shape_cast %287 : vector<2x1x256xf32> to vector<2x256xf32>
    %cst_44 = arith.constant dense<0.000000e+00> : vector<2x256xf32>
    %289 = tpu.matmul %285, %17, %cst_44 {dimension_numbers = #tpu.dot_dimension_numbers<[1], [0], [0], [1], [0, 0, 1, 1], [], []>} : vector<2x64xf32>, vector<64x256xf32>, vector<2x256xf32> -> vector<2x256xf32>
    %290 = arith.addf %288, %289 : vector<2x256xf32>
    %291 = vector.extract_strided_slice %290 {offsets = [0, 0], sizes = [2, 192], strides = [1, 1]} : vector<2x256xf32> to vector<2x192xf32>
    %292 = arith.negf %291 : vector<2x192xf32>
    %293 = math.exp %292 : vector<2x192xf32>
    %cst_45 = arith.constant 1.000000e+00 : f32
    %294 = vector.broadcast %cst_45 : f32 to vector<2x192xf32>
    %295 = arith.addf %294, %293 : vector<2x192xf32>
    %296 = arith.divf %294, %295 : vector<2x192xf32>
    %297 = vector.extract_strided_slice %290 {offsets = [0, 192], sizes = [2, 64], strides = [1, 1]} : vector<2x256xf32> to vector<2x64xf32>
    %298 = math.tanh %297 : vector<2x64xf32>
    %299 = vector.extract_strided_slice %296 {offsets = [0, 0], sizes = [2, 64], strides = [1, 1]} : vector<2x192xf32> to vector<2x64xf32>
    %300 = vector.extract_strided_slice %296 {offsets = [0, 64], sizes = [2, 64], strides = [1, 1]} : vector<2x192xf32> to vector<2x64xf32>
    %301 = vector.extract_strided_slice %296 {offsets = [0, 128], sizes = [2, 64], strides = [1, 1]} : vector<2x192xf32> to vector<2x64xf32>
    %302 = arith.mulf %300, %281 : vector<2x64xf32>
    %303 = arith.mulf %299, %298 : vector<2x64xf32>
    %304 = arith.addf %302, %303 : vector<2x64xf32>
    %305 = math.tanh %304 : vector<2x64xf32>
    %306 = arith.mulf %301, %305 : vector<2x64xf32>
    %c0_i32_46 = arith.constant 0 : i32
    %307 = vector.broadcast %c0_i32_46 : i32 to vector<1x8x1xi32>
    %308 = arith.cmpi eq, %21, %307 : vector<1x8x1xi32>
    %309 = vector.shape_cast %306 : vector<2x64xf32> to vector<2x1x64xf32>
    %310 = vector.shape_cast %308 : vector<1x8x1xi1> to vector<1x8x1xi1>
    %311 = vector.broadcast %310 : vector<1x8x1xi1> to vector<2x8x64xi1>
    %312 = vector.shape_cast %309 : vector<2x1x64xf32> to vector<2x1x64xf32>
    %313 = vector.broadcast %312 : vector<2x1x64xf32> to vector<2x8x64xf32>
    %314 = arith.select %311, %313, %286 : vector<2x8x64xi1>, vector<2x8x64xf32>
    %315 = vector.extract_strided_slice %15 {offsets = [0, 1, 0], sizes = [2, 1, 256], strides = [1, 1, 1]} : vector<2x8x256xf32> to vector<2x1x256xf32>
    %316 = vector.shape_cast %315 : vector<2x1x256xf32> to vector<2x256xf32>
    %cst_47 = arith.constant dense<0.000000e+00> : vector<2x256xf32>
    %317 = tpu.matmul %306, %17, %cst_47 {dimension_numbers = #tpu.dot_dimension_numbers<[1], [0], [0], [1], [0, 0, 1, 1], [], []>} : vector<2x64xf32>, vector<64x256xf32>, vector<2x256xf32> -> vector<2x256xf32>
    %318 = arith.addf %316, %317 : vector<2x256xf32>
    %319 = vector.extract_strided_slice %318 {offsets = [0, 0], sizes = [2, 192], strides = [1, 1]} : vector<2x256xf32> to vector<2x192xf32>
    %320 = arith.negf %319 : vector<2x192xf32>
    %321 = math.exp %320 : vector<2x192xf32>
    %cst_48 = arith.constant 1.000000e+00 : f32
    %322 = vector.broadcast %cst_48 : f32 to vector<2x192xf32>
    %323 = arith.addf %322, %321 : vector<2x192xf32>
    %324 = arith.divf %322, %323 : vector<2x192xf32>
    %325 = vector.extract_strided_slice %318 {offsets = [0, 192], sizes = [2, 64], strides = [1, 1]} : vector<2x256xf32> to vector<2x64xf32>
    %326 = math.tanh %325 : vector<2x64xf32>
    %327 = vector.extract_strided_slice %324 {offsets = [0, 0], sizes = [2, 64], strides = [1, 1]} : vector<2x192xf32> to vector<2x64xf32>
    %328 = vector.extract_strided_slice %324 {offsets = [0, 64], sizes = [2, 64], strides = [1, 1]} : vector<2x192xf32> to vector<2x64xf32>
    %329 = vector.extract_strided_slice %324 {offsets = [0, 128], sizes = [2, 64], strides = [1, 1]} : vector<2x192xf32> to vector<2x64xf32>
    %330 = arith.mulf %328, %304 : vector<2x64xf32>
    %331 = arith.mulf %327, %326 : vector<2x64xf32>
    %332 = arith.addf %330, %331 : vector<2x64xf32>
    %333 = math.tanh %332 : vector<2x64xf32>
    %334 = arith.mulf %329, %333 : vector<2x64xf32>
    %c1_i32_49 = arith.constant 1 : i32
    %335 = vector.broadcast %c1_i32_49 : i32 to vector<1x8x1xi32>
    %336 = arith.cmpi eq, %21, %335 : vector<1x8x1xi32>
    %337 = vector.shape_cast %334 : vector<2x64xf32> to vector<2x1x64xf32>
    %338 = vector.shape_cast %336 : vector<1x8x1xi1> to vector<1x8x1xi1>
    %339 = vector.broadcast %338 : vector<1x8x1xi1> to vector<2x8x64xi1>
    %340 = vector.shape_cast %337 : vector<2x1x64xf32> to vector<2x1x64xf32>
    %341 = vector.broadcast %340 : vector<2x1x64xf32> to vector<2x8x64xf32>
    %342 = arith.select %339, %341, %314 : vector<2x8x64xi1>, vector<2x8x64xf32>
    %343 = vector.extract_strided_slice %15 {offsets = [0, 2, 0], sizes = [2, 1, 256], strides = [1, 1, 1]} : vector<2x8x256xf32> to vector<2x1x256xf32>
    %344 = vector.shape_cast %343 : vector<2x1x256xf32> to vector<2x256xf32>
    %cst_50 = arith.constant dense<0.000000e+00> : vector<2x256xf32>
    %345 = tpu.matmul %334, %17, %cst_50 {dimension_numbers = #tpu.dot_dimension_numbers<[1], [0], [0], [1], [0, 0, 1, 1], [], []>} : vector<2x64xf32>, vector<64x256xf32>, vector<2x256xf32> -> vector<2x256xf32>
    %346 = arith.addf %344, %345 : vector<2x256xf32>
    %347 = vector.extract_strided_slice %346 {offsets = [0, 0], sizes = [2, 192], strides = [1, 1]} : vector<2x256xf32> to vector<2x192xf32>
    %348 = arith.negf %347 : vector<2x192xf32>
    %349 = math.exp %348 : vector<2x192xf32>
    %cst_51 = arith.constant 1.000000e+00 : f32
    %350 = vector.broadcast %cst_51 : f32 to vector<2x192xf32>
    %351 = arith.addf %350, %349 : vector<2x192xf32>
    %352 = arith.divf %350, %351 : vector<2x192xf32>
    %353 = vector.extract_strided_slice %346 {offsets = [0, 192], sizes = [2, 64], strides = [1, 1]} : vector<2x256xf32> to vector<2x64xf32>
    %354 = math.tanh %353 : vector<2x64xf32>
    %355 = vector.extract_strided_slice %352 {offsets = [0, 0], sizes = [2, 64], strides = [1, 1]} : vector<2x192xf32> to vector<2x64xf32>
    %356 = vector.extract_strided_slice %352 {offsets = [0, 64], sizes = [2, 64], strides = [1, 1]} : vector<2x192xf32> to vector<2x64xf32>
    %357 = vector.extract_strided_slice %352 {offsets = [0, 128], sizes = [2, 64], strides = [1, 1]} : vector<2x192xf32> to vector<2x64xf32>
    %358 = arith.mulf %356, %332 : vector<2x64xf32>
    %359 = arith.mulf %355, %354 : vector<2x64xf32>
    %360 = arith.addf %358, %359 : vector<2x64xf32>
    %361 = math.tanh %360 : vector<2x64xf32>
    %362 = arith.mulf %357, %361 : vector<2x64xf32>
    %c2_i32_52 = arith.constant 2 : i32
    %363 = vector.broadcast %c2_i32_52 : i32 to vector<1x8x1xi32>
    %364 = arith.cmpi eq, %21, %363 : vector<1x8x1xi32>
    %365 = vector.shape_cast %362 : vector<2x64xf32> to vector<2x1x64xf32>
    %366 = vector.shape_cast %364 : vector<1x8x1xi1> to vector<1x8x1xi1>
    %367 = vector.broadcast %366 : vector<1x8x1xi1> to vector<2x8x64xi1>
    %368 = vector.shape_cast %365 : vector<2x1x64xf32> to vector<2x1x64xf32>
    %369 = vector.broadcast %368 : vector<2x1x64xf32> to vector<2x8x64xf32>
    %370 = arith.select %367, %369, %342 : vector<2x8x64xi1>, vector<2x8x64xf32>
    %371 = vector.extract_strided_slice %15 {offsets = [0, 3, 0], sizes = [2, 1, 256], strides = [1, 1, 1]} : vector<2x8x256xf32> to vector<2x1x256xf32>
    %372 = vector.shape_cast %371 : vector<2x1x256xf32> to vector<2x256xf32>
    %cst_53 = arith.constant dense<0.000000e+00> : vector<2x256xf32>
    %373 = tpu.matmul %362, %17, %cst_53 {dimension_numbers = #tpu.dot_dimension_numbers<[1], [0], [0], [1], [0, 0, 1, 1], [], []>} : vector<2x64xf32>, vector<64x256xf32>, vector<2x256xf32> -> vector<2x256xf32>
    %374 = arith.addf %372, %373 : vector<2x256xf32>
    %375 = vector.extract_strided_slice %374 {offsets = [0, 0], sizes = [2, 192], strides = [1, 1]} : vector<2x256xf32> to vector<2x192xf32>
    %376 = arith.negf %375 : vector<2x192xf32>
    %377 = math.exp %376 : vector<2x192xf32>
    %cst_54 = arith.constant 1.000000e+00 : f32
    %378 = vector.broadcast %cst_54 : f32 to vector<2x192xf32>
    %379 = arith.addf %378, %377 : vector<2x192xf32>
    %380 = arith.divf %378, %379 : vector<2x192xf32>
    %381 = vector.extract_strided_slice %374 {offsets = [0, 192], sizes = [2, 64], strides = [1, 1]} : vector<2x256xf32> to vector<2x64xf32>
    %382 = math.tanh %381 : vector<2x64xf32>
    %383 = vector.extract_strided_slice %380 {offsets = [0, 0], sizes = [2, 64], strides = [1, 1]} : vector<2x192xf32> to vector<2x64xf32>
    %384 = vector.extract_strided_slice %380 {offsets = [0, 64], sizes = [2, 64], strides = [1, 1]} : vector<2x192xf32> to vector<2x64xf32>
    %385 = vector.extract_strided_slice %380 {offsets = [0, 128], sizes = [2, 64], strides = [1, 1]} : vector<2x192xf32> to vector<2x64xf32>
    %386 = arith.mulf %384, %360 : vector<2x64xf32>
    %387 = arith.mulf %383, %382 : vector<2x64xf32>
    %388 = arith.addf %386, %387 : vector<2x64xf32>
    %389 = math.tanh %388 : vector<2x64xf32>
    %390 = arith.mulf %385, %389 : vector<2x64xf32>
    %c3_i32_55 = arith.constant 3 : i32
    %391 = vector.broadcast %c3_i32_55 : i32 to vector<1x8x1xi32>
    %392 = arith.cmpi eq, %21, %391 : vector<1x8x1xi32>
    %393 = vector.shape_cast %390 : vector<2x64xf32> to vector<2x1x64xf32>
    %394 = vector.shape_cast %392 : vector<1x8x1xi1> to vector<1x8x1xi1>
    %395 = vector.broadcast %394 : vector<1x8x1xi1> to vector<2x8x64xi1>
    %396 = vector.shape_cast %393 : vector<2x1x64xf32> to vector<2x1x64xf32>
    %397 = vector.broadcast %396 : vector<2x1x64xf32> to vector<2x8x64xf32>
    %398 = arith.select %395, %397, %370 : vector<2x8x64xi1>, vector<2x8x64xf32>
    %399 = vector.extract_strided_slice %15 {offsets = [0, 4, 0], sizes = [2, 1, 256], strides = [1, 1, 1]} : vector<2x8x256xf32> to vector<2x1x256xf32>
    %400 = vector.shape_cast %399 : vector<2x1x256xf32> to vector<2x256xf32>
    %cst_56 = arith.constant dense<0.000000e+00> : vector<2x256xf32>
    %401 = tpu.matmul %390, %17, %cst_56 {dimension_numbers = #tpu.dot_dimension_numbers<[1], [0], [0], [1], [0, 0, 1, 1], [], []>} : vector<2x64xf32>, vector<64x256xf32>, vector<2x256xf32> -> vector<2x256xf32>
    %402 = arith.addf %400, %401 : vector<2x256xf32>
    %403 = vector.extract_strided_slice %402 {offsets = [0, 0], sizes = [2, 192], strides = [1, 1]} : vector<2x256xf32> to vector<2x192xf32>
    %404 = arith.negf %403 : vector<2x192xf32>
    %405 = math.exp %404 : vector<2x192xf32>
    %cst_57 = arith.constant 1.000000e+00 : f32
    %406 = vector.broadcast %cst_57 : f32 to vector<2x192xf32>
    %407 = arith.addf %406, %405 : vector<2x192xf32>
    %408 = arith.divf %406, %407 : vector<2x192xf32>
    %409 = vector.extract_strided_slice %402 {offsets = [0, 192], sizes = [2, 64], strides = [1, 1]} : vector<2x256xf32> to vector<2x64xf32>
    %410 = math.tanh %409 : vector<2x64xf32>
    %411 = vector.extract_strided_slice %408 {offsets = [0, 0], sizes = [2, 64], strides = [1, 1]} : vector<2x192xf32> to vector<2x64xf32>
    %412 = vector.extract_strided_slice %408 {offsets = [0, 64], sizes = [2, 64], strides = [1, 1]} : vector<2x192xf32> to vector<2x64xf32>
    %413 = vector.extract_strided_slice %408 {offsets = [0, 128], sizes = [2, 64], strides = [1, 1]} : vector<2x192xf32> to vector<2x64xf32>
    %414 = arith.mulf %412, %388 : vector<2x64xf32>
    %415 = arith.mulf %411, %410 : vector<2x64xf32>
    %416 = arith.addf %414, %415 : vector<2x64xf32>
    %417 = math.tanh %416 : vector<2x64xf32>
    %418 = arith.mulf %413, %417 : vector<2x64xf32>
    %c4_i32_58 = arith.constant 4 : i32
    %419 = vector.broadcast %c4_i32_58 : i32 to vector<1x8x1xi32>
    %420 = arith.cmpi eq, %21, %419 : vector<1x8x1xi32>
    %421 = vector.shape_cast %418 : vector<2x64xf32> to vector<2x1x64xf32>
    %422 = vector.shape_cast %420 : vector<1x8x1xi1> to vector<1x8x1xi1>
    %423 = vector.broadcast %422 : vector<1x8x1xi1> to vector<2x8x64xi1>
    %424 = vector.shape_cast %421 : vector<2x1x64xf32> to vector<2x1x64xf32>
    %425 = vector.broadcast %424 : vector<2x1x64xf32> to vector<2x8x64xf32>
    %426 = arith.select %423, %425, %398 : vector<2x8x64xi1>, vector<2x8x64xf32>
    %427 = vector.extract_strided_slice %15 {offsets = [0, 5, 0], sizes = [2, 1, 256], strides = [1, 1, 1]} : vector<2x8x256xf32> to vector<2x1x256xf32>
    %428 = vector.shape_cast %427 : vector<2x1x256xf32> to vector<2x256xf32>
    %cst_59 = arith.constant dense<0.000000e+00> : vector<2x256xf32>
    %429 = tpu.matmul %418, %17, %cst_59 {dimension_numbers = #tpu.dot_dimension_numbers<[1], [0], [0], [1], [0, 0, 1, 1], [], []>} : vector<2x64xf32>, vector<64x256xf32>, vector<2x256xf32> -> vector<2x256xf32>
    %430 = arith.addf %428, %429 : vector<2x256xf32>
    %431 = vector.extract_strided_slice %430 {offsets = [0, 0], sizes = [2, 192], strides = [1, 1]} : vector<2x256xf32> to vector<2x192xf32>
    %432 = arith.negf %431 : vector<2x192xf32>
    %433 = math.exp %432 : vector<2x192xf32>
    %cst_60 = arith.constant 1.000000e+00 : f32
    %434 = vector.broadcast %cst_60 : f32 to vector<2x192xf32>
    %435 = arith.addf %434, %433 : vector<2x192xf32>
    %436 = arith.divf %434, %435 : vector<2x192xf32>
    %437 = vector.extract_strided_slice %430 {offsets = [0, 192], sizes = [2, 64], strides = [1, 1]} : vector<2x256xf32> to vector<2x64xf32>
    %438 = math.tanh %437 : vector<2x64xf32>
    %439 = vector.extract_strided_slice %436 {offsets = [0, 0], sizes = [2, 64], strides = [1, 1]} : vector<2x192xf32> to vector<2x64xf32>
    %440 = vector.extract_strided_slice %436 {offsets = [0, 64], sizes = [2, 64], strides = [1, 1]} : vector<2x192xf32> to vector<2x64xf32>
    %441 = vector.extract_strided_slice %436 {offsets = [0, 128], sizes = [2, 64], strides = [1, 1]} : vector<2x192xf32> to vector<2x64xf32>
    %442 = arith.mulf %440, %416 : vector<2x64xf32>
    %443 = arith.mulf %439, %438 : vector<2x64xf32>
    %444 = arith.addf %442, %443 : vector<2x64xf32>
    %445 = math.tanh %444 : vector<2x64xf32>
    %446 = arith.mulf %441, %445 : vector<2x64xf32>
    %c5_i32_61 = arith.constant 5 : i32
    %447 = vector.broadcast %c5_i32_61 : i32 to vector<1x8x1xi32>
    %448 = arith.cmpi eq, %21, %447 : vector<1x8x1xi32>
    %449 = vector.shape_cast %446 : vector<2x64xf32> to vector<2x1x64xf32>
    %450 = vector.shape_cast %448 : vector<1x8x1xi1> to vector<1x8x1xi1>
    %451 = vector.broadcast %450 : vector<1x8x1xi1> to vector<2x8x64xi1>
    %452 = vector.shape_cast %449 : vector<2x1x64xf32> to vector<2x1x64xf32>
    %453 = vector.broadcast %452 : vector<2x1x64xf32> to vector<2x8x64xf32>
    %454 = arith.select %451, %453, %426 : vector<2x8x64xi1>, vector<2x8x64xf32>
    %455 = vector.extract_strided_slice %15 {offsets = [0, 6, 0], sizes = [2, 1, 256], strides = [1, 1, 1]} : vector<2x8x256xf32> to vector<2x1x256xf32>
    %456 = vector.shape_cast %455 : vector<2x1x256xf32> to vector<2x256xf32>
    %cst_62 = arith.constant dense<0.000000e+00> : vector<2x256xf32>
    %457 = tpu.matmul %446, %17, %cst_62 {dimension_numbers = #tpu.dot_dimension_numbers<[1], [0], [0], [1], [0, 0, 1, 1], [], []>} : vector<2x64xf32>, vector<64x256xf32>, vector<2x256xf32> -> vector<2x256xf32>
    %458 = arith.addf %456, %457 : vector<2x256xf32>
    %459 = vector.extract_strided_slice %458 {offsets = [0, 0], sizes = [2, 192], strides = [1, 1]} : vector<2x256xf32> to vector<2x192xf32>
    %460 = arith.negf %459 : vector<2x192xf32>
    %461 = math.exp %460 : vector<2x192xf32>
    %cst_63 = arith.constant 1.000000e+00 : f32
    %462 = vector.broadcast %cst_63 : f32 to vector<2x192xf32>
    %463 = arith.addf %462, %461 : vector<2x192xf32>
    %464 = arith.divf %462, %463 : vector<2x192xf32>
    %465 = vector.extract_strided_slice %458 {offsets = [0, 192], sizes = [2, 64], strides = [1, 1]} : vector<2x256xf32> to vector<2x64xf32>
    %466 = math.tanh %465 : vector<2x64xf32>
    %467 = vector.extract_strided_slice %464 {offsets = [0, 0], sizes = [2, 64], strides = [1, 1]} : vector<2x192xf32> to vector<2x64xf32>
    %468 = vector.extract_strided_slice %464 {offsets = [0, 64], sizes = [2, 64], strides = [1, 1]} : vector<2x192xf32> to vector<2x64xf32>
    %469 = vector.extract_strided_slice %464 {offsets = [0, 128], sizes = [2, 64], strides = [1, 1]} : vector<2x192xf32> to vector<2x64xf32>
    %470 = arith.mulf %468, %444 : vector<2x64xf32>
    %471 = arith.mulf %467, %466 : vector<2x64xf32>
    %472 = arith.addf %470, %471 : vector<2x64xf32>
    %473 = math.tanh %472 : vector<2x64xf32>
    %474 = arith.mulf %469, %473 : vector<2x64xf32>
    %c6_i32_64 = arith.constant 6 : i32
    %475 = vector.broadcast %c6_i32_64 : i32 to vector<1x8x1xi32>
    %476 = arith.cmpi eq, %21, %475 : vector<1x8x1xi32>
    %477 = vector.shape_cast %474 : vector<2x64xf32> to vector<2x1x64xf32>
    %478 = vector.shape_cast %476 : vector<1x8x1xi1> to vector<1x8x1xi1>
    %479 = vector.broadcast %478 : vector<1x8x1xi1> to vector<2x8x64xi1>
    %480 = vector.shape_cast %477 : vector<2x1x64xf32> to vector<2x1x64xf32>
    %481 = vector.broadcast %480 : vector<2x1x64xf32> to vector<2x8x64xf32>
    %482 = arith.select %479, %481, %454 : vector<2x8x64xi1>, vector<2x8x64xf32>
    %483 = vector.extract_strided_slice %15 {offsets = [0, 7, 0], sizes = [2, 1, 256], strides = [1, 1, 1]} : vector<2x8x256xf32> to vector<2x1x256xf32>
    %484 = vector.shape_cast %483 : vector<2x1x256xf32> to vector<2x256xf32>
    %cst_65 = arith.constant dense<0.000000e+00> : vector<2x256xf32>
    %485 = tpu.matmul %474, %17, %cst_65 {dimension_numbers = #tpu.dot_dimension_numbers<[1], [0], [0], [1], [0, 0, 1, 1], [], []>} : vector<2x64xf32>, vector<64x256xf32>, vector<2x256xf32> -> vector<2x256xf32>
    %486 = arith.addf %484, %485 : vector<2x256xf32>
    %487 = vector.extract_strided_slice %486 {offsets = [0, 0], sizes = [2, 192], strides = [1, 1]} : vector<2x256xf32> to vector<2x192xf32>
    %488 = arith.negf %487 : vector<2x192xf32>
    %489 = math.exp %488 : vector<2x192xf32>
    %cst_66 = arith.constant 1.000000e+00 : f32
    %490 = vector.broadcast %cst_66 : f32 to vector<2x192xf32>
    %491 = arith.addf %490, %489 : vector<2x192xf32>
    %492 = arith.divf %490, %491 : vector<2x192xf32>
    %493 = vector.extract_strided_slice %486 {offsets = [0, 192], sizes = [2, 64], strides = [1, 1]} : vector<2x256xf32> to vector<2x64xf32>
    %494 = math.tanh %493 : vector<2x64xf32>
    %495 = vector.extract_strided_slice %492 {offsets = [0, 0], sizes = [2, 64], strides = [1, 1]} : vector<2x192xf32> to vector<2x64xf32>
    %496 = vector.extract_strided_slice %492 {offsets = [0, 64], sizes = [2, 64], strides = [1, 1]} : vector<2x192xf32> to vector<2x64xf32>
    %497 = vector.extract_strided_slice %492 {offsets = [0, 128], sizes = [2, 64], strides = [1, 1]} : vector<2x192xf32> to vector<2x64xf32>
    %498 = arith.mulf %496, %472 : vector<2x64xf32>
    %499 = arith.mulf %495, %494 : vector<2x64xf32>
    %500 = arith.addf %498, %499 : vector<2x64xf32>
    %501 = math.tanh %500 : vector<2x64xf32>
    %502 = arith.mulf %497, %501 : vector<2x64xf32>
    %c7_i32_67 = arith.constant 7 : i32
    %503 = vector.broadcast %c7_i32_67 : i32 to vector<1x8x1xi32>
    %504 = arith.cmpi eq, %21, %503 : vector<1x8x1xi32>
    %505 = vector.shape_cast %502 : vector<2x64xf32> to vector<2x1x64xf32>
    %506 = vector.shape_cast %504 : vector<1x8x1xi1> to vector<1x8x1xi1>
    %507 = vector.broadcast %506 : vector<1x8x1xi1> to vector<2x8x64xi1>
    %508 = vector.shape_cast %505 : vector<2x1x64xf32> to vector<2x1x64xf32>
    %509 = vector.broadcast %508 : vector<2x1x64xf32> to vector<2x8x64xf32>
    %510 = arith.select %507, %509, %482 : vector<2x8x64xi1>, vector<2x8x64xf32>
    %511 = vector.shape_cast %19 : vector<2x8xf32> to vector<2x8x1xf32>
    %512 = vector.broadcast %511 : vector<2x8x1xf32> to vector<2x8x64xf32>
    %513 = arith.mulf %512, %510 : vector<2x8x64xf32>
    %cst_68 = arith.constant dense<0.000000e+00> : vector<2x64xf32>
    %514 = vector.multi_reduction <add>, %513, %cst_68 [1] : vector<2x8x64xf32> to vector<2x64xf32>
    %c0_69 = arith.constant 0 : index
    %c0_70 = arith.constant 0 : index
    %515 = vector.load %arg9[%c0_69, %c0_70] : memref<64x128xf32, #tpu.memory_space<vmem>>, vector<64x128xf32>
    %c0_71 = arith.constant 0 : index
    %c0_72 = arith.constant 0 : index
    %516 = vector.load %arg14[%c0_71, %c0_72] : memref<2x8xf32, #tpu.memory_space<vmem>>, vector<2x8xf32>
    %cst_73 = arith.constant 1.000000e+00 : f32
    %517 = vector.broadcast %cst_73 : f32 to vector<2x8xf32>
    %518 = arith.subf %517, %516 : vector<2x8xf32>
    %cst_74 = arith.constant 9.99999995E+11 : f32
    %519 = vector.broadcast %cst_74 : f32 to vector<2x8xf32>
    %520 = arith.mulf %518, %519 : vector<2x8xf32>
    %c0_75 = arith.constant 0 : index
    %c0_76 = arith.constant 0 : index
    %521 = vector.load %arg11[%c0_75, %c0_76] : memref<1x64xf32, #tpu.memory_space<vmem>>, vector<1x64xf32>
    %522 = vector.shape_cast %521 : vector<1x64xf32> to vector<1x1x64xf32>
    %523 = vector.shape_cast %522 : vector<1x1x64xf32> to vector<1x1x64xf32>
    %524 = vector.broadcast %523 : vector<1x1x64xf32> to vector<2x8x64xf32>
    %525 = tpu.concatenate %277, %510 in 2 : vector<2x8x64xf32>, vector<2x8x64xf32> -> vector<2x8x128xf32>
    %526 = vector.shape_cast %525 : vector<2x8x128xf32> to vector<16x128xf32>
    %c0_77 = arith.constant 0 : index
    %c0_78 = arith.constant 0 : index
    %527 = vector.load %arg8[%c0_77, %c0_78] : memref<128x64xf32, #tpu.memory_space<vmem>>, vector<128x64xf32>
    %cst_79 = arith.constant dense<0.000000e+00> : vector<16x64xf32>
    %528 = tpu.matmul %526, %527, %cst_79 {dimension_numbers = #tpu.dot_dimension_numbers<[1], [0], [0], [1], [0, 0, 1, 1], [], []>} : vector<16x128xf32>, vector<128x64xf32>, vector<16x64xf32> -> vector<16x64xf32>
    %529 = vector.shape_cast %528 : vector<16x64xf32> to vector<2x8x64xf32>
    %cst_80 = arith.constant 0.000000e+00 : f32
    %530 = vector.broadcast %cst_80 : f32 to vector<2x64xf32>
    %cst_81 = arith.constant 0.000000e+00 : f32
    %531 = vector.broadcast %cst_81 : f32 to vector<2x64xf32>
    %cst_82 = arith.constant dense<0.000000e+00> : vector<2x128xf32>
    %532 = tpu.matmul %530, %515, %cst_82 {dimension_numbers = #tpu.dot_dimension_numbers<[1], [0], [0], [1], [0, 0, 1, 1], [], []>} : vector<2x64xf32>, vector<64x128xf32>, vector<2x128xf32> -> vector<2x128xf32>
    %533 = vector.extract_strided_slice %532 {offsets = [0, 0], sizes = [2, 64], strides = [1, 1]} : vector<2x128xf32> to vector<2x64xf32>
    %534 = vector.extract_strided_slice %532 {offsets = [0, 64], sizes = [2, 64], strides = [1, 1]} : vector<2x128xf32> to vector<2x64xf32>
    %535 = vector.shape_cast %533 : vector<2x64xf32> to vector<2x1x64xf32>
    %536 = vector.broadcast %535 : vector<2x1x64xf32> to vector<2x8x64xf32>
    %537 = arith.addf %529, %536 : vector<2x8x64xf32>
    %538 = math.tanh %537 : vector<2x8x64xf32>
    %539 = arith.mulf %538, %524 : vector<2x8x64xf32>
    %cst_83 = arith.constant dense<0.000000e+00> : vector<2x8xf32>
    %540 = vector.multi_reduction <add>, %539, %cst_83 [2] : vector<2x8x64xf32> to vector<2x8xf32>
    %541 = arith.mulf %516, %540 : vector<2x8xf32>
    %542 = arith.subf %541, %520 : vector<2x8xf32>
    %cst_84 = arith.constant dense<0xFF800000> : vector<2xf32>
    %543 = vector.multi_reduction <maximumf>, %542, %cst_84 [1] : vector<2x8xf32> to vector<2xf32>
    %cst_85 = arith.constant 0xFF800000 : f32
    %544 = vector.broadcast %cst_85 : f32 to vector<2xf32>
    %545 = arith.maximumf %544, %543 : vector<2xf32>
    %546 = vector.shape_cast %545 : vector<2xf32> to vector<2x1xf32>
    %547 = vector.broadcast %546 : vector<2x1xf32> to vector<2x8xf32>
    %548 = arith.subf %542, %547 : vector<2x8xf32>
    %549 = math.exp %548 : vector<2x8xf32>
    %cst_86 = arith.constant dense<0.000000e+00> : vector<2xf32>
    %550 = vector.multi_reduction <add>, %549, %cst_86 [1] : vector<2x8xf32> to vector<2xf32>
    %551 = vector.shape_cast %550 : vector<2xf32> to vector<2x1xf32>
    %552 = vector.broadcast %551 : vector<2x1xf32> to vector<2x8xf32>
    %553 = arith.divf %549, %552 : vector<2x8xf32>
    %554 = vector.shape_cast %553 : vector<2x8xf32> to vector<2x8x1xf32>
    %555 = vector.broadcast %554 : vector<2x8x1xf32> to vector<2x8x64xf32>
    %556 = arith.mulf %277, %555 : vector<2x8x64xf32>
    %cst_87 = arith.constant dense<0.000000e+00> : vector<2x64xf32>
    %557 = vector.multi_reduction <add>, %556, %cst_87 [1] : vector<2x8x64xf32> to vector<2x64xf32>
    %558 = math.tanh %534 : vector<2x64xf32>
    %559 = arith.addf %557, %558 : vector<2x64xf32>
    %560 = vector.extract_strided_slice %19 {offsets = [0, 0], sizes = [2, 1], strides = [1, 1]} : vector<2x8xf32> to vector<2x1xf32>
    %561 = vector.broadcast %560 : vector<2x1xf32> to vector<2x64xf32>
    %562 = arith.mulf %561, %559 : vector<2x64xf32>
    %563 = arith.addf %531, %562 : vector<2x64xf32>
    %cst_88 = arith.constant dense<0.000000e+00> : vector<2x128xf32>
    %564 = tpu.matmul %559, %515, %cst_88 {dimension_numbers = #tpu.dot_dimension_numbers<[1], [0], [0], [1], [0, 0, 1, 1], [], []>} : vector<2x64xf32>, vector<64x128xf32>, vector<2x128xf32> -> vector<2x128xf32>
    %565 = vector.extract_strided_slice %564 {offsets = [0, 0], sizes = [2, 64], strides = [1, 1]} : vector<2x128xf32> to vector<2x64xf32>
    %566 = vector.extract_strided_slice %564 {offsets = [0, 64], sizes = [2, 64], strides = [1, 1]} : vector<2x128xf32> to vector<2x64xf32>
    %567 = vector.shape_cast %565 : vector<2x64xf32> to vector<2x1x64xf32>
    %568 = vector.broadcast %567 : vector<2x1x64xf32> to vector<2x8x64xf32>
    %569 = arith.addf %529, %568 : vector<2x8x64xf32>
    %570 = math.tanh %569 : vector<2x8x64xf32>
    %571 = arith.mulf %570, %524 : vector<2x8x64xf32>
    %cst_89 = arith.constant dense<0.000000e+00> : vector<2x8xf32>
    %572 = vector.multi_reduction <add>, %571, %cst_89 [2] : vector<2x8x64xf32> to vector<2x8xf32>
    %573 = arith.mulf %516, %572 : vector<2x8xf32>
    %574 = arith.subf %573, %520 : vector<2x8xf32>
    %cst_90 = arith.constant dense<0xFF800000> : vector<2xf32>
    %575 = vector.multi_reduction <maximumf>, %574, %cst_90 [1] : vector<2x8xf32> to vector<2xf32>
    %cst_91 = arith.constant 0xFF800000 : f32
    %576 = vector.broadcast %cst_91 : f32 to vector<2xf32>
    %577 = arith.maximumf %576, %575 : vector<2xf32>
    %578 = vector.shape_cast %577 : vector<2xf32> to vector<2x1xf32>
    %579 = vector.broadcast %578 : vector<2x1xf32> to vector<2x8xf32>
    %580 = arith.subf %574, %579 : vector<2x8xf32>
    %581 = math.exp %580 : vector<2x8xf32>
    %cst_92 = arith.constant dense<0.000000e+00> : vector<2xf32>
    %582 = vector.multi_reduction <add>, %581, %cst_92 [1] : vector<2x8xf32> to vector<2xf32>
    %583 = vector.shape_cast %582 : vector<2xf32> to vector<2x1xf32>
    %584 = vector.broadcast %583 : vector<2x1xf32> to vector<2x8xf32>
    %585 = arith.divf %581, %584 : vector<2x8xf32>
    %586 = vector.shape_cast %585 : vector<2x8xf32> to vector<2x8x1xf32>
    %587 = vector.broadcast %586 : vector<2x8x1xf32> to vector<2x8x64xf32>
    %588 = arith.mulf %277, %587 : vector<2x8x64xf32>
    %cst_93 = arith.constant dense<0.000000e+00> : vector<2x64xf32>
    %589 = vector.multi_reduction <add>, %588, %cst_93 [1] : vector<2x8x64xf32> to vector<2x64xf32>
    %590 = math.tanh %566 : vector<2x64xf32>
    %591 = arith.addf %589, %590 : vector<2x64xf32>
    %592 = vector.extract_strided_slice %19 {offsets = [0, 1], sizes = [2, 1], strides = [1, 1]} : vector<2x8xf32> to vector<2x1xf32>
    %593 = vector.broadcast %592 : vector<2x1xf32> to vector<2x64xf32>
    %594 = arith.mulf %593, %591 : vector<2x64xf32>
    %595 = arith.addf %563, %594 : vector<2x64xf32>
    %cst_94 = arith.constant dense<0.000000e+00> : vector<2x128xf32>
    %596 = tpu.matmul %591, %515, %cst_94 {dimension_numbers = #tpu.dot_dimension_numbers<[1], [0], [0], [1], [0, 0, 1, 1], [], []>} : vector<2x64xf32>, vector<64x128xf32>, vector<2x128xf32> -> vector<2x128xf32>
    %597 = vector.extract_strided_slice %596 {offsets = [0, 0], sizes = [2, 64], strides = [1, 1]} : vector<2x128xf32> to vector<2x64xf32>
    %598 = vector.extract_strided_slice %596 {offsets = [0, 64], sizes = [2, 64], strides = [1, 1]} : vector<2x128xf32> to vector<2x64xf32>
    %599 = vector.shape_cast %597 : vector<2x64xf32> to vector<2x1x64xf32>
    %600 = vector.broadcast %599 : vector<2x1x64xf32> to vector<2x8x64xf32>
    %601 = arith.addf %529, %600 : vector<2x8x64xf32>
    %602 = math.tanh %601 : vector<2x8x64xf32>
    %603 = arith.mulf %602, %524 : vector<2x8x64xf32>
    %cst_95 = arith.constant dense<0.000000e+00> : vector<2x8xf32>
    %604 = vector.multi_reduction <add>, %603, %cst_95 [2] : vector<2x8x64xf32> to vector<2x8xf32>
    %605 = arith.mulf %516, %604 : vector<2x8xf32>
    %606 = arith.subf %605, %520 : vector<2x8xf32>
    %cst_96 = arith.constant dense<0xFF800000> : vector<2xf32>
    %607 = vector.multi_reduction <maximumf>, %606, %cst_96 [1] : vector<2x8xf32> to vector<2xf32>
    %cst_97 = arith.constant 0xFF800000 : f32
    %608 = vector.broadcast %cst_97 : f32 to vector<2xf32>
    %609 = arith.maximumf %608, %607 : vector<2xf32>
    %610 = vector.shape_cast %609 : vector<2xf32> to vector<2x1xf32>
    %611 = vector.broadcast %610 : vector<2x1xf32> to vector<2x8xf32>
    %612 = arith.subf %606, %611 : vector<2x8xf32>
    %613 = math.exp %612 : vector<2x8xf32>
    %cst_98 = arith.constant dense<0.000000e+00> : vector<2xf32>
    %614 = vector.multi_reduction <add>, %613, %cst_98 [1] : vector<2x8xf32> to vector<2xf32>
    %615 = vector.shape_cast %614 : vector<2xf32> to vector<2x1xf32>
    %616 = vector.broadcast %615 : vector<2x1xf32> to vector<2x8xf32>
    %617 = arith.divf %613, %616 : vector<2x8xf32>
    %618 = vector.shape_cast %617 : vector<2x8xf32> to vector<2x8x1xf32>
    %619 = vector.broadcast %618 : vector<2x8x1xf32> to vector<2x8x64xf32>
    %620 = arith.mulf %277, %619 : vector<2x8x64xf32>
    %cst_99 = arith.constant dense<0.000000e+00> : vector<2x64xf32>
    %621 = vector.multi_reduction <add>, %620, %cst_99 [1] : vector<2x8x64xf32> to vector<2x64xf32>
    %622 = math.tanh %598 : vector<2x64xf32>
    %623 = arith.addf %621, %622 : vector<2x64xf32>
    %624 = vector.extract_strided_slice %19 {offsets = [0, 2], sizes = [2, 1], strides = [1, 1]} : vector<2x8xf32> to vector<2x1xf32>
    %625 = vector.broadcast %624 : vector<2x1xf32> to vector<2x64xf32>
    %626 = arith.mulf %625, %623 : vector<2x64xf32>
    %627 = arith.addf %595, %626 : vector<2x64xf32>
    %cst_100 = arith.constant dense<0.000000e+00> : vector<2x128xf32>
    %628 = tpu.matmul %623, %515, %cst_100 {dimension_numbers = #tpu.dot_dimension_numbers<[1], [0], [0], [1], [0, 0, 1, 1], [], []>} : vector<2x64xf32>, vector<64x128xf32>, vector<2x128xf32> -> vector<2x128xf32>
    %629 = vector.extract_strided_slice %628 {offsets = [0, 0], sizes = [2, 64], strides = [1, 1]} : vector<2x128xf32> to vector<2x64xf32>
    %630 = vector.extract_strided_slice %628 {offsets = [0, 64], sizes = [2, 64], strides = [1, 1]} : vector<2x128xf32> to vector<2x64xf32>
    %631 = vector.shape_cast %629 : vector<2x64xf32> to vector<2x1x64xf32>
    %632 = vector.broadcast %631 : vector<2x1x64xf32> to vector<2x8x64xf32>
    %633 = arith.addf %529, %632 : vector<2x8x64xf32>
    %634 = math.tanh %633 : vector<2x8x64xf32>
    %635 = arith.mulf %634, %524 : vector<2x8x64xf32>
    %cst_101 = arith.constant dense<0.000000e+00> : vector<2x8xf32>
    %636 = vector.multi_reduction <add>, %635, %cst_101 [2] : vector<2x8x64xf32> to vector<2x8xf32>
    %637 = arith.mulf %516, %636 : vector<2x8xf32>
    %638 = arith.subf %637, %520 : vector<2x8xf32>
    %cst_102 = arith.constant dense<0xFF800000> : vector<2xf32>
    %639 = vector.multi_reduction <maximumf>, %638, %cst_102 [1] : vector<2x8xf32> to vector<2xf32>
    %cst_103 = arith.constant 0xFF800000 : f32
    %640 = vector.broadcast %cst_103 : f32 to vector<2xf32>
    %641 = arith.maximumf %640, %639 : vector<2xf32>
    %642 = vector.shape_cast %641 : vector<2xf32> to vector<2x1xf32>
    %643 = vector.broadcast %642 : vector<2x1xf32> to vector<2x8xf32>
    %644 = arith.subf %638, %643 : vector<2x8xf32>
    %645 = math.exp %644 : vector<2x8xf32>
    %cst_104 = arith.constant dense<0.000000e+00> : vector<2xf32>
    %646 = vector.multi_reduction <add>, %645, %cst_104 [1] : vector<2x8xf32> to vector<2xf32>
    %647 = vector.shape_cast %646 : vector<2xf32> to vector<2x1xf32>
    %648 = vector.broadcast %647 : vector<2x1xf32> to vector<2x8xf32>
    %649 = arith.divf %645, %648 : vector<2x8xf32>
    %650 = vector.shape_cast %649 : vector<2x8xf32> to vector<2x8x1xf32>
    %651 = vector.broadcast %650 : vector<2x8x1xf32> to vector<2x8x64xf32>
    %652 = arith.mulf %277, %651 : vector<2x8x64xf32>
    %cst_105 = arith.constant dense<0.000000e+00> : vector<2x64xf32>
    %653 = vector.multi_reduction <add>, %652, %cst_105 [1] : vector<2x8x64xf32> to vector<2x64xf32>
    %654 = math.tanh %630 : vector<2x64xf32>
    %655 = arith.addf %653, %654 : vector<2x64xf32>
    %656 = vector.extract_strided_slice %19 {offsets = [0, 3], sizes = [2, 1], strides = [1, 1]} : vector<2x8xf32> to vector<2x1xf32>
    %657 = vector.broadcast %656 : vector<2x1xf32> to vector<2x64xf32>
    %658 = arith.mulf %657, %655 : vector<2x64xf32>
    %659 = arith.addf %627, %658 : vector<2x64xf32>
    %cst_106 = arith.constant dense<0.000000e+00> : vector<2x128xf32>
    %660 = tpu.matmul %655, %515, %cst_106 {dimension_numbers = #tpu.dot_dimension_numbers<[1], [0], [0], [1], [0, 0, 1, 1], [], []>} : vector<2x64xf32>, vector<64x128xf32>, vector<2x128xf32> -> vector<2x128xf32>
    %661 = vector.extract_strided_slice %660 {offsets = [0, 0], sizes = [2, 64], strides = [1, 1]} : vector<2x128xf32> to vector<2x64xf32>
    %662 = vector.extract_strided_slice %660 {offsets = [0, 64], sizes = [2, 64], strides = [1, 1]} : vector<2x128xf32> to vector<2x64xf32>
    %663 = vector.shape_cast %661 : vector<2x64xf32> to vector<2x1x64xf32>
    %664 = vector.broadcast %663 : vector<2x1x64xf32> to vector<2x8x64xf32>
    %665 = arith.addf %529, %664 : vector<2x8x64xf32>
    %666 = math.tanh %665 : vector<2x8x64xf32>
    %667 = arith.mulf %666, %524 : vector<2x8x64xf32>
    %cst_107 = arith.constant dense<0.000000e+00> : vector<2x8xf32>
    %668 = vector.multi_reduction <add>, %667, %cst_107 [2] : vector<2x8x64xf32> to vector<2x8xf32>
    %669 = arith.mulf %516, %668 : vector<2x8xf32>
    %670 = arith.subf %669, %520 : vector<2x8xf32>
    %cst_108 = arith.constant dense<0xFF800000> : vector<2xf32>
    %671 = vector.multi_reduction <maximumf>, %670, %cst_108 [1] : vector<2x8xf32> to vector<2xf32>
    %cst_109 = arith.constant 0xFF800000 : f32
    %672 = vector.broadcast %cst_109 : f32 to vector<2xf32>
    %673 = arith.maximumf %672, %671 : vector<2xf32>
    %674 = vector.shape_cast %673 : vector<2xf32> to vector<2x1xf32>
    %675 = vector.broadcast %674 : vector<2x1xf32> to vector<2x8xf32>
    %676 = arith.subf %670, %675 : vector<2x8xf32>
    %677 = math.exp %676 : vector<2x8xf32>
    %cst_110 = arith.constant dense<0.000000e+00> : vector<2xf32>
    %678 = vector.multi_reduction <add>, %677, %cst_110 [1] : vector<2x8xf32> to vector<2xf32>
    %679 = vector.shape_cast %678 : vector<2xf32> to vector<2x1xf32>
    %680 = vector.broadcast %679 : vector<2x1xf32> to vector<2x8xf32>
    %681 = arith.divf %677, %680 : vector<2x8xf32>
    %682 = vector.shape_cast %681 : vector<2x8xf32> to vector<2x8x1xf32>
    %683 = vector.broadcast %682 : vector<2x8x1xf32> to vector<2x8x64xf32>
    %684 = arith.mulf %277, %683 : vector<2x8x64xf32>
    %cst_111 = arith.constant dense<0.000000e+00> : vector<2x64xf32>
    %685 = vector.multi_reduction <add>, %684, %cst_111 [1] : vector<2x8x64xf32> to vector<2x64xf32>
    %686 = math.tanh %662 : vector<2x64xf32>
    %687 = arith.addf %685, %686 : vector<2x64xf32>
    %688 = vector.extract_strided_slice %19 {offsets = [0, 4], sizes = [2, 1], strides = [1, 1]} : vector<2x8xf32> to vector<2x1xf32>
    %689 = vector.broadcast %688 : vector<2x1xf32> to vector<2x64xf32>
    %690 = arith.mulf %689, %687 : vector<2x64xf32>
    %691 = arith.addf %659, %690 : vector<2x64xf32>
    %cst_112 = arith.constant dense<0.000000e+00> : vector<2x128xf32>
    %692 = tpu.matmul %687, %515, %cst_112 {dimension_numbers = #tpu.dot_dimension_numbers<[1], [0], [0], [1], [0, 0, 1, 1], [], []>} : vector<2x64xf32>, vector<64x128xf32>, vector<2x128xf32> -> vector<2x128xf32>
    %693 = vector.extract_strided_slice %692 {offsets = [0, 0], sizes = [2, 64], strides = [1, 1]} : vector<2x128xf32> to vector<2x64xf32>
    %694 = vector.extract_strided_slice %692 {offsets = [0, 64], sizes = [2, 64], strides = [1, 1]} : vector<2x128xf32> to vector<2x64xf32>
    %695 = vector.shape_cast %693 : vector<2x64xf32> to vector<2x1x64xf32>
    %696 = vector.broadcast %695 : vector<2x1x64xf32> to vector<2x8x64xf32>
    %697 = arith.addf %529, %696 : vector<2x8x64xf32>
    %698 = math.tanh %697 : vector<2x8x64xf32>
    %699 = arith.mulf %698, %524 : vector<2x8x64xf32>
    %cst_113 = arith.constant dense<0.000000e+00> : vector<2x8xf32>
    %700 = vector.multi_reduction <add>, %699, %cst_113 [2] : vector<2x8x64xf32> to vector<2x8xf32>
    %701 = arith.mulf %516, %700 : vector<2x8xf32>
    %702 = arith.subf %701, %520 : vector<2x8xf32>
    %cst_114 = arith.constant dense<0xFF800000> : vector<2xf32>
    %703 = vector.multi_reduction <maximumf>, %702, %cst_114 [1] : vector<2x8xf32> to vector<2xf32>
    %cst_115 = arith.constant 0xFF800000 : f32
    %704 = vector.broadcast %cst_115 : f32 to vector<2xf32>
    %705 = arith.maximumf %704, %703 : vector<2xf32>
    %706 = vector.shape_cast %705 : vector<2xf32> to vector<2x1xf32>
    %707 = vector.broadcast %706 : vector<2x1xf32> to vector<2x8xf32>
    %708 = arith.subf %702, %707 : vector<2x8xf32>
    %709 = math.exp %708 : vector<2x8xf32>
    %cst_116 = arith.constant dense<0.000000e+00> : vector<2xf32>
    %710 = vector.multi_reduction <add>, %709, %cst_116 [1] : vector<2x8xf32> to vector<2xf32>
    %711 = vector.shape_cast %710 : vector<2xf32> to vector<2x1xf32>
    %712 = vector.broadcast %711 : vector<2x1xf32> to vector<2x8xf32>
    %713 = arith.divf %709, %712 : vector<2x8xf32>
    %714 = vector.shape_cast %713 : vector<2x8xf32> to vector<2x8x1xf32>
    %715 = vector.broadcast %714 : vector<2x8x1xf32> to vector<2x8x64xf32>
    %716 = arith.mulf %277, %715 : vector<2x8x64xf32>
    %cst_117 = arith.constant dense<0.000000e+00> : vector<2x64xf32>
    %717 = vector.multi_reduction <add>, %716, %cst_117 [1] : vector<2x8x64xf32> to vector<2x64xf32>
    %718 = math.tanh %694 : vector<2x64xf32>
    %719 = arith.addf %717, %718 : vector<2x64xf32>
    %720 = vector.extract_strided_slice %19 {offsets = [0, 5], sizes = [2, 1], strides = [1, 1]} : vector<2x8xf32> to vector<2x1xf32>
    %721 = vector.broadcast %720 : vector<2x1xf32> to vector<2x64xf32>
    %722 = arith.mulf %721, %719 : vector<2x64xf32>
    %723 = arith.addf %691, %722 : vector<2x64xf32>
    %cst_118 = arith.constant dense<0.000000e+00> : vector<2x128xf32>
    %724 = tpu.matmul %719, %515, %cst_118 {dimension_numbers = #tpu.dot_dimension_numbers<[1], [0], [0], [1], [0, 0, 1, 1], [], []>} : vector<2x64xf32>, vector<64x128xf32>, vector<2x128xf32> -> vector<2x128xf32>
    %725 = vector.extract_strided_slice %724 {offsets = [0, 0], sizes = [2, 64], strides = [1, 1]} : vector<2x128xf32> to vector<2x64xf32>
    %726 = vector.extract_strided_slice %724 {offsets = [0, 64], sizes = [2, 64], strides = [1, 1]} : vector<2x128xf32> to vector<2x64xf32>
    %727 = vector.shape_cast %725 : vector<2x64xf32> to vector<2x1x64xf32>
    %728 = vector.broadcast %727 : vector<2x1x64xf32> to vector<2x8x64xf32>
    %729 = arith.addf %529, %728 : vector<2x8x64xf32>
    %730 = math.tanh %729 : vector<2x8x64xf32>
    %731 = arith.mulf %730, %524 : vector<2x8x64xf32>
    %cst_119 = arith.constant dense<0.000000e+00> : vector<2x8xf32>
    %732 = vector.multi_reduction <add>, %731, %cst_119 [2] : vector<2x8x64xf32> to vector<2x8xf32>
    %733 = arith.mulf %516, %732 : vector<2x8xf32>
    %734 = arith.subf %733, %520 : vector<2x8xf32>
    %cst_120 = arith.constant dense<0xFF800000> : vector<2xf32>
    %735 = vector.multi_reduction <maximumf>, %734, %cst_120 [1] : vector<2x8xf32> to vector<2xf32>
    %cst_121 = arith.constant 0xFF800000 : f32
    %736 = vector.broadcast %cst_121 : f32 to vector<2xf32>
    %737 = arith.maximumf %736, %735 : vector<2xf32>
    %738 = vector.shape_cast %737 : vector<2xf32> to vector<2x1xf32>
    %739 = vector.broadcast %738 : vector<2x1xf32> to vector<2x8xf32>
    %740 = arith.subf %734, %739 : vector<2x8xf32>
    %741 = math.exp %740 : vector<2x8xf32>
    %cst_122 = arith.constant dense<0.000000e+00> : vector<2xf32>
    %742 = vector.multi_reduction <add>, %741, %cst_122 [1] : vector<2x8xf32> to vector<2xf32>
    %743 = vector.shape_cast %742 : vector<2xf32> to vector<2x1xf32>
    %744 = vector.broadcast %743 : vector<2x1xf32> to vector<2x8xf32>
    %745 = arith.divf %741, %744 : vector<2x8xf32>
    %746 = vector.shape_cast %745 : vector<2x8xf32> to vector<2x8x1xf32>
    %747 = vector.broadcast %746 : vector<2x8x1xf32> to vector<2x8x64xf32>
    %748 = arith.mulf %277, %747 : vector<2x8x64xf32>
    %cst_123 = arith.constant dense<0.000000e+00> : vector<2x64xf32>
    %749 = vector.multi_reduction <add>, %748, %cst_123 [1] : vector<2x8x64xf32> to vector<2x64xf32>
    %750 = math.tanh %726 : vector<2x64xf32>
    %751 = arith.addf %749, %750 : vector<2x64xf32>
    %752 = vector.extract_strided_slice %19 {offsets = [0, 6], sizes = [2, 1], strides = [1, 1]} : vector<2x8xf32> to vector<2x1xf32>
    %753 = vector.broadcast %752 : vector<2x1xf32> to vector<2x64xf32>
    %754 = arith.mulf %753, %751 : vector<2x64xf32>
    %755 = arith.addf %723, %754 : vector<2x64xf32>
    %cst_124 = arith.constant dense<0.000000e+00> : vector<2x128xf32>
    %756 = tpu.matmul %751, %515, %cst_124 {dimension_numbers = #tpu.dot_dimension_numbers<[1], [0], [0], [1], [0, 0, 1, 1], [], []>} : vector<2x64xf32>, vector<64x128xf32>, vector<2x128xf32> -> vector<2x128xf32>
    %757 = vector.extract_strided_slice %756 {offsets = [0, 0], sizes = [2, 64], strides = [1, 1]} : vector<2x128xf32> to vector<2x64xf32>
    %758 = vector.extract_strided_slice %756 {offsets = [0, 64], sizes = [2, 64], strides = [1, 1]} : vector<2x128xf32> to vector<2x64xf32>
    %759 = vector.shape_cast %757 : vector<2x64xf32> to vector<2x1x64xf32>
    %760 = vector.broadcast %759 : vector<2x1x64xf32> to vector<2x8x64xf32>
    %761 = arith.addf %529, %760 : vector<2x8x64xf32>
    %762 = math.tanh %761 : vector<2x8x64xf32>
    %763 = arith.mulf %762, %524 : vector<2x8x64xf32>
    %cst_125 = arith.constant dense<0.000000e+00> : vector<2x8xf32>
    %764 = vector.multi_reduction <add>, %763, %cst_125 [2] : vector<2x8x64xf32> to vector<2x8xf32>
    %765 = arith.mulf %516, %764 : vector<2x8xf32>
    %766 = arith.subf %765, %520 : vector<2x8xf32>
    %cst_126 = arith.constant dense<0xFF800000> : vector<2xf32>
    %767 = vector.multi_reduction <maximumf>, %766, %cst_126 [1] : vector<2x8xf32> to vector<2xf32>
    %cst_127 = arith.constant 0xFF800000 : f32
    %768 = vector.broadcast %cst_127 : f32 to vector<2xf32>
    %769 = arith.maximumf %768, %767 : vector<2xf32>
    %770 = vector.shape_cast %769 : vector<2xf32> to vector<2x1xf32>
    %771 = vector.broadcast %770 : vector<2x1xf32> to vector<2x8xf32>
    %772 = arith.subf %766, %771 : vector<2x8xf32>
    %773 = math.exp %772 : vector<2x8xf32>
    %cst_128 = arith.constant dense<0.000000e+00> : vector<2xf32>
    %774 = vector.multi_reduction <add>, %773, %cst_128 [1] : vector<2x8xf32> to vector<2xf32>
    %775 = vector.shape_cast %774 : vector<2xf32> to vector<2x1xf32>
    %776 = vector.broadcast %775 : vector<2x1xf32> to vector<2x8xf32>
    %777 = arith.divf %773, %776 : vector<2x8xf32>
    %778 = vector.shape_cast %777 : vector<2x8xf32> to vector<2x8x1xf32>
    %779 = vector.broadcast %778 : vector<2x8x1xf32> to vector<2x8x64xf32>
    %780 = arith.mulf %277, %779 : vector<2x8x64xf32>
    %cst_129 = arith.constant dense<0.000000e+00> : vector<2x64xf32>
    %781 = vector.multi_reduction <add>, %780, %cst_129 [1] : vector<2x8x64xf32> to vector<2x64xf32>
    %782 = math.tanh %758 : vector<2x64xf32>
    %783 = arith.addf %781, %782 : vector<2x64xf32>
    %784 = vector.extract_strided_slice %19 {offsets = [0, 7], sizes = [2, 1], strides = [1, 1]} : vector<2x8xf32> to vector<2x1xf32>
    %785 = vector.broadcast %784 : vector<2x1xf32> to vector<2x64xf32>
    %786 = arith.mulf %785, %783 : vector<2x64xf32>
    %787 = arith.addf %755, %786 : vector<2x64xf32>
    %788 = tpu.concatenate %787, %514 in 1 : vector<2x64xf32>, vector<2x64xf32> -> vector<2x128xf32>
    %c0_130 = arith.constant 0 : index
    %c0_131 = arith.constant 0 : index
    %789 = vector.load %arg10[%c0_130, %c0_131] : memref<128x64xf32, #tpu.memory_space<vmem>>, vector<128x64xf32>
    %cst_132 = arith.constant dense<0.000000e+00> : vector<2x64xf32>
    %790 = tpu.matmul %788, %789, %cst_132 {dimension_numbers = #tpu.dot_dimension_numbers<[1], [0], [0], [1], [0, 0, 1, 1], [], []>} : vector<2x128xf32>, vector<128x64xf32>, vector<2x64xf32> -> vector<2x64xf32>
    %791 = math.tanh %790 : vector<2x64xf32>
    %c0_133 = arith.constant 0 : index
    %c0_134 = arith.constant 0 : index
    %792 = vector.load %arg15[%c0_133, %c0_134] : memref<2x64xf32, #tpu.memory_space<vmem>>, vector<2x64xf32>
    tpu.vector_store %arg15[%c0_133, %c0_134], %791 {strides = array<i32>} : memref<2x64xf32, #tpu.memory_space<vmem>>, vector<2x64xf32>,
    return
  }
}

</mosaic_0001>

<bundles_post_ra>
// kernel: tpu_custom_call.1
= control target key start
LH: loop header
LB: loop body
LE: loop exit
PB: predicated region body
PF: predicated region fallthrough
CT: control target
= control target key end

     0   :  { %20 = vsyncpa [#allocation3], 0  ;;  %s8191_s0 = inlined_call_operand.hbm [shape: f32[2,8,64], index: 0, kind: input, shape index: {}]   ;;  %s8192_s1 = inlined_call_operand.hbm [shape: f32[2,8,64], index: 1, kind: input, shape index: {}]   ;;  %s8193_s2 = inlined_call_operand.vmem [shape: f32[64,256], index: 2, kind: input, shape index: {}]   ;;  %s8194_s3 = inlined_call_operand.vmem [shape: f32[64,256], index: 3, kind: input, shape index: {}]   ;;  %s8195_s4 = inlined_call_operand.vmem [shape: f32[1,256], index: 4, kind: input, shape index: {}]   ;;  %s8196_s5 = inlined_call_operand.vmem [shape: f32[64,256], index: 5, kind: input, shape index: {}]   ;;  %s8197_s6 = inlined_call_operand.hbm [shape: f32[64,256], index: 6, kind: input, shape index: {}]   ;;  %s8198_s7 = inlined_call_operand.vmem [shape: f32[1,256], index: 7, kind: input, shape index: {}]   ;;  %s8199_s8 = inlined_call_operand.vmem [shape: f32[128,64], index: 8, kind: input, shape index: {}]   ;;  %s8200_s9 = inlined_call_operand.hbm [shape: f32[64,128], index: 9, kind: input, shape index: {}]   ;;  %s8201_s10 = inlined_call_operand.vmem [shape: f32[128,64], index: 10, kind: input, shape index: {}]   ;;  %s8202_s11 = inlined_call_operand.vmem [shape: f32[1,64], index: 11, kind: input, shape index: {}]   ;;  %s8203_s12 = inlined_call_operand.vmem [shape: f32[2,8], index: 12, kind: input, shape index: {}]   ;;  %s8204_s13 = inlined_call_operand.vmem [shape: f32[2,8], index: 13, kind: input, shape index: {}]   ;;  %s8205_s14 = inlined_call_operand.vmem [shape: f32[2,8], index: 14, kind: input, shape index: {}]   ;;  %s8206_s15 = inlined_call_operand.hbm [shape: f32[2,64], index: 15, kind: output, shape index: {}]  }
   0x1   :  { %21 = vsyncpa [#allocation6], 0 }
   0x2   :  { %22 = vsyncpa [#allocation9], 0 }
   0x3   :  { %23 = vsyncpa [#allocation4], 0  ;;  %s6492_s18 = smov [#allocation5]   ;;  %s6493_s20 = smov [#allocation2]  }
   0x4   :  { %s41_s19 = sshll.u32 %s6492_s18, 4  ;;  %s29_s21 = sshll.u32 %s6493_s20, 4  ;;  %s42_s19 = int_to_ptr.vmem [resolvable:$true] %s41_s19  ;;  %s6594_s21 = int_to_ptr.vmem [resolvable:$true] %s29_s21 }
   0x5   :  { %s6374_s24 = scalar_lea.hbm %s8192_s1, 256 }
   0x6   :  { %p6375_p0 = scmp.ne.s32.totalorder %s8192_s1, %s6374_s24  ;;  %p6378_p1 = scmp.lt.u32.totalorder %s6374_s24, %s8192_s1 }
   0x8   :  { %p6380_p2 = pnand %p6378_p1, %p6375_p0 }
   0xa   :  { %6383 = shalt.err (!%p6380_p2)
}
   0xb   :  { %s6384_s29 = scalar_lea.vmem %s42_s19, 256  ;;  %p6389_p4 = scmp.lt.s32.totalorder %s42_s19, %s42_s19 }
   0xc   :  { %p6385_p3 = scmp.ne.s32.totalorder %s42_s19, %s6384_s29  ;;  %p6390_p5 = scmp.lt.s32.totalorder %s6384_s29, %s6384_s29 }
   0xe   :  { %p6391_p6 = por %p6390_p5, %p6389_p4 }
  0x10   :  { %p6392_p7 = pnand %p6391_p6, %p6385_p3 }
  0x12   :  { %6395 = shalt.err (!%p6392_p7)
}
  0x13   :  { %s6494_s30 = smov 128   ;;  %s6495_s16 = smov 8  }
  0x14   :  { %47 = dma.hbm_to_vmem [thread:$0]  %s8192_s1, 256, %s42_s19, [#allocation6], %s6494_s30, %s6494_s30, %s6495_s16  }
  0x15   :  { %s6396_s23 = scalar_lea.hbm %s8191_s0, 256 }
  0x16   :  { %p6397_p8 = scmp.ne.s32.totalorder %s8191_s0, %s6396_s23  ;;  %p6400_p9 = scmp.lt.u32.totalorder %s6396_s23, %s8191_s0 }
  0x18   :  { %p6402_p10 = pnand %p6400_p9, %p6397_p8 }
  0x1a   :  { %6405 = shalt.err (!%p6402_p10)
}
  0x1b   :  { %s6406_s28 = scalar_lea.vmem %s6594_s21, 256  ;;  %p6411_p12 = scmp.lt.s32.totalorder %s6594_s21, %s6594_s21 }
  0x1c   :  { %p6407_p11 = scmp.ne.s32.totalorder %s6594_s21, %s6406_s28  ;;  %p6412_p13 = scmp.lt.s32.totalorder %s6406_s28, %s6406_s28 }
  0x1e   :  { %p6413_p0 = por %p6412_p13, %p6411_p12 }
  0x20   :  { %p6414_p1 = pnand %p6413_p0, %p6407_p11 }
  0x22   :  { %6417 = shalt.err (!%p6414_p1)
}
  0x23   :  { %35 = dma.hbm_to_vmem [thread:$0]  %s8191_s0, 256, %s6594_s21, [#allocation3], %s6494_s30, %s6494_s30, %s6495_s16  }
  0x24   :  { %s6496_s29 = smov [#allocation7]   ;;  %s6418_s22 = scalar_lea.hbm %s8197_s6, 2048 }
  0x25   :  { %s61_s17 = sshll.u32 %s6496_s29, 4  ;;  %p6419_p2 = scmp.ne.s32.totalorder %s8197_s6, %s6418_s22  ;;  %s62_s17 = int_to_ptr.vmem [resolvable:$true] %s61_s17 }
  0x26   :  { %p6422_p3 = scmp.lt.u32.totalorder %s6418_s22, %s8197_s6 }
  0x28   :  { %p6424_p4 = pnand %p6422_p3, %p6419_p2 }
  0x2a   :  { %6427 = shalt.err (!%p6424_p4)
}
  0x2b   :  { %s6428_s27 = scalar_lea.vmem %s62_s17, 2048  ;;  %p6433_p6 = scmp.lt.s32.totalorder %s62_s17, %s62_s17 }
  0x2c   :  { %p6429_p5 = scmp.ne.s32.totalorder %s62_s17, %s6428_s27  ;;  %p6434_p7 = scmp.lt.s32.totalorder %s6428_s27, %s6428_s27 }
  0x2e   :  { %p6435_p8 = por %p6434_p7, %p6433_p6 }
  0x30   :  { %p6436_p9 = pnand %p6435_p8, %p6429_p5 }
  0x32   :  { %6439 = shalt.err (!%p6436_p9)
}
  0x33   :  { %s6497_s0 = smov 256   ;;  %s6498_s21 = smov 16  }
  0x34   :  { %67 = dma.hbm_to_vmem [thread:$0]  %s8197_s6, 2048, %s62_s17, [#allocation6], %s6497_s0, %s6497_s0, %s6498_s21  }
  0x35   :  { %s6499_s19 = smov [#allocation8]   ;;  %s6440_s22 = scalar_lea.hbm %s8200_s9, 1024 }
  0x36   :  { %s77_s29 = sshll.u32 %s6499_s19, 4  ;;  %p6441_p10 = scmp.ne.s32.totalorder %s8200_s9, %s6440_s22  ;;  %s78_s29 = int_to_ptr.vmem [resolvable:$true] %s77_s29 }
  0x37   :  { %p6444_p11 = scmp.lt.u32.totalorder %s6440_s22, %s8200_s9 }
  0x39   :  { %p6446_p12 = pnand %p6444_p11, %p6441_p10 }
  0x3b   :  { %6449 = shalt.err (!%p6446_p12)
}
  0x3c   :  { %s6450_s27 = scalar_lea.vmem %s78_s29, 1024  ;;  %p6455_p0 = scmp.lt.s32.totalorder %s78_s29, %s78_s29 }
  0x3d   :  { %p6451_p13 = scmp.ne.s32.totalorder %s78_s29, %s6450_s27  ;;  %p6456_p1 = scmp.lt.s32.totalorder %s6450_s27, %s6450_s27 }
  0x3f   :  { %p6457_p2 = por %p6456_p1, %p6455_p0 }
  0x41   :  { %p6458_p3 = pnand %p6457_p2, %p6451_p13 }
  0x43   :  { %6461 = shalt.err (!%p6458_p3)
}
  0x44   :  { %83 = dma.hbm_to_vmem [thread:$0]  %s8200_s9, 1024, %s78_s29, [#allocation9], %s6494_s30, %s6494_s30, %s6495_s16  }
  0x45   :  { %6484 = dma.done.wait [#allocation3], 256  }
  0x46   :  { %6485 = vsyncadd [#allocation3], 4294967040 }
  0x47   :  { %6486 = dma.done.wait [#allocation6], 2304  }
  0x48   :  { %6487 = vsyncadd [#allocation6], 4294964992 }
  0x49   :  { %6488 = dma.done.wait [#allocation9], 1024  }
  0x4a   :  { %6489 = vsyncadd [#allocation9], 4294966272  ;;  %v6500_v0 = vmov 0.0   ;;  %v109_v1 = vld [vmem:[%s8193_s2 + $0x8] sm:$0xff]  ;;  %v111_v2 = vld [vmem:[%s8193_s2 + $0x18] sm:$0xff]  ;;  %vm136_vm0 = vcmask 523264   ;;  %v126_v51 = vlaneseq }
  0x4b   :  { %207 = vmatprep.mubr.f32.mxu1 %v6500_v0  ;;  %436 = vmatprep.mubr.f32.mxu0 %v6500_v0  ;;  %v108_v3 = vld [vmem:[%s8193_s2] sm:$0xff]  ;;  %v5422_v4 = vpack.c.bf16 %v111_v2, %v109_v1  ;;  %v110_v5 = vld [vmem:[%s8193_s2 + $0x10] sm:$0xff]  ;;  %v334_v6 = vld [vmem:[%s8194_s3 + $0x8] sm:$0xff]  ;;  %vm536_vm1 = vcmask 1041409   ;;  %vm6511_vm10 = vmmov 0   ;;  %vm3466_vm11 = vcmask 58368  }
  0x4c   :  { %v336_v7 = vld [vmem:[%s8194_s3 + $0x18] sm:$0xff]  ;;  %v5424_v8 = vpack.c.bf16 %v110_v5, %v108_v3  ;;  %v333_v10 = vld [vmem:[%s8194_s3] sm:$0xff]  ;;  %v335_v11 = vld [vmem:[%s8194_s3 + $0x10] sm:$0xff]  ;;  %v6796_v52 = vshrl.u32 %v126_v51, 7  ;;  %vm4983_vm12 = vcmask 517120  }
  0x4d   :  { %v6678_v9 = vpack.c.bf16 %v336_v7, %v334_v6  ;;  %v113_v12 = vld [vmem:[%s8193_s2 + $0x28] sm:$0xff]  ;;  %5423 = vmatprep.subr.bf16.mxu1 %v5422_v4  ;;  %v6689_v13 = vpack.c.bf16 %v335_v11, %v333_v10  ;;  %v115_v14 = vld [vmem:[%s8193_s2 + $0x38] sm:$0xff]  ;;  %v112_v15 = vld [vmem:[%s8193_s2 + $0x20] sm:$0xff] }
  0x4e   :  { %v114_v16 = vld [vmem:[%s8193_s2 + $0x30] sm:$0xff]  ;;  %5425 = vmatpush1.bf16.msra.mxu1 %v5424_v8  ;;  %v5426_v17 = vpack.c.bf16 %v115_v14, %v113_v12  ;;  %v338_v19 = vld [vmem:[%s8194_s3 + $0x28] sm:$0xff]  ;;  %v340_v20 = vld [vmem:[%s8194_s3 + $0x38] sm:$0xff]  ;;  %v6799_v53 = vsub.s32 1, %v6796_v52  ;;  %v6820_v6 = vsub.s32 0, %v6796_v52  ;;  %vm515_vm2 = vcmp.eq.s32.totalorder %v6796_v52, 0 }
  0x4f   :  { %5455 = vmatprep.subr.bf16.mxu0 %v6678_v9  ;;  %v5428_v18 = vpack.c.bf16 %v114_v16, %v112_v15  ;;  %v337_v21 = vld [vmem:[%s8194_s3 + $0x20] sm:$0xff]  ;;  %v6711_v22 = vpack.c.bf16 %v340_v20, %v338_v19  ;;  %v339_v23 = vld [vmem:[%s8194_s3 + $0x30] sm:$0xff]  ;;  %v117_v24 = vld [vmem:[%s8193_s2 + $0x48] sm:$0xff]  ;;  %vm695_vm3 = vcmp.eq.s32.totalorder %v6796_v52, 1  ;;  %vm876_vm4 = vcmp.eq.s32.totalorder %v6796_v52, 2 }
  0x50   :  { %5457 = vmatpush1.bf16.msra.mxu0 %v6689_v13  ;;  %v119_v25 = vld [vmem:[%s8193_s2 + $0x58] sm:$0xff]  ;;  %5427 = vmatprep.subr.bf16.mxu1 %v5426_v17  ;;  %v6722_v26 = vpack.c.bf16 %v339_v23, %v337_v21  ;;  %v116_v28 = vld [vmem:[%s8193_s2 + $0x40] sm:$0xff]  ;;  %v118_v29 = vld [vmem:[%s8193_s2 + $0x50] sm:$0xff]  ;;  %vm1059_vm5 = vcmp.eq.s32.totalorder %v6796_v52, 3  ;;  %vm1242_vm6 = vcmp.eq.s32.totalorder %v6796_v52, 4  ;;  %vm1425_vm7 = vcmp.eq.s32.totalorder %v6796_v52, 5 }
  0x51   :  { %v5430_v27 = vpack.c.bf16 %v119_v25, %v117_v24  ;;  %v342_v30 = vld [vmem:[%s8194_s3 + $0x48] sm:$0xff]  ;;  %5459 = vmatprep.subr.bf16.mxu0 %v6711_v22  ;;  %v344_v31 = vld [vmem:[%s8194_s3 + $0x58] sm:$0xff]  ;;  %v341_v32 = vld [vmem:[%s8194_s3 + $0x40] sm:$0xff]  ;;  %v5432_v34 = vpack.c.bf16 %v118_v29, %v116_v28  ;;  %vm1608_vm8 = vcmp.eq.s32.totalorder %v6796_v52, 6  ;;  %vm1791_vm9 = vcmp.eq.s32.totalorder %v6796_v52, 7 }
  0x52   :  { %v343_v33 = vld [vmem:[%s8194_s3 + $0x50] sm:$0xff]  ;;  %5429 = vmatpush1.bf16.msra.mxu1 %v5428_v18  ;;  %v6743_v35 = vpack.c.bf16 %v344_v31, %v342_v30  ;;  %v121_v36 = vld [vmem:[%s8193_s2 + $0x68] sm:$0xff]  ;;  %v123_v37 = vld [vmem:[%s8193_s2 + $0x78] sm:$0xff] }
  0x53   :  { %v120_v38 = vld [vmem:[%s8193_s2 + $0x60] sm:$0xff]  ;;  %5431 = vmatprep.subr.bf16.mxu1 %v5430_v27  ;;  %v6755_v39 = vpack.c.bf16 %v343_v33, %v341_v32  ;;  %v5434_v40 = vpack.c.bf16 %v123_v37, %v121_v36  ;;  %v122_v41 = vld [vmem:[%s8193_s2 + $0x70] sm:$0xff]  ;;  %v346_v42 = vld [vmem:[%s8194_s3 + $0x68] sm:$0xff] }
  0x54   :  { %5461 = vmatpush1.bf16.msra.mxu0 %v6722_v26  ;;  %v348_v43 = vld [vmem:[%s8194_s3 + $0x78] sm:$0xff]  ;;  %v345_v45 = vld [vmem:[%s8194_s3 + $0x60] sm:$0xff]  ;;  %v347_v46 = vld [vmem:[%s8194_s3 + $0x70] sm:$0xff]  ;;  %v5436_v47 = vpack.c.bf16 %v122_v41, %v120_v38 }
  0x55   :  { %5463 = vmatprep.subr.bf16.mxu0 %v6743_v35  ;;  %v6767_v44 = vpack.c.bf16 %v348_v43, %v346_v42  ;;  %v6776_v48 = vpack.c.bf16 %v347_v46, %v345_v45  ;;  %v106_v49 = vld [vmem:[#allocation2] sm:$0xff]  ;;  %v107_v50 = vld [vmem:[#allocation2 + $0x8] sm:$0xff]  ;;  %v225_v30 = vld [vmem:[%s8196_s5 + $0x18] sm:$0xff] }
  0x56   :  { %5433 = vmatpush1.bf16.msra.mxu1 %v5432_v34  ;;  %v124_v54 = vld [vmem:[%s8195_s4] sm:$0x3]  ;;  %s6501_s4 = smov 64   ;;  %v223_v29 = vld [vmem:[%s8196_s5 + $0x8] sm:$0xff]  ;;  %v224_v33 = vld [vmem:[%s8196_s5 + $0x10] sm:$0xff] }
  0x57   :  { %5435 = vmatprep.subr.bf16.mxu1 %v5434_v40  ;;  %v133_v58 = vrot.slane %v124_v54, %v6799_v53  ;;  %v129_v7 = vrot.slane %v124_v54, %v6820_v6  ;;  %v222_v31 = vld [vmem:[%s8196_s5] sm:$0xff]  ;;  %v5438_v32 = vpack.c.bf16 %v225_v30, %v223_v29  ;;  %v227_v34 = vld [vmem:[%s8196_s5 + $0x28] sm:$0xff]  ;;  %v229_v36 = vld [vmem:[%s8196_s5 + $0x38] sm:$0xff] }
  0x58   :  { %5465 = vmatpush1.bf16.msra.mxu0 %v6755_v39  ;;  %v5440_v37 = vpack.c.bf16 %v224_v33, %v222_v31  ;;  %v5442_v38 = vpack.c.bf16 %v229_v36, %v227_v34  ;;  %v226_v40 = vld [vmem:[%s8196_s5 + $0x20] sm:$0xff]  ;;  %v228_v41 = vld [vmem:[%s8196_s5 + $0x30] sm:$0xff]  ;;  %v231_v42 = vld [vmem:[%s8196_s5 + $0x48] sm:$0xff] }
  0x59   :  { %5467 = vmatprep.subr.bf16.mxu0 %v6767_v44  ;;  %v233_v43 = vld [vmem:[%s8196_s5 + $0x58] sm:$0xff]  ;;  %v5444_v45 = vpack.c.bf16 %v228_v41, %v226_v40 }
  0x5a   :  { %5437 = vmatpush1.bf16.msra.mxu1 %v5436_v47  ;;  %v5446_v46 = vpack.c.bf16 %v233_v43, %v231_v42  ;;  %v230_v47 = vld [vmem:[%s8196_s5 + $0x40] sm:$0xff]  ;;  %v237_v54 = vld [vmem:[%s8196_s5 + $0x78] sm:$0xff] }
  0x5b   :  { %5439 = vmatprep.subr.bf16.mxu1 %v5438_v32 }
  0x5c   :  { %5469 = vmatpush1.bf16.msra.mxu0 %v6776_v48 }
  0x5d   :  { %5487 = vmatprep.subr.bf16.mxu0 %v6678_v9  ;;  %5002 = vmatmul.mubr.msk.f32.vlgmr.msra.gmra.mrb[0].mxu1 %vm136_vm0, %v106_v49  ;;  %v232_v49 = vld [vmem:[%s8196_s5 + $0x50] sm:$0xff] }
  0x5e   :  { %213 = vmatprep.mubr.f32.mxu1 %v6500_v0  ;;  %5441 = vmatpush1.bf16.msra.mxu1 %v5440_v37 }
  0x5f   :  { %437 = vmatmul.mubr.f32.vlgmr.msra.gmra.mrb[0].mxu0 %v6500_v0  ;;  %5443 = vmatprep.subr.bf16.mxu1 %v5442_v38 }
  0x60   :  { %5489 = vmatpush1.bf16.msra.mxu0 %v6689_v13  ;;  %791 = vmatprep.mubr.f32.mxu0 %v6500_v0 }
  0x61   :  { %5491 = vmatprep.subr.bf16.mxu0 %v6711_v22  ;;  %5003 = vmatmul.mubr.msk.f32.gmra.mrb[2].mxu1 %vm136_vm0, %v107_v50  ;;  %v235_v50 = vld [vmem:[%s8196_s5 + $0x68] sm:$0xff] }
  0x62   :  { %320 = vmatprep.mubr.f32.mxu1 %v6500_v0  ;;  %5445 = vmatpush1.bf16.msra.mxu1 %v5444_v45 }
  0x63   :  { %5447 = vmatprep.subr.bf16.mxu1 %v5446_v46 }
  0x64   :  { %5493 = vmatpush1.bf16.msra.mxu0 %v6722_v26 }
  0x65   :  { %5495 = vmatprep.subr.bf16.mxu0 %v6743_v35 }
  0x68   :  { %5497 = vmatpush1.bf16.msra.mxu0 %v6755_v39 }
  0x69   :  { %5499 = vmatprep.subr.bf16.mxu0 %v6767_v44 }
  0x6c   :  { %5501 = vmatpush1.bf16.msra.mxu0 %v6776_v48 }
  0x6d   :  { %5519 = vmatprep.subr.bf16.mxu0 %v6678_v9 }
 0x130   :  { %v209_v55 = vpop.f32.mrb[0].mxu1 }
 0x131   :  { %v211_v56 = vpop.f32.mrb[1].mxu1  ;;  %v6825_v11 = vadd.f32 %v209_v55, %v129_v7  ;;  %v5448_v55 = vpack.c.bf16 %v232_v49, %v230_v47 }
 0x132   :  { %v438_v57 = vpop.f32.mrb[0].mxu0  ;;  %v6805_v63 = vadd.f32 %v211_v56, %v133_v58  ;;  %v5450_v56 = vpack.c.bf16 %v237_v54, %v235_v50 }
 0x133   :  { %v440_v59 = vpop.f32.mrb[1].mxu0  ;;  %v445_v8 = vrot.slane %v438_v57, 1  ;;  %v451_v14 = vadd.f32 %v438_v57, %v6825_v11  ;;  %v234_v57 = vld [vmem:[%s8196_s5 + $0x60] sm:$0xff]  ;;  %5449 = vmatpush1.bf16.msra.mxu1 %v5448_v55 }
 0x134   :  { %v446_v60 = vrot.slane %v440_v59, 1  ;;  %v215_v61 = vpop.f32.mrb[2].mxu1  ;;  %v6813_v3 = vadd.f32 %v440_v59, %v6805_v63  ;;  %5451 = vmatprep.subr.bf16.mxu1 %v5450_v56 }
 0x135   :  { %v217_v62 = vpop.f32.mrb[3].mxu1  ;;  %v6823_v10 = vadd.f32 %v215_v61, %v129_v7  ;;  %v5006_v16 = vmul.f32 -1.442695, %v451_v14 }
 0x136   :  { %v6807_v1 = vadd.f32 %v217_v62, %v133_v58  ;;  %v236_v58 = vld [vmem:[%s8196_s5 + $0x70] sm:$0xff] }
 0x137   :  { %v453_v12 = vadd.f32 %v445_v8, %v6823_v10  ;;  %v5452_v59 = vpack.c.bf16 %v236_v58, %v234_v57 }
 0x138   :  { %v6810_v2 = vadd.f32 %v446_v60, %v6807_v1  ;;  %v220_v60 = vld [vmem:[#allocation5] sm:$0xff] }
 0x139   :  { %v5008_v15 = vmul.f32 -1.442695, %v453_v12  ;;  %5453 = vmatpush1.bf16.msra.mxu1 %v5452_v59 }
 0x13a   :  { %5905 = vtanh.f32 %v6810_v2  ;;  %5471 = vmatprep.subr.bf16.mxu1 %v6678_v9 }
 0x13b   :  { %5907 = vtanh.f32 %v6813_v3 }
 0x13c   :  { %5909 = vpow2.f32 %v5008_v15  ;;  %5004 = vmatmul.mubr.msk.f32.vlgmr.msra.gmra.mrb[4].mxu1 %vm136_vm0, %v220_v60 }
 0x13d   :  { %5911 = vpow2.f32 %v5006_v16  ;;  %5473 = vmatpush1.bf16.msra.mxu1 %v6689_v13  ;;  %326 = vmatprep.mubr.f32.mxu1 %v6500_v0  ;;  %v5009_v16 = vmul.f32 -1.442695, %v6810_v2 }
 0x13e   :  { %5475 = vmatprep.subr.bf16.mxu1 %v6711_v22 }
 0x141   :  { %5477 = vmatpush1.bf16.msra.mxu1 %v6722_v26 }
 0x142   :  { %5479 = vmatprep.subr.bf16.mxu1 %v6743_v35 }
 0x144   :  { %v5906_v4 = vpop.eup %5905 }
 0x145   :  { %487 = vrot.lane.b32.xlu0 %v5906_v4, %s6501_s4  ;;  %v5908_v5 = vpop.eup %5907  ;;  %5481 = vmatpush1.bf16.msra.mxu1 %v6755_v39 }
 0x146   :  { %v5910_v17 = vpop.eup %5909  ;;  %5483 = vmatprep.subr.bf16.mxu1 %v6767_v44 }
 0x147   :  { %v469_v18 = vadd.f32 1.0, %v5910_v17  ;;  %v5912_v19 = vpop.eup %5911  ;;  %v5007_v17 = vmul.f32 -1.442695, %v6813_v3 }
 0x148   :  { %v467_v20 = vadd.f32 1.0, %v5912_v19 }
 0x149   :  { %485 = vrot.lane.b32.xlu0 %v5908_v5, %s6501_s4  ;;  %5913 = vrcp.f32 %v469_v18  ;;  %5485 = vmatpush1.bf16.msra.mxu1 %v6776_v48  ;;  %v221_v5 = vld [vmem:[#allocation5 + $0x8] sm:$0xff] }
 0x14a   :  { %5915 = vrcp.f32 %v467_v20  ;;  %5503 = vmatprep.subr.bf16.mxu1 %v6678_v9  ;;  %5005 = vmatmul.mubr.msk.f32.gmra.mrb[6].mxu1 %vm136_vm0, %v221_v5  ;;  %v238_v20 = vld [vmem:[%s8198_s7] sm:$0x3] }
 0x14b   :  { %613 = vmatprep.mubr.f32.mxu1 %v6500_v0 }
 0x153   :  { %v5914_v21 = vpop.eup %5913 }
 0x154   :  { %v5916_v25 = vpop.eup %5915  ;;  %v482_v61 = vmul.f32 0.0, %v5914_v21 }
 0x155   :  { %v481_v7 = vmul.f32 0.0, %v5916_v25 }
 0x1b7   :  { %v488_v23 = vpop.permute.xlu0 %487 }
 0x1b8   :  { %v492_v24 = vmul.f32 %v5914_v21, %v488_v23  ;;  %v243_v23 = vrot.slane %v238_v20, %v6820_v6 }
 0x1ba   :  { %497 = vrot.lane.b32.xlu1 %v492_v24, %s6501_s4 }
 0x1bb   :  { %v486_v27 = vpop.permute.xlu0 %485 }
 0x1bc   :  { %v491_v28 = vmul.f32 %v5916_v25, %v486_v27 }
 0x1be   :  { %495 = vrot.lane.b32.xlu1 %v491_v28, %s6501_s4 }
 0x20f   :  { %v322_v25 = vpop.f32.mrb[4].mxu1 }
 0x210   :  { %v6906_v27 = vadd.f32 %v322_v25, %v243_v23  ;;  %v6908_v28 = vpop.f32.mrb[5].mxu1 }
 0x21d   :  { %v328_v36 = vpop.f32.mrb[6].mxu1 }
 0x21e   :  { %v6927_v37 = vadd.f32 %v328_v36, %v243_v23  ;;  %v6929_v38 = vpop.f32.mrb[7].mxu1 }
 0x22c   :  { %v498_v62 = vpop.permute.xlu1 %497 }
 0x22d   :  { %v6890_v4 = vadd.f32 %v498_v62, %v482_v61 }
 0x22f   :  { %5917 = vtanh.f32 %v6890_v4 }
 0x230   :  { %v496_v8 = vpop.permute.xlu1 %495 }
 0x231   :  { %v6895_v12 = vadd.f32 %v496_v8, %v481_v7 }
 0x233   :  { %5919 = vtanh.f32 %v6895_v12 }
 0x234   :  { %5921 = vpow2.f32 %v5009_v16 }
 0x235   :  { %5923 = vpow2.f32 %v5007_v17 }
 0x239   :  { %v5918_v14 = vpop.eup %5917 }
 0x23a   :  { %509 = vrot.lane.b32.xlu0 %v5918_v14, %s6501_s4 }
 0x23d   :  { %v5920_v15 = vpop.eup %5919 }
 0x23e   :  { %507 = vrot.lane.b32.xlu1 %v5920_v15, %s6501_s4  ;;  %v5922_v18 = vpop.eup %5921  ;;  %v535_v15 = vrot.slane %v6890_v4, 7  ;;  %v6509_v4 = vmov 7  }
 0x23f   :  { %v470_v19 = vadd.f32 1.0, %v5922_v18  ;;  %v5924_v21 = vpop.eup %5923 }
 0x240   :  { %v468_v24 = vadd.f32 1.0, %v5924_v21 }
 0x241   :  { %5925 = vrcp.f32 %v470_v19  ;;  %v658_v19 = vrot.slane %v6895_v12, 7 }
 0x242   :  { %5927 = vrcp.f32 %v468_v24 }
 0x24b   :  { %v5926_v2 = vpop.eup %5925 }
 0x24c   :  { %v5928_v30 = vpop.eup %5927 }
 0x2ac   :  { %v510_v3 = vpop.permute.xlu0 %509 }
 0x2ad   :  { %v6910_v29 = vmul.f32 %v5926_v2, %v510_v3 }
 0x2af   :  { %v545_v32 = vrot.slane %v6910_v29, 7 }
 0x2b0   :  { %v508_v31 = vpop.permute.xlu1 %507 }
 0x2b1   :  { %v6913_v33 = vmul.f32 %v5928_v30, %v508_v31 }
 0x2b3   :  { %v546_v34 = vsel %vm536_vm1, %v545_v32, %v6913_v33 }
 0x2b4   :  { %5010 = vmatmul.mubr.msk.f32.vlgmr.msra.gmra.mrb[8].mxu1 %vm136_vm0, %v546_v34 }
 0x2b5   :  { %5505 = vmatpush1.bf16.msra.mxu1 %v6689_v13  ;;  %974 = vmatprep.mubr.f32.mxu1 %v6500_v0 }
 0x2b6   :  { %5507 = vmatprep.subr.bf16.mxu1 %v6711_v22 }
 0x2b9   :  { %5509 = vmatpush1.bf16.msra.mxu1 %v6722_v26 }
 0x2ba   :  { %5511 = vmatprep.subr.bf16.mxu1 %v6743_v35 }
 0x2bd   :  { %5513 = vmatpush1.bf16.msra.mxu1 %v6755_v39 }
 0x2be   :  { %5515 = vmatprep.subr.bf16.mxu1 %v6767_v44 }
 0x2c1   :  { %5517 = vmatpush1.bf16.msra.mxu1 %v6776_v48 }
 0x2c2   :  { %5535 = vmatprep.subr.bf16.mxu1 %v6678_v9 }
 0x387   :  { %v615_v40 = vpop.f32.mrb[8].mxu1 }
 0x388   :  { %v617_v41 = vpop.f32.mrb[9].mxu1  ;;  %v630_v49 = vadd.f32 %v615_v40, %v6823_v10  ;;  %v622_v50 = vrot.slane %v615_v40, 7 }
 0x389   :  { %v623_v42 = vrot.slane %v617_v41, 7  ;;  %v631_v43 = vadd.f32 %v617_v41, %v6807_v1 }
 0x38a   :  { %v5013_v54 = vmul.f32 -1.442695, %v630_v49  ;;  %v628_v55 = vadd.f32 %v622_v50, %v6825_v11  ;;  %v521_v50 = vrot.slane %v6913_v33, %v6820_v6 }
 0x38b   :  { %5929 = vtanh.f32 %v631_v43  ;;  %v629_v45 = vadd.f32 %v623_v42, %v6805_v63  ;;  %v5014_v30 = vmul.f32 -1.442695, %v631_v43  ;;  %v525_v42 = vrot.slane %v6910_v29, %v6820_v6 }
 0x38c   :  { %v5011_v56 = vmul.f32 -1.442695, %v628_v55 }
 0x38d   :  { %5931 = vtanh.f32 %v629_v45  ;;  %v5012_v31 = vmul.f32 -1.442695, %v629_v45  ;;  %v527_v45 = vsel %vm515_vm2, %v525_v42, 0.0 }
 0x38e   :  { %5933 = vpow2.f32 %v5013_v54 }
 0x38f   :  { %5935 = vpow2.f32 %v5011_v56 }
 0x395   :  { %v5930_v46 = vpop.eup %5929 }
 0x396   :  { %667 = vrot.lane.b32.xlu1 %v5930_v46, %s6501_s4 }
 0x397   :  { %v5932_v47 = vpop.eup %5931 }
 0x398   :  { %665 = vrot.lane.b32.xlu0 %v5932_v47, %s6501_s4  ;;  %v5934_v57 = vpop.eup %5933 }
 0x399   :  { %v646_v58 = vadd.f32 1.0, %v5934_v57  ;;  %v5936_v59 = vpop.eup %5935 }
 0x39a   :  { %v644_v60 = vadd.f32 1.0, %v5936_v59 }
 0x39b   :  { %5937 = vrcp.f32 %v646_v58  ;;  %v526_v58 = vsel %vm515_vm2, %v521_v50, 0.0 }
 0x39c   :  { %5939 = vrcp.f32 %v644_v60 }
 0x3a5   :  { %v5938_v61 = vpop.eup %5937 }
 0x3a6   :  { %v5940_v7 = vpop.eup %5939  ;;  %v662_v16 = vmul.f32 %v5938_v61, %v535_v15 }
 0x3a7   :  { %v661_v20 = vmul.f32 %v5940_v7, %v658_v19 }
 0x408   :  { %v668_v62 = vpop.permute.xlu1 %667 }
 0x409   :  { %v672_v5 = vmul.f32 %v5938_v61, %v668_v62 }
 0x40a   :  { %v666_v8 = vpop.permute.xlu0 %665 }
 0x40b   :  { %677 = vrot.lane.b32.xlu1 %v672_v5, %s6501_s4  ;;  %v671_v14 = vmul.f32 %v5940_v7, %v666_v8 }
 0x40d   :  { %675 = vrot.lane.b32.xlu0 %v671_v14, %s6501_s4 }
 0x47d   :  { %v678_v17 = vpop.permute.xlu1 %677 }
 0x47e   :  { %v6942_v18 = vadd.f32 %v678_v17, %v662_v16 }
 0x47f   :  { %v676_v21 = vpop.permute.xlu0 %675 }
 0x480   :  { %5941 = vtanh.f32 %v6942_v18  ;;  %v6946_v23 = vadd.f32 %v676_v21, %v661_v20  ;;  %v839_v50 = vrot.slane %v6942_v18, 7 }
 0x482   :  { %5943 = vtanh.f32 %v6946_v23  ;;  %v714_v24 = vrot.slane %v6946_v23, 1 }
 0x483   :  { %5945 = vpow2.f32 %v5014_v30 }
 0x484   :  { %v6952_v25 = vsel %vm536_vm1, %v6942_v18, %v714_v24  ;;  %5947 = vpow2.f32 %v5012_v31 }
 0x48a   :  { %v5942_v2 = vpop.eup %5941 }
 0x48b   :  { %689 = vrot.lane.b32.xlu1 %v5942_v2, %s6501_s4 }
 0x48c   :  { %v5944_v3 = vpop.eup %5943 }
 0x48d   :  { %687 = vrot.lane.b32.xlu0 %v5944_v3, %s6501_s4  ;;  %v5946_v32 = vpop.eup %5945 }
 0x48e   :  { %v647_v34 = vadd.f32 1.0, %v5946_v32  ;;  %v5948_v36 = vpop.eup %5947 }
 0x48f   :  { %v645_v40 = vadd.f32 1.0, %v5948_v36 }
 0x490   :  { %5949 = vrcp.f32 %v647_v34 }
 0x491   :  { %5951 = vrcp.f32 %v645_v40 }
 0x49a   :  { %v5950_v41 = vpop.eup %5949 }
 0x49b   :  { %v5952_v49 = vpop.eup %5951 }
 0x4fd   :  { %v690_v46 = vpop.permute.xlu1 %689 }
 0x4fe   :  { %v694_v47 = vmul.f32 %v5950_v41, %v690_v46 }
 0x4ff   :  { %v688_v29 = vpop.permute.xlu0 %687 }
 0x500   :  { %v705_v43 = vrot.slane %v694_v47, %v6799_v53  ;;  %v693_v55 = vmul.f32 %v5952_v49, %v688_v29 }
 0x502   :  { %v6967_v54 = vsel %vm695_vm3, %v705_v43, %v527_v45  ;;  %v701_v56 = vrot.slane %v693_v55, %v6799_v53  ;;  %v723_v57 = vrot.slane %v693_v55, 1 }
 0x504   :  { %v6974_v59 = vsel %vm695_vm3, %v701_v56, %v526_v58  ;;  %v724_v60 = vsel %vm536_vm1, %v694_v47, %v723_v57  ;;  %v838_v47 = vrot.slane %v6946_v23, 7 }
 0x505   :  { %5015 = vmatmul.mubr.msk.f32.vlgmr.msra.gmra.mrb[2].mxu0 %vm136_vm0, %v724_v60 }
 0x506   :  { %5521 = vmatpush1.bf16.msra.mxu0 %v6689_v13  ;;  %1157 = vmatprep.mubr.f32.mxu0 %v6500_v0 }
 0x507   :  { %5523 = vmatprep.subr.bf16.mxu0 %v6711_v22 }
 0x50a   :  { %5525 = vmatpush1.bf16.msra.mxu0 %v6722_v26 }
 0x50b   :  { %5527 = vmatprep.subr.bf16.mxu0 %v6743_v35 }
 0x50e   :  { %5529 = vmatpush1.bf16.msra.mxu0 %v6755_v39 }
 0x50f   :  { %5531 = vmatprep.subr.bf16.mxu0 %v6767_v44 }
 0x512   :  { %5533 = vmatpush1.bf16.msra.mxu0 %v6776_v48 }
 0x513   :  { %5551 = vmatprep.subr.bf16.mxu0 %v6678_v9 }
 0x5d8   :  { %v793_v33 = vpop.f32.mrb[2].mxu0 }
 0x5d9   :  { %v795_v61 = vpop.f32.mrb[3].mxu0  ;;  %v800_v17 = vrot.slane %v793_v33, 6  ;;  %v802_v20 = vrot.slane %v793_v33, 7 }
 0x5da   :  { %v801_v62 = vrot.slane %v795_v61, 6  ;;  %v803_v5 = vrot.slane %v795_v61, 7 }
 0x5db   :  { %v808_v19 = vadd.f32 %v800_v17, %v6825_v11  ;;  %v810_v24 = vadd.f32 %v802_v20, %v6823_v10  ;;  %v7011_v17 = vsub.s32 2, %v6796_v52 }
 0x5dc   :  { %v809_v7 = vadd.f32 %v801_v62, %v6805_v63  ;;  %v811_v8 = vadd.f32 %v803_v5, %v6807_v1 }
 0x5dd   :  { %v5016_v21 = vmul.f32 -1.442695, %v808_v19  ;;  %v5018_v2 = vmul.f32 -1.442695, %v810_v24 }
 0x5de   :  { %5953 = vtanh.f32 %v809_v7  ;;  %v5017_v18 = vmul.f32 -1.442695, %v809_v7  ;;  %v5019_v61 = vmul.f32 -1.442695, %v811_v8 }
 0x5df   :  { %5955 = vtanh.f32 %v811_v8 }
 0x5e0   :  { %5957 = vpow2.f32 %v5016_v21 }
 0x5e1   :  { %5959 = vpow2.f32 %v5018_v2 }
 0x5e8   :  { %v5954_v14 = vpop.eup %5953 }
 0x5e9   :  { %846 = vrot.lane.b32.xlu0 %v5954_v14, %s6501_s4  ;;  %v5956_v16 = vpop.eup %5955 }
 0x5ea   :  { %848 = vrot.lane.b32.xlu1 %v5956_v16, %s6501_s4  ;;  %v5958_v3 = vpop.eup %5957 }
 0x5eb   :  { %v824_v30 = vadd.f32 1.0, %v5958_v3  ;;  %v5960_v31 = vpop.eup %5959 }
 0x5ec   :  { %v826_v32 = vadd.f32 1.0, %v5960_v31 }
 0x5ed   :  { %5961 = vrcp.f32 %v824_v30 }
 0x5ee   :  { %5963 = vrcp.f32 %v826_v32 }
 0x5f7   :  { %v5962_v34 = vpop.eup %5961 }
 0x5f8   :  { %v5964_v41 = vpop.eup %5963  ;;  %v842_v43 = vmul.f32 %v5962_v34, %v838_v47 }
 0x5f9   :  { %v843_v29 = vmul.f32 %v5964_v41, %v839_v50 }
 0x65b   :  { %v847_v36 = vpop.permute.xlu0 %846 }
 0x65c   :  { %v852_v40 = vmul.f32 %v5962_v34, %v847_v36  ;;  %v849_v42 = vpop.permute.xlu1 %848 }
 0x65d   :  { %v853_v46 = vmul.f32 %v5964_v41, %v849_v42 }
 0x65e   :  { %856 = vrot.lane.b32.xlu0 %v852_v40, %s6501_s4 }
 0x65f   :  { %858 = vrot.lane.b32.xlu1 %v853_v46, %s6501_s4 }
 0x6d0   :  { %v857_v45 = vpop.permute.xlu0 %856 }
 0x6d1   :  { %v6996_v49 = vadd.f32 %v857_v45, %v842_v43  ;;  %v859_v55 = vpop.permute.xlu1 %858 }
 0x6d2   :  { %v7000_v56 = vadd.f32 %v859_v55, %v843_v29 }
 0x6d3   :  { %5965 = vtanh.f32 %v6996_v49  ;;  %v895_v57 = vrot.slane %v6996_v49, 2 }
 0x6d4   :  { %5967 = vtanh.f32 %v7000_v56  ;;  %v896_v58 = vrot.slane %v7000_v56, 1 }
 0x6d5   :  { %5969 = vpow2.f32 %v5017_v18 }
 0x6d6   :  { %v7006_v23 = vsel %vm536_vm1, %v896_v58, %v895_v57  ;;  %5971 = vpow2.f32 %v5019_v61 }
 0x6dd   :  { %v5966_v60 = vpop.eup %5965 }
 0x6de   :  { %868 = vrot.lane.b32.xlu0 %v5966_v60, %s6501_s4  ;;  %v5968_v33 = vpop.eup %5967 }
 0x6df   :  { %870 = vrot.lane.b32.xlu1 %v5968_v33, %s6501_s4  ;;  %v5970_v62 = vpop.eup %5969 }
 0x6e0   :  { %v825_v5 = vadd.f32 1.0, %v5970_v62  ;;  %v5972_v14 = vpop.eup %5971 }
 0x6e1   :  { %v827_v16 = vadd.f32 1.0, %v5972_v14 }
 0x6e2   :  { %5973 = vrcp.f32 %v825_v5 }
 0x6e3   :  { %5975 = vrcp.f32 %v827_v16 }
 0x6ec   :  { %v5974_v19 = vpop.eup %5973 }
 0x6ed   :  { %v5976_v7 = vpop.eup %5975 }
 0x750   :  { %v869_v20 = vpop.permute.xlu0 %868 }
 0x751   :  { %v874_v21 = vmul.f32 %v5974_v19, %v869_v20  ;;  %v871_v2 = vpop.permute.xlu1 %870  ;;  %v1021_v20 = vrot.slane %v6996_v49, 7 }
 0x752   :  { %v875_v3 = vmul.f32 %v5976_v7, %v871_v2  ;;  %v1022_v2 = vrot.slane %v7000_v56, 7 }
 0x753   :  { %v882_v24 = vrot.slane %v874_v21, %v7011_v17  ;;  %v905_v30 = vrot.slane %v874_v21, 2 }
 0x754   :  { %v886_v31 = vrot.slane %v875_v3, %v7011_v17  ;;  %v906_v32 = vrot.slane %v875_v3, 1 }
 0x755   :  { %v7018_v8 = vsel %vm876_vm4, %v882_v24, %v6974_v59 }
 0x756   :  { %v7024_v34 = vsel %vm876_vm4, %v886_v31, %v6967_v54  ;;  %v907_v36 = vsel %vm536_vm1, %v906_v32, %v905_v30 }
 0x757   :  { %5020 = vmatmul.mubr.msk.f32.vlgmr.msra.gmra.mrb[10].mxu1 %vm136_vm0, %v907_v36 }
 0x758   :  { %5537 = vmatpush1.bf16.msra.mxu1 %v6689_v13  ;;  %1340 = vmatprep.mubr.f32.mxu1 %v6500_v0 }
 0x759   :  { %5539 = vmatprep.subr.bf16.mxu1 %v6711_v22 }
 0x75c   :  { %5541 = vmatpush1.bf16.msra.mxu1 %v6722_v26 }
 0x75d   :  { %5543 = vmatprep.subr.bf16.mxu1 %v6743_v35 }
 0x760   :  { %5545 = vmatpush1.bf16.msra.mxu1 %v6755_v39 }
 0x761   :  { %5547 = vmatprep.subr.bf16.mxu1 %v6767_v44 }
 0x764   :  { %5549 = vmatpush1.bf16.msra.mxu1 %v6776_v48 }
 0x765   :  { %5567 = vmatprep.subr.bf16.mxu1 %v6678_v9 }
 0x82a   :  { %v976_v54 = vpop.f32.mrb[10].mxu1 }
 0x82b   :  { %v978_v59 = vpop.f32.mrb[11].mxu1  ;;  %v983_v45 = vrot.slane %v976_v54, 5  ;;  %v985_v9 = vrot.slane %v976_v54, 6 }
 0x82c   :  { %v984_v40 = vrot.slane %v978_v59, 5  ;;  %v986_v41 = vrot.slane %v978_v59, 6 }
 0x82d   :  { %v991_v50 = vadd.f32 %v983_v45, %v6825_v11  ;;  %v993_v55 = vadd.f32 %v985_v9, %v6823_v10 }
 0x82e   :  { %v992_v42 = vadd.f32 %v984_v40, %v6805_v63  ;;  %v994_v46 = vadd.f32 %v986_v41, %v6807_v1 }
 0x82f   :  { %v5021_v29 = vmul.f32 -1.442695, %v991_v50  ;;  %v5023_v57 = vmul.f32 -1.442695, %v993_v55  ;;  %v7061_v50 = vsub.s32 3, %v6796_v52 }
 0x830   :  { %5977 = vtanh.f32 %v992_v42  ;;  %v5022_v56 = vmul.f32 -1.442695, %v992_v42  ;;  %v5024_v40 = vmul.f32 -1.442695, %v994_v46 }
 0x831   :  { %5979 = vtanh.f32 %v994_v46 }
 0x832   :  { %5981 = vpow2.f32 %v5021_v29 }
 0x833   :  { %5983 = vpow2.f32 %v5023_v57 }
 0x83a   :  { %v5978_v47 = vpop.eup %5977 }
 0x83b   :  { %1029 = vrot.lane.b32.xlu0 %v5978_v47, %s6501_s4  ;;  %v5980_v43 = vpop.eup %5979 }
 0x83c   :  { %1031 = vrot.lane.b32.xlu1 %v5980_v43, %s6501_s4  ;;  %v5982_v58 = vpop.eup %5981 }
 0x83d   :  { %v1007_v60 = vadd.f32 1.0, %v5982_v58  ;;  %v5984_v33 = vpop.eup %5983 }
 0x83e   :  { %v1009_v18 = vadd.f32 1.0, %v5984_v33 }
 0x83f   :  { %5985 = vrcp.f32 %v1007_v60 }
 0x840   :  { %5987 = vrcp.f32 %v1009_v18 }
 0x849   :  { %v5986_v61 = vpop.eup %5985 }
 0x84a   :  { %v5988_v14 = vpop.eup %5987  ;;  %v1025_v21 = vmul.f32 %v5986_v61, %v1021_v20 }
 0x84b   :  { %v1026_v3 = vmul.f32 %v5988_v14, %v1022_v2 }
 0x8ad   :  { %v1030_v62 = vpop.permute.xlu0 %1029 }
 0x8ae   :  { %v1035_v5 = vmul.f32 %v5986_v61, %v1030_v62  ;;  %v1032_v16 = vpop.permute.xlu1 %1031 }
 0x8af   :  { %v1036_v19 = vmul.f32 %v5988_v14, %v1032_v16 }
 0x8b0   :  { %1039 = vrot.lane.b32.xlu0 %v1035_v5, %s6501_s4 }
 0x8b1   :  { %1041 = vrot.lane.b32.xlu1 %v1036_v19, %s6501_s4 }
 0x922   :  { %v1040_v24 = vpop.permute.xlu0 %1039 }
 0x923   :  { %v7046_v7 = vadd.f32 %v1040_v24, %v1025_v21  ;;  %v1042_v30 = vpop.permute.xlu1 %1041 }
 0x924   :  { %v7050_v31 = vadd.f32 %v1042_v30, %v1026_v3 }
 0x925   :  { %5989 = vtanh.f32 %v7046_v7  ;;  %v1078_v32 = vrot.slane %v7046_v7, 3 }
 0x926   :  { %5991 = vtanh.f32 %v7050_v31  ;;  %v1079_v36 = vrot.slane %v7050_v31, 2 }
 0x927   :  { %5993 = vpow2.f32 %v5022_v56 }
 0x928   :  { %v7056_v49 = vsel %vm536_vm1, %v1079_v36, %v1078_v32  ;;  %5995 = vpow2.f32 %v5024_v40 }
 0x92f   :  { %v5990_v54 = vpop.eup %5989 }
 0x930   :  { %1051 = vrot.lane.b32.xlu0 %v5990_v54, %s6501_s4  ;;  %v5992_v59 = vpop.eup %5991 }
 0x931   :  { %1053 = vrot.lane.b32.xlu1 %v5992_v59, %s6501_s4  ;;  %v5994_v41 = vpop.eup %5993 }
 0x932   :  { %v1008_v47 = vadd.f32 1.0, %v5994_v41  ;;  %v5996_v43 = vpop.eup %5995 }
 0x933   :  { %v1010_v45 = vadd.f32 1.0, %v5996_v43 }
 0x934   :  { %5997 = vrcp.f32 %v1008_v47 }
 0x935   :  { %5999 = vrcp.f32 %v1010_v45 }
 0x93e   :  { %v5998_v9 = vpop.eup %5997 }
 0x93f   :  { %v6000_v42 = vpop.eup %5999 }
 0x9a2   :  { %v1052_v29 = vpop.permute.xlu0 %1051 }
 0x9a3   :  { %v1057_v55 = vmul.f32 %v5998_v9, %v1052_v29  ;;  %v1054_v58 = vpop.permute.xlu1 %1053 }
 0x9a4   :  { %v1058_v60 = vmul.f32 %v6000_v42, %v1054_v58 }
 0x9a5   :  { %v1065_v57 = vrot.slane %v1057_v55, %v7061_v50  ;;  %v1088_v33 = vrot.slane %v1057_v55, 3 }
 0x9a6   :  { %v1069_v18 = vrot.slane %v1058_v60, %v7061_v50  ;;  %v1089_v61 = vrot.slane %v1058_v60, 2 }
 0x9a7   :  { %v7068_v46 = vsel %vm1059_vm5, %v1065_v57, %v7018_v8  ;;  %v1204_v57 = vrot.slane %v7046_v7, 7 }
 0x9a8   :  { %v7074_v62 = vsel %vm1059_vm5, %v1069_v18, %v7024_v34  ;;  %v1090_v5 = vsel %vm536_vm1, %v1089_v61, %v1088_v33  ;;  %v1205_v33 = vrot.slane %v7050_v31, 7 }
 0x9a9   :  { %5025 = vmatmul.mubr.msk.f32.vlgmr.msra.gmra.mrb[4].mxu0 %vm136_vm0, %v1090_v5 }
 0x9aa   :  { %5553 = vmatpush1.bf16.msra.mxu0 %v6689_v13  ;;  %1523 = vmatprep.mubr.f32.mxu0 %v6500_v0 }
 0x9ab   :  { %5555 = vmatprep.subr.bf16.mxu0 %v6711_v22 }
 0x9ae   :  { %5557 = vmatpush1.bf16.msra.mxu0 %v6722_v26 }
 0x9af   :  { %5559 = vmatprep.subr.bf16.mxu0 %v6743_v35 }
 0x9b2   :  { %5561 = vmatpush1.bf16.msra.mxu0 %v6755_v39 }
 0x9b3   :  { %5563 = vmatprep.subr.bf16.mxu0 %v6767_v44 }
 0x9b6   :  { %5565 = vmatpush1.bf16.msra.mxu0 %v6776_v48 }
 0xa7c   :  { %v1159_v8 = vpop.f32.mrb[4].mxu0 }
 0xa7d   :  { %v1161_v34 = vpop.f32.mrb[5].mxu0  ;;  %v1166_v2 = vrot.slane %v1159_v8, 4  ;;  %v1168_v30 = vrot.slane %v1159_v8, 5 }
 0xa7e   :  { %v1167_v14 = vrot.slane %v1161_v34, 4  ;;  %v1169_v16 = vrot.slane %v1161_v34, 5 }
 0xa7f   :  { %v1174_v3 = vadd.f32 %v1166_v2, %v6825_v11  ;;  %v1176_v36 = vadd.f32 %v1168_v30, %v6823_v10 }
 0xa80   :  { %v1175_v19 = vadd.f32 %v1167_v14, %v6805_v63  ;;  %v1177_v20 = vadd.f32 %v1169_v16, %v6807_v1 }
 0xa81   :  { %v5026_v32 = vmul.f32 -1.442695, %v1174_v3  ;;  %v5028_v54 = vmul.f32 -1.442695, %v1176_v36 }
 0xa82   :  { %6001 = vtanh.f32 %v1175_v19  ;;  %v5027_v31 = vmul.f32 -1.442695, %v1175_v19 }
 0xa83   :  { %6003 = vtanh.f32 %v1177_v20 }
 0xa84   :  { %6005 = vpow2.f32 %v5026_v32  ;;  %v7110_v32 = vsub.s32 4, %v6796_v52 }
 0xa85   :  { %6007 = vpow2.f32 %v5028_v54 }
 0xa8c   :  { %v6002_v21 = vpop.eup %6001 }
 0xa8d   :  { %1212 = vrot.lane.b32.xlu0 %v6002_v21, %s6501_s4  ;;  %v6004_v24 = vpop.eup %6003  ;;  %v5029_v21 = vmul.f32 -1.442695, %v1177_v20 }
 0xa8e   :  { %1214 = vrot.lane.b32.xlu1 %v6004_v24, %s6501_s4  ;;  %v6006_v59 = vpop.eup %6005 }
 0xa8f   :  { %v1190_v56 = vadd.f32 1.0, %v6006_v59  ;;  %v6008_v40 = vpop.eup %6007 }
 0xa90   :  { %v1192_v41 = vadd.f32 1.0, %v6008_v40 }
 0xa91   :  { %6009 = vrcp.f32 %v1190_v56 }
 0xa92   :  { %6011 = vrcp.f32 %v1192_v41 }
 0xa9b   :  { %v6010_v47 = vpop.eup %6009 }
 0xa9c   :  { %v6012_v9 = vpop.eup %6011  ;;  %v1208_v42 = vmul.f32 %v6010_v47, %v1204_v57 }
 0xa9d   :  { %v1209_v18 = vmul.f32 %v6012_v9, %v1205_v33 }
 0xaff   :  { %v1213_v43 = vpop.permute.xlu0 %1212 }
 0xb00   :  { %v1218_v45 = vmul.f32 %v6010_v47, %v1213_v43  ;;  %v1215_v29 = vpop.permute.xlu1 %1214 }
 0xb01   :  { %v1219_v55 = vmul.f32 %v6012_v9, %v1215_v29 }
 0xb02   :  { %1222 = vrot.lane.b32.xlu0 %v1218_v45, %s6501_s4 }
 0xb03   :  { %1224 = vrot.lane.b32.xlu1 %v1219_v55, %s6501_s4 }
 0xb74   :  { %v1223_v58 = vpop.permute.xlu0 %1222 }
 0xb75   :  { %v7095_v60 = vadd.f32 %v1223_v58, %v1208_v42  ;;  %v1225_v61 = vpop.permute.xlu1 %1224 }
 0xb76   :  { %v7099_v5 = vadd.f32 %v1225_v61, %v1209_v18 }
 0xb77   :  { %6013 = vtanh.f32 %v7095_v60  ;;  %v1261_v8 = vrot.slane %v7095_v60, 4 }
 0xb78   :  { %6015 = vtanh.f32 %v7099_v5  ;;  %v1262_v34 = vrot.slane %v7099_v5, 3 }
 0xb79   :  { %6017 = vpow2.f32 %v5027_v31 }
 0xb7a   :  { %v7105_v7 = vsel %vm536_vm1, %v1262_v34, %v1261_v8  ;;  %6019 = vpow2.f32 %v5029_v21 }
 0xb81   :  { %v6014_v14 = vpop.eup %6013 }
 0xb82   :  { %1234 = vrot.lane.b32.xlu0 %v6014_v14, %s6501_s4  ;;  %v6016_v16 = vpop.eup %6015 }
 0xb83   :  { %1236 = vrot.lane.b32.xlu1 %v6016_v16, %s6501_s4  ;;  %v6018_v24 = vpop.eup %6017 }
 0xb84   :  { %v1191_v2 = vadd.f32 1.0, %v6018_v24  ;;  %v6020_v3 = vpop.eup %6019 }
 0xb85   :  { %v1193_v30 = vadd.f32 1.0, %v6020_v3  ;;  %v1387_v3 = vrot.slane %v7095_v60, 7 }
 0xb86   :  { %6021 = vrcp.f32 %v1191_v2 }
 0xb87   :  { %6023 = vrcp.f32 %v1193_v30 }
 0xb90   :  { %v6022_v36 = vpop.eup %6021 }
 0xb91   :  { %v6024_v19 = vpop.eup %6023 }
 0xbf4   :  { %v1235_v54 = vpop.permute.xlu0 %1234 }
 0xbf5   :  { %v1240_v59 = vmul.f32 %v6022_v36, %v1235_v54  ;;  %v1237_v40 = vpop.permute.xlu1 %1236 }
 0xbf6   :  { %v1241_v41 = vmul.f32 %v6024_v19, %v1237_v40 }
 0xbf7   :  { %v1248_v56 = vrot.slane %v1240_v59, %v7110_v32  ;;  %v1271_v47 = vrot.slane %v1240_v59, 4  ;;  %v1388_v59 = vrot.slane %v7099_v5, 7 }
 0xbf8   :  { %v1252_v43 = vrot.slane %v1241_v41, %v7110_v32  ;;  %v1272_v45 = vrot.slane %v1241_v41, 3 }
 0xbf9   :  { %v7117_v20 = vsel %vm1242_vm6, %v1248_v56, %v7068_v46 }
 0xbfa   :  { %v7123_v9 = vsel %vm1242_vm6, %v1252_v43, %v7074_v62  ;;  %v1273_v29 = vsel %vm536_vm1, %v1272_v45, %v1271_v47 }
 0xbfb   :  { %5030 = vmatmul.mubr.msk.f32.vlgmr.msra.gmra.mrb[12].mxu1 %vm136_vm0, %v1273_v29 }
 0xbfc   :  { %5569 = vmatpush1.bf16.msra.mxu1 %v6689_v13  ;;  %1706 = vmatprep.mubr.f32.mxu1 %v6500_v0 }
 0xbfd   :  { %5571 = vmatprep.subr.bf16.mxu1 %v6711_v22 }
 0xc00   :  { %5573 = vmatpush1.bf16.msra.mxu1 %v6722_v26 }
 0xc01   :  { %5575 = vmatprep.subr.bf16.mxu1 %v6743_v35 }
 0xc04   :  { %5577 = vmatpush1.bf16.msra.mxu1 %v6755_v39 }
 0xc05   :  { %5579 = vmatprep.subr.bf16.mxu1 %v6767_v44 }
 0xc08   :  { %5581 = vmatpush1.bf16.msra.mxu1 %v6776_v48 }
 0xcce   :  { %v1342_v46 = vpop.f32.mrb[12].mxu1 }
 0xccf   :  { %v1344_v62 = vpop.f32.mrb[13].mxu1  ;;  %v1349_v35 = vrot.slane %v1342_v46, 3  ;;  %v1351_v44 = vrot.slane %v1342_v46, 4 }
 0xcd0   :  { %v1350_v55 = vrot.slane %v1344_v62, 3  ;;  %v1352_v57 = vrot.slane %v1344_v62, 4 }
 0xcd1   :  { %v1357_v39 = vadd.f32 %v1349_v35, %v6825_v11  ;;  %v1359_v58 = vadd.f32 %v1351_v44, %v6823_v10 }
 0xcd2   :  { %v1358_v13 = vadd.f32 %v1350_v55, %v6805_v63  ;;  %v1360_v42 = vadd.f32 %v1352_v57, %v6807_v1 }
 0xcd3   :  { %v5031_v48 = vmul.f32 -1.442695, %v1357_v39  ;;  %v5033_v33 = vmul.f32 -1.442695, %v1359_v58 }
 0xcd4   :  { %6025 = vtanh.f32 %v1358_v13  ;;  %v5032_v5 = vmul.f32 -1.442695, %v1358_v13  ;;  %v5034_v29 = vmul.f32 -1.442695, %v1360_v42 }
 0xcd5   :  { %6027 = vtanh.f32 %v1360_v42 }
 0xcd6   :  { %6029 = vpow2.f32 %v5031_v48 }
 0xcd7   :  { %6031 = vpow2.f32 %v5033_v33 }
 0xcde   :  { %v6026_v22 = vpop.eup %6025 }
 0xcdf   :  { %1395 = vrot.lane.b32.xlu0 %v6026_v22, %s6501_s4  ;;  %v6028_v26 = vpop.eup %6027  ;;  %v7159_v22 = vsub.s32 5, %v6796_v52 }
 0xce0   :  { %1397 = vrot.lane.b32.xlu1 %v6028_v26, %s6501_s4  ;;  %v6030_v18 = vpop.eup %6029 }
 0xce1   :  { %v1373_v61 = vadd.f32 1.0, %v6030_v18  ;;  %v6032_v8 = vpop.eup %6031 }
 0xce2   :  { %v1375_v34 = vadd.f32 1.0, %v6032_v8 }
 0xce3   :  { %6033 = vrcp.f32 %v1373_v61 }
 0xce4   :  { %6035 = vrcp.f32 %v1375_v34 }
 0xced   :  { %v6034_v14 = vpop.eup %6033 }
 0xcee   :  { %v6036_v21 = vpop.eup %6035  ;;  %v1391_v30 = vmul.f32 %v6034_v14, %v1387_v3 }
 0xcef   :  { %v1392_v56 = vmul.f32 %v6036_v21, %v1388_v59 }
 0xd51   :  { %v1396_v16 = vpop.permute.xlu0 %1395 }
 0xd52   :  { %v1401_v31 = vmul.f32 %v6034_v14, %v1396_v16  ;;  %v1398_v24 = vpop.permute.xlu1 %1397 }
 0xd53   :  { %v1402_v2 = vmul.f32 %v6036_v21, %v1398_v24 }
 0xd54   :  { %1405 = vrot.lane.b32.xlu0 %v1401_v31, %s6501_s4 }
 0xd55   :  { %1407 = vrot.lane.b32.xlu1 %v1402_v2, %s6501_s4 }
 0xdc6   :  { %v1406_v36 = vpop.permute.xlu0 %1405 }
 0xdc7   :  { %v7144_v54 = vadd.f32 %v1406_v36, %v1391_v30  ;;  %v1408_v19 = vpop.permute.xlu1 %1407 }
 0xdc8   :  { %v7148_v40 = vadd.f32 %v1408_v19, %v1392_v56 }
 0xdc9   :  { %6037 = vtanh.f32 %v7144_v54  ;;  %v1444_v41 = vrot.slane %v7144_v54, 5 }
 0xdca   :  { %6039 = vtanh.f32 %v7148_v40  ;;  %v1445_v47 = vrot.slane %v7148_v40, 4 }
 0xdcb   :  { %6041 = vpow2.f32 %v5032_v5 }
 0xdcc   :  { %v7154_v60 = vsel %vm536_vm1, %v1445_v47, %v1444_v41  ;;  %6043 = vpow2.f32 %v5034_v29 }
 0xdd3   :  { %v6038_v43 = vpop.eup %6037 }
 0xdd4   :  { %1417 = vrot.lane.b32.xlu0 %v6038_v43, %s6501_s4  ;;  %v6040_v45 = vpop.eup %6039 }
 0xdd5   :  { %1419 = vrot.lane.b32.xlu1 %v6040_v45, %s6501_s4  ;;  %v6042_v46 = vpop.eup %6041 }
 0xdd6   :  { %v1374_v62 = vadd.f32 1.0, %v6042_v46  ;;  %v6044_v55 = vpop.eup %6043 }
 0xdd7   :  { %v1376_v57 = vadd.f32 1.0, %v6044_v55 }
 0xdd8   :  { %6045 = vrcp.f32 %v1374_v62 }
 0xdd9   :  { %6047 = vrcp.f32 %v1376_v57 }
 0xde2   :  { %v6046_v26 = vpop.eup %6045 }
 0xde3   :  { %v6048_v13 = vpop.eup %6047 }
 0xe46   :  { %v1418_v35 = vpop.permute.xlu0 %1417 }
 0xe47   :  { %v1423_v39 = vmul.f32 %v6046_v26, %v1418_v35  ;;  %v1420_v48 = vpop.permute.xlu1 %1419  ;;  %v1570_v26 = vrot.slane %v7144_v54, 7 }
 0xe48   :  { %v1424_v58 = vmul.f32 %v6048_v13, %v1420_v48  ;;  %v1571_v13 = vrot.slane %v7148_v40, 7 }
 0xe49   :  { %v1431_v44 = vrot.slane %v1423_v39, %v7159_v22  ;;  %v1454_v33 = vrot.slane %v1423_v39, 5 }
 0xe4a   :  { %v1435_v18 = vrot.slane %v1424_v58, %v7159_v22  ;;  %v1455_v61 = vrot.slane %v1424_v58, 4 }
 0xe4b   :  { %v7166_v42 = vsel %vm1425_vm7, %v1431_v44, %v7117_v20 }
 0xe4c   :  { %v7172_v8 = vsel %vm1425_vm7, %v1435_v18, %v7123_v9  ;;  %v1456_v34 = vsel %vm536_vm1, %v1455_v61, %v1454_v33 }
 0xe4d   :  { %5035 = vmatmul.mubr.msk.f32.vlgmr.msra.gmra.mrb[6].mxu0 %vm136_vm0, %v1456_v34 }
 0xe4e   :  { %1917 = vmatprep.mubr.f32.mxu0 %v6500_v0 }
 0xf20   :  { %v1525_v14 = vpop.f32.mrb[6].mxu0 }
 0xf21   :  { %v1527_v16 = vpop.f32.mrb[7].mxu0  ;;  %v1532_v3 = vrot.slane %v1525_v14, 2  ;;  %v1534_v36 = vrot.slane %v1525_v14, 3 }
 0xf22   :  { %v1533_v20 = vrot.slane %v1527_v16, 2  ;;  %v1535_v31 = vrot.slane %v1527_v16, 3 }
 0xf23   :  { %v1540_v30 = vadd.f32 %v1532_v3, %v6825_v11  ;;  %v1542_v56 = vadd.f32 %v1534_v36, %v6823_v10  ;;  %v7201_v3 = vsub.s32 6, %v6796_v52 }
 0xf24   :  { %v1541_v21 = vadd.f32 %v1533_v20, %v6805_v63  ;;  %v1543_v24 = vadd.f32 %v1535_v31, %v6807_v1 }
 0xf25   :  { %v5036_v59 = vmul.f32 -1.442695, %v1540_v30  ;;  %v5038_v19 = vmul.f32 -1.442695, %v1542_v56 }
 0xf26   :  { %6049 = vtanh.f32 %v1541_v21  ;;  %v5037_v40 = vmul.f32 -1.442695, %v1541_v21  ;;  %v5039_v16 = vmul.f32 -1.442695, %v1543_v24 }
 0xf27   :  { %6051 = vtanh.f32 %v1543_v24 }
 0xf28   :  { %6053 = vpow2.f32 %v5036_v59 }
 0xf29   :  { %6055 = vpow2.f32 %v5038_v19 }
 0xf30   :  { %v6050_v2 = vpop.eup %6049 }
 0xf31   :  { %1578 = vrot.lane.b32.xlu0 %v6050_v2, %s6501_s4  ;;  %v6052_v9 = vpop.eup %6051 }
 0xf32   :  { %1580 = vrot.lane.b32.xlu1 %v6052_v9, %s6501_s4  ;;  %v6054_v41 = vpop.eup %6053 }
 0xf33   :  { %v1556_v47 = vadd.f32 1.0, %v6054_v41  ;;  %v6056_v43 = vpop.eup %6055 }
 0xf34   :  { %v1558_v45 = vadd.f32 1.0, %v6056_v43 }
 0xf35   :  { %6057 = vrcp.f32 %v1556_v47 }
 0xf36   :  { %6059 = vrcp.f32 %v1558_v45 }
 0xf3f   :  { %v6058_v5 = vpop.eup %6057 }
 0xf40   :  { %v6060_v62 = vpop.eup %6059  ;;  %v1574_v35 = vmul.f32 %v6058_v5, %v1570_v26 }
 0xf41   :  { %v1575_v48 = vmul.f32 %v6060_v62, %v1571_v13 }
 0xfa3   :  { %v1579_v29 = vpop.permute.xlu0 %1578 }
 0xfa4   :  { %v1584_v46 = vmul.f32 %v6058_v5, %v1579_v29  ;;  %v1581_v55 = vpop.permute.xlu1 %1580 }
 0xfa5   :  { %v1585_v57 = vmul.f32 %v6060_v62, %v1581_v55 }
 0xfa6   :  { %1588 = vrot.lane.b32.xlu0 %v1584_v46, %s6501_s4 }
 0xfa7   :  { %1590 = vrot.lane.b32.xlu1 %v1585_v57, %s6501_s4 }
0x1018   :  { %v1589_v39 = vpop.permute.xlu0 %1588 }
0x1019   :  { %v7186_v44 = vadd.f32 %v1589_v39, %v1574_v35  ;;  %v1591_v58 = vpop.permute.xlu1 %1590 }
0x101a   :  { %v7190_v33 = vadd.f32 %v1591_v58, %v1575_v48 }
0x101b   :  { %6061 = vtanh.f32 %v7186_v44  ;;  %v1627_v18 = vrot.slane %v7186_v44, 6 }
0x101c   :  { %6063 = vtanh.f32 %v7190_v33  ;;  %v1628_v61 = vrot.slane %v7190_v33, 5 }
0x101d   :  { %6065 = vpow2.f32 %v5037_v40 }
0x101e   :  { %v7196_v54 = vsel %vm536_vm1, %v1628_v61, %v1627_v18  ;;  %6067 = vpow2.f32 %v5039_v16 }
0x1025   :  { %v6062_v34 = vpop.eup %6061 }
0x1026   :  { %1600 = vrot.lane.b32.xlu0 %v6062_v34, %s6501_s4  ;;  %v6064_v14 = vpop.eup %6063 }
0x1027   :  { %1602 = vrot.lane.b32.xlu1 %v6064_v14, %s6501_s4  ;;  %v6066_v20 = vpop.eup %6065 }
0x1028   :  { %v1557_v31 = vadd.f32 1.0, %v6066_v20  ;;  %v6068_v2 = vpop.eup %6067 }
0x1029   :  { %v1559_v9 = vadd.f32 1.0, %v6068_v2 }
0x102a   :  { %6069 = vrcp.f32 %v1557_v31 }
0x102b   :  { %6071 = vrcp.f32 %v1559_v9  ;;  %v6503_v9 = vmov 1  }
0x102c   :  { %5884 = vset.pattern.permute.xlu1 %v6503_v9 }
0x1034   :  { %v6070_v30 = vpop.eup %6069 }
0x1035   :  { %v6072_v21 = vpop.eup %6071 }
0x1098   :  { %v1601_v36 = vpop.permute.xlu0 %1600 }
0x1099   :  { %v1606_v59 = vmul.f32 %v6070_v30, %v1601_v36  ;;  %v1603_v19 = vpop.permute.xlu1 %1602  ;;  %v1753_v30 = vrot.slane %v7186_v44, 7 }
0x109a   :  { %v1607_v41 = vmul.f32 %v6072_v21, %v1603_v19  ;;  %v1754_v21 = vrot.slane %v7190_v33, 7  ;;  %v7247_v33 = vld [vmem:[%s8203_s12] sm:$0x3] }
0x109b   :  { %v1614_v56 = vrot.slane %v1606_v59, %v7201_v3  ;;  %v1637_v47 = vrot.slane %v1606_v59, 6 }
0x109c   :  { %v1618_v43 = vrot.slane %v1607_v41, %v7201_v3  ;;  %v1638_v45 = vrot.slane %v1607_v41, 5 }
0x109d   :  { %v7208_v24 = vsel %vm1608_vm8, %v1614_v56, %v7166_v42 }
0x109e   :  { %v7214_v5 = vsel %vm1608_vm8, %v1618_v43, %v7172_v8  ;;  %v1639_v29 = vsel %vm536_vm1, %v1638_v45, %v1637_v47 }
0x109f   :  { %5040 = vmatmul.mubr.msk.f32.vlgmr.msra.gmra.mrb[14].mxu1 %vm136_vm0, %v1639_v29  ;;  %v350_v29 = vld [vmem:[#allocation7 + $0x8] sm:$0xff] }
0x10a0   :  { %2084 = vmatprep.mubr.f32.mxu1 %v6500_v0 }
0x1172   :  { %v1708_v46 = vpop.f32.mrb[14].mxu1 }
0x1173   :  { %v1710_v62 = vpop.f32.mrb[15].mxu1  ;;  %v1715_v39 = vrot.slane %v1708_v46, 1  ;;  %v1717_v48 = vrot.slane %v1708_v46, 2  ;;  %v352_v46 = vld [vmem:[#allocation7 + $0x18] sm:$0xff] }
0x1174   :  { %v1716_v42 = vrot.slane %v1710_v62, 1  ;;  %v1718_v55 = vrot.slane %v1710_v62, 2  ;;  %v7237_v62 = vpack.c.bf16 %v352_v46, %v350_v29  ;;  %v7321_v29 = vsub.s32 7, %v6796_v52 }
0x1175   :  { %v1723_v13 = vadd.f32 %v1715_v39, %v6825_v11  ;;  %v356_v39 = vld [vmem:[#allocation7 + $0x38] sm:$0xff] }
0x1176   :  { %v7220_v57 = vadd.f32 %v1716_v42, %v6805_v63  ;;  %v7224_v26 = vadd.f32 %v1718_v55, %v6807_v1  ;;  %v1725_v63 = vadd.f32 %v1717_v48, %v6823_v10  ;;  %v6502_v10 = vmov 3   ;;  %v349_v42 = vld [vmem:[#allocation7] sm:$0xff]  ;;  %v351_v55 = vld [vmem:[#allocation7 + $0x10] sm:$0xff]  ;;  %5583 = vmatprep.subr.bf16.mxu0 %v7237_v62  ;;  %5599 = vmatprep.subr.bf16.mxu1 %v7237_v62 }
0x1177   :  { %v5041_v58 = vmul.f32 -1.442695, %v1723_v13  ;;  %5886 = vset.pattern.permute.xlu0 %v6502_v10 }
0x1178   :  { %6073 = vtanh.f32 %v7220_v57  ;;  %v5043_v18 = vmul.f32 -1.442695, %v1725_v63  ;;  %v355_v63 = vld [vmem:[#allocation7 + $0x30] sm:$0xff] }
0x1179   :  { %6075 = vtanh.f32 %v7224_v26 }
0x117a   :  { %6077 = vpow2.f32 %v5041_v58  ;;  %v353_v58 = vld [vmem:[#allocation7 + $0x20] sm:$0xff] }
0x117b   :  { %6079 = vpow2.f32 %v5043_v18  ;;  %v1821_v18 = vrot.slane %v7247_v33, %v6820_v6 }
0x1182   :  { %v6074_v8 = vpop.eup %6073 }
0x1183   :  { %1761 = vrot.lane.b32.xlu0 %v6074_v8, %s6501_s4  ;;  %v6076_v35 = vpop.eup %6075  ;;  %v7242_v8 = vpack.c.bf16 %v351_v55, %v349_v42 }
0x1184   :  { %1763 = vrot.lane.b32.xlu1 %v6076_v35, %s6501_s4  ;;  %v6078_v1 = vpop.eup %6077  ;;  %v354_v35 = vld [vmem:[#allocation7 + $0x28] sm:$0xff] }
0x1185   :  { %v1739_v61 = vadd.f32 1.0, %v6078_v1  ;;  %v6080_v34 = vpop.eup %6079  ;;  %5585 = vmatpush1.bf16.msra.mxu0 %v7242_v8  ;;  %5601 = vmatpush1.bf16.msra.mxu1 %v7242_v8  ;;  %v7253_v48 = vpack.c.bf16 %v356_v39, %v354_v35  ;;  %v7258_v1 = vpack.c.bf16 %v355_v63, %v353_v58 }
0x1186   :  { %v1741_v14 = vadd.f32 1.0, %v6080_v34  ;;  %v360_v34 = vld [vmem:[#allocation7 + $0x58] sm:$0xff] }
0x1187   :  { %6081 = vrcp.f32 %v1739_v61  ;;  %5587 = vmatprep.subr.bf16.mxu0 %v7253_v48  ;;  %5603 = vmatprep.subr.bf16.mxu1 %v7253_v48  ;;  %v358_v61 = vld [vmem:[#allocation7 + $0x48] sm:$0xff] }
0x1188   :  { %6083 = vrcp.f32 %v1741_v14  ;;  %v7264_v14 = vpack.c.bf16 %v360_v34, %v358_v61 }
0x1189   :  { %5589 = vmatpush1.bf16.msra.mxu0 %v7258_v1  ;;  %5605 = vmatpush1.bf16.msra.mxu1 %v7258_v1 }
0x118a   :  { %5591 = vmatprep.subr.bf16.mxu0 %v7264_v14  ;;  %5607 = vmatprep.subr.bf16.mxu1 %v7264_v14 }
0x1191   :  { %v6082_v40 = vpop.eup %6081 }
0x1192   :  { %v6084_v31 = vpop.eup %6083  ;;  %v1757_v36 = vmul.f32 %v6082_v40, %v1753_v30  ;;  %v364_v30 = vld [vmem:[#allocation7 + $0x78] sm:$0xff] }
0x1193   :  { %v1758_v19 = vmul.f32 %v6084_v31, %v1754_v21 }
0x11f5   :  { %v1762_v16 = vpop.permute.xlu0 %1761 }
0x11f6   :  { %v1767_v20 = vmul.f32 %v6082_v40, %v1762_v16  ;;  %v1764_v11 = vpop.permute.xlu1 %1763  ;;  %v357_v40 = vld [vmem:[#allocation7 + $0x40] sm:$0xff]  ;;  %v359_v16 = vld [vmem:[#allocation7 + $0x50] sm:$0xff] }
0x11f7   :  { %v1768_v2 = vmul.f32 %v6084_v31, %v1764_v11  ;;  %v7266_v31 = vpack.c.bf16 %v359_v16, %v357_v40  ;;  %v1828_v11 = vrot.slane %v7247_v33, %v6799_v53 }
0x11f8   :  { %1771 = vrot.lane.b32.xlu0 %v1767_v20, %s6501_s4 }
0x11f9   :  { %1773 = vrot.lane.b32.xlu1 %v1768_v2, %s6501_s4  ;;  %5593 = vmatpush1.bf16.msra.mxu0 %v7266_v31  ;;  %v362_v2 = vld [vmem:[#allocation7 + $0x68] sm:$0xff] }
0x11fa   :  { %5609 = vmatpush1.bf16.msra.mxu1 %v7266_v31 }
0x126a   :  { %v1772_v59 = vpop.permute.xlu0 %1771 }
0x126b   :  { %v1777_v56 = vadd.f32 %v1772_v59, %v1757_v36  ;;  %v1774_v41 = vpop.permute.xlu1 %1773  ;;  %v7274_v36 = vpack.c.bf16 %v364_v30, %v362_v2  ;;  %v361_v59 = vld [vmem:[#allocation7 + $0x60] sm:$0xff] }
0x126c   :  { %v1778_v47 = vadd.f32 %v1774_v41, %v1758_v19  ;;  %v6504_v19 = vmov 0   ;;  %v6505_v41 = vmov 2  }
0x126d   :  { %6085 = vtanh.f32 %v1777_v56  ;;  %v1810_v43 = vrot.slane %v1777_v56, 7  ;;  %v363_v56 = vld [vmem:[#allocation7 + $0x70] sm:$0xff]  ;;  %5595 = vmatprep.subr.bf16.mxu0 %v7274_v36  ;;  %5611 = vmatprep.subr.bf16.mxu1 %v7274_v36 }
0x126e   :  { %6087 = vtanh.f32 %v1778_v47  ;;  %v1811_v45 = vrot.slane %v1778_v47, 6  ;;  %v7278_v21 = vpack.c.bf16 %v363_v56, %v361_v59  ;;  %v6506_v47 = vmov 4  }
0x1270   :  { %v7240_v44 = vsel %vm536_vm1, %v1811_v45, %v1810_v43  ;;  %5597 = vmatpush1.bf16.msra.mxu0 %v7278_v21  ;;  %5613 = vmatpush1.bf16.msra.mxu1 %v7278_v21  ;;  %v537_v43 = vsel %vm536_vm1, %v535_v15, %v6895_v12  ;;  %v5042_v12 = vmul.f32 -1.442695, %v7220_v57  ;;  %v5044_v15 = vmul.f32 -1.442695, %v7224_v26 }
0x1271   :  { %5615 = vmatprep.subr.bf16.mxu0 %v7237_v62  ;;  %5631 = vmatprep.subr.bf16.mxu1 %v7237_v62 }
0x1272   :  { %6089 = vpow2.f32 %v5042_v12 }
0x1273   :  { %6091 = vpow2.f32 %v5044_v15 }
0x1277   :  { %v6086_v13 = vpop.eup %6085 }
0x1278   :  { %1783 = vrot.lane.b32.xlu0 %v6086_v13, %s6501_s4  ;;  %v6088_v20 = vpop.eup %6087 }
0x1279   :  { %1785 = vrot.lane.b32.xlu1 %v6088_v20, %s6501_s4 }
0x127c   :  { %1823 = vbcast.lane.b32.xlu0 %v1821_v18, 256 }
0x127d   :  { %1830 = vbcast.lane.b32.xlu1 %v1828_v11, 256 }
0x1280   :  { %1073 = vperm.xlu0 %5886, %v7247_v33  }
0x1281   :  { %709 = vperm.xlu1 %5884, %v7247_v33  }
0x1284   :  { %5887 = vset.pattern.permute.xlu0 %v6504_v19 }
0x1285   :  { %530 = vperm.xlu0 %5887, %v7247_v33   ;;  %5885 = vset.pattern.permute.xlu1 %v6505_v41 }
0x1286   :  { %890 = vperm.xlu1 %5885, %v7247_v33  }
0x1289   :  { %716 = vrot.lane.b32.xlu0 %v6952_v25, %s6501_s4  ;;  %v6507_v25 = vmov 5  }
0x128a   :  { %5888 = vset.pattern.permute.xlu1 %v6506_v47 }
0x128b   :  { %1256 = vperm.xlu1 %5888, %v7247_v33  }
0x128d   :  { %898 = vrot.lane.b32.xlu0 %v7006_v23, %s6501_s4  ;;  %v6508_v23 = vmov 6  }
0x128f   :  { %538 = vrot.lane.b32.xlu1 %v537_v43, %s6501_s4 }
0x1290   :  { %5889 = vset.pattern.permute.xlu1 %v6507_v25 }
0x1291   :  { %1081 = vrot.lane.b32.xlu0 %v7056_v49, %s6501_s4  ;;  %v6090_v49 = vpop.eup %6089 }
0x1293   :  { %1439 = vperm.xlu1 %5889, %v7247_v33  }
0x1295   :  { %1264 = vrot.lane.b32.xlu0 %v7105_v7, %s6501_s4  ;;  %v1740_v7 = vadd.f32 1.0, %v6090_v49 }
0x1297   :  { %5890 = vset.pattern.permute.xlu1 %v6508_v23  ;;  %6093 = vrcp.f32 %v1740_v7 }
0x1298   :  { %1622 = vperm.xlu1 %5890, %v7247_v33  }
0x1299   :  { %1630 = vrot.lane.b32.xlu0 %v7196_v54, %s6501_s4  ;;  %v6092_v54 = vpop.eup %6091 }
0x129a   :  { %v1742_v45 = vadd.f32 1.0, %v6092_v54 }
0x129c   :  { %5891 = vset.pattern.permute.xlu1 %v6509_v4  ;;  %6095 = vrcp.f32 %v1742_v45 }
0x129d   :  { %1805 = vperm.xlu1 %5891, %v7247_v33  }
0x12a1   :  { %1447 = vrot.lane.b32.xlu1 %v7154_v60, %s6501_s4  ;;  %v6094_v60 = vpop.eup %6093 }
0x12a2   :  { %5897 = vset.pattern.permute.xlu1 %v6503_v9 }
0x12a5   :  { %1813 = vrot.lane.b32.xlu1 %v7240_v44, %s6501_s4 }
0x12a6   :  { %v6096_v55 = vpop.eup %6095 }
0x12ea   :  { %v1784_v9 = vpop.permute.xlu0 %1783 }
0x12eb   :  { %v1789_v46 = vmul.f32 %v6094_v60, %v1784_v9  ;;  %v1786_v26 = vpop.permute.xlu1 %1785 }
0x12ec   :  { %v1790_v33 = vmul.f32 %v6096_v55, %v1786_v26 }
0x12ed   :  { %v1797_v57 = vrot.slane %v1789_v46, %v7321_v29 }
0x12ee   :  { %v1824_v42 = vpop.permute.xlu0 %1823  ;;  %v1801_v39 = vrot.slane %v1790_v33, %v7321_v29 }
0x12ef   :  { %v7328_v44 = vsel %vm1791_vm9, %v1797_v57, %v7208_v24  ;;  %v1831_v58 = vpop.permute.xlu1 %1830 }
0x12f0   :  { %v1832_v35 = vmul.f32 %v1824_v42, %v7328_v44  ;;  %v7336_v18 = vsel %vm1791_vm9, %v1801_v39, %v7214_v5 }
0x12f1   :  { %v1833_v61 = vmul.f32 %v1831_v58, %v7336_v18 }
0x12f2   :  { %v1834_v13 = vsel %vm136_vm0, %v1832_v35, 0.0  ;;  %v6371_v35 = vld [vmem:[%s8198_s7] sm:$0x3] }
0x12f3   :  { %v1835_v63 = vrot.slane %v1834_v13, 4  ;;  %v1841_v24 = vsel %vm136_vm0, %v1833_v61, 0.0  ;;  %v247_v39 = vrot.slane %v6371_v35, %v6799_v53 }
0x12f4   :  { %v1842_v16 = vrot.slane %v1841_v24, 4 }
0x12f5   :  { %v1836_v34 = vadd.f32 %v1835_v63, %v1834_v13 }
0x12f6   :  { %v1843_v11 = vadd.f32 %v1842_v16, %v1841_v24 }
0x12f7   :  { %v1837_v40 = vrot.slane %v1836_v34, 2 }
0x12f8   :  { %v1844_v2 = vrot.slane %v1843_v11, 2 }
0x12f9   :  { %v1838_v20 = vadd.f32 %v1837_v40, %v1836_v34  ;;  %v7356_v34 = vadd.f32 %v6908_v28, %v247_v39 }
0x12fa   :  { %v1845_v59 = vadd.f32 %v1844_v2, %v1843_v11 }
0x12fb   :  { %v1839_v30 = vrot.slane %v1838_v20, 1 }
0x12fc   :  { %v1846_v56 = vrot.slane %v1845_v59, 1 }
0x12fd   :  { %v1840_v19 = vadd.f32 %v1839_v30, %v1838_v20  ;;  %v7360_v30 = vadd.f32 %v6929_v38, %v247_v39 }
0x12fe   :  { %v1847_v43 = vadd.f32 %v1846_v56, %v1845_v59 }
0x12ff   :  { %v1074_v49 = vpop.permute.xlu0 %1073 }
0x1300   :  { %v1850_v12 = vsel %vm536_vm1, %v1847_v43, %v1840_v19  ;;  %v710_v5 = vpop.permute.xlu1 %709 }
0x1301   :  { %5045 = vmatmul.mubr.msk.f32.vlgmr.msra.gmra.mrb[8].mxu0 %vm136_vm0, %v1850_v12 }
0x1302   :  { %5617 = vmatpush1.bf16.msra.mxu0 %v7242_v8  ;;  %2249 = vmatprep.mubr.f32.mxu0 %v6500_v0 }
0x1303   :  { %5619 = vmatprep.subr.bf16.mxu0 %v7253_v48 }
0x1304   :  { %v531_v54 = vpop.permute.xlu0 %530 }
0x1305   :  { %v891_v15 = vpop.permute.xlu1 %890 }
0x1306   :  { %5621 = vmatpush1.bf16.msra.mxu0 %v7258_v1 }
0x1307   :  { %5623 = vmatprep.subr.bf16.mxu0 %v7264_v14 }
0x1308   :  { %v717_v60 = vpop.permute.xlu0 %716 }
0x1309   :  { %v719_v55 = vmul.f32 %v717_v60, %v710_v5 }
0x130a   :  { %5625 = vmatpush1.bf16.msra.mxu0 %v7266_v31  ;;  %v1257_v7 = vpop.permute.xlu1 %1256 }
0x130b   :  { %5627 = vmatprep.subr.bf16.mxu0 %v7274_v36 }
0x130c   :  { %v899_v46 = vpop.permute.xlu0 %898 }
0x130d   :  { %v901_v58 = vmul.f32 %v899_v46, %v891_v15 }
0x130e   :  { %5629 = vmatpush1.bf16.msra.mxu0 %v7278_v21  ;;  %v539_v45 = vpop.permute.xlu1 %538 }
0x130f   :  { %5647 = vmatprep.subr.bf16.mxu0 %v7237_v62  ;;  %v541_v42 = vmul.f32 %v539_v45, %v531_v54 }
0x1310   :  { %v1082_v26 = vpop.permute.xlu0 %1081 }
0x1311   :  { %v720_v33 = vadd.f32 %v719_v55, %v541_v42  ;;  %v1084_v61 = vmul.f32 %v1082_v26, %v1074_v49 }
0x1312   :  { %v1440_v9 = vpop.permute.xlu1 %1439 }
0x1313   :  { %v902_v63 = vadd.f32 %v901_v58, %v720_v33 }
0x1314   :  { %v1265_v24 = vpop.permute.xlu0 %1264 }
0x1315   :  { %v1085_v59 = vadd.f32 %v1084_v61, %v902_v63  ;;  %v1267_v56 = vmul.f32 %v1265_v24, %v1257_v7 }
0x1317   :  { %v1623_v57 = vpop.permute.xlu1 %1622  ;;  %v1268_v12 = vadd.f32 %v1267_v56, %v1085_v59 }
0x1318   :  { %v1631_v5 = vpop.permute.xlu0 %1630 }
0x1319   :  { %v1633_v49 = vmul.f32 %v1631_v5, %v1623_v57 }
0x131c   :  { %v1806_v13 = vpop.permute.xlu1 %1805 }
0x1320   :  { %v1448_v20 = vpop.permute.xlu1 %1447 }
0x1321   :  { %v1450_v19 = vmul.f32 %v1448_v20, %v1440_v9 }
0x1323   :  { %v1451_v28 = vadd.f32 %v1450_v19, %v1268_v12 }
0x1324   :  { %v1814_v15 = vpop.permute.xlu1 %1813 }
0x1325   :  { %v1634_v54 = vadd.f32 %v1633_v49, %v1451_v28  ;;  %v1816_v45 = vmul.f32 %v1814_v15, %v1806_v13 }
0x1327   :  { %v1817_v46 = vadd.f32 %v1816_v45, %v1634_v54 }
0x1329   :  { %v1963_v7 = vrot.slane %v1817_v46, 1 }
0x13d4   :  { %v1919_v40 = vpop.f32.mrb[8].mxu0 }
0x13d5   :  { %v1921_v16 = vpop.f32.mrb[9].mxu0  ;;  %v1932_v9 = vadd.f32 %v1919_v40, %v6906_v27  ;;  %v1926_v42 = vrot.slane %v1919_v40, 1 }
0x13d6   :  { %v1927_v11 = vrot.slane %v1921_v16, 1  ;;  %v1933_v2 = vadd.f32 %v1921_v16, %v7356_v34 }
0x13d7   :  { %v5046_v55 = vmul.f32 -1.442695, %v1932_v9  ;;  %v1934_v57 = vadd.f32 %v1926_v42, %v6927_v37 }
0x13d8   :  { %6097 = vtanh.f32 %v1933_v2  ;;  %v1935_v43 = vadd.f32 %v1927_v11, %v7360_v30  ;;  %v5047_v45 = vmul.f32 -1.442695, %v1933_v2 }
0x13d9   :  { %v5048_v26 = vmul.f32 -1.442695, %v1934_v57 }
0x13da   :  { %6099 = vtanh.f32 %v1935_v43  ;;  %v5049_v54 = vmul.f32 -1.442695, %v1935_v43 }
0x13db   :  { %6101 = vpow2.f32 %v5046_v55 }
0x13dc   :  { %6103 = vpow2.f32 %v5048_v26 }
0x13e2   :  { %v6098_v60 = vpop.eup %6097 }
0x13e3   :  { %1974 = vrot.lane.b32.xlu1 %v6098_v60, %s6501_s4 }
0x13e4   :  { %v6100_v38 = vpop.eup %6099 }
0x13e5   :  { %1976 = vrot.lane.b32.xlu0 %v6100_v38, %s6501_s4  ;;  %v6102_v33 = vpop.eup %6101 }
0x13e6   :  { %v1948_v35 = vadd.f32 1.0, %v6102_v33  ;;  %v6104_v39 = vpop.eup %6103 }
0x13e7   :  { %1964 = vrot.lane.b32.xlu1 %v1817_v46, %s6501_s4  ;;  %v1950_v13 = vadd.f32 1.0, %v6104_v39 }
0x13e8   :  { %6105 = vrcp.f32 %v1948_v35 }
0x13e9   :  { %1966 = vrot.lane.b32.xlu0 %v1963_v7, %s6501_s4  ;;  %6107 = vrcp.f32 %v1950_v13 }
0x13f2   :  { %v6106_v58 = vpop.eup %6105 }
0x13f3   :  { %v6108_v24 = vpop.eup %6107 }
0x1455   :  { %v1975_v63 = vpop.permute.xlu1 %1974 }
0x1456   :  { %v1980_v61 = vmul.f32 %v6106_v58, %v1975_v63 }
0x1457   :  { %v1977_v16 = vpop.permute.xlu0 %1976 }
0x1458   :  { %1984 = vrot.lane.b32.xlu1 %v1980_v61, %s6501_s4  ;;  %v1981_v40 = vmul.f32 %v6108_v24, %v1977_v16 }
0x1459   :  { %v1965_v20 = vpop.permute.xlu1 %1964 }
0x145a   :  { %1986 = vrot.lane.b32.xlu0 %v1981_v40, %s6501_s4  ;;  %v1970_v11 = vmul.f32 %v6106_v58, %v1965_v20 }
0x145b   :  { %v1967_v56 = vpop.permute.xlu0 %1966 }
0x145c   :  { %v1971_v12 = vmul.f32 %v6108_v24, %v1967_v56 }
0x14ca   :  { %v1985_v59 = vpop.permute.xlu1 %1984 }
0x14cb   :  { %v7371_v19 = vadd.f32 %v1985_v59, %v1970_v11 }
0x14cc   :  { %v1987_v5 = vpop.permute.xlu0 %1986 }
0x14cd   :  { %6109 = vtanh.f32 %v7371_v19  ;;  %v7374_v28 = vadd.f32 %v1987_v5, %v1971_v12 }
0x14cf   :  { %6111 = vtanh.f32 %v7374_v28 }
0x14d0   :  { %6113 = vpow2.f32 %v5049_v54 }
0x14d1   :  { %6115 = vpow2.f32 %v5047_v45 }
0x14d7   :  { %v6110_v15 = vpop.eup %6109 }
0x14d8   :  { %1996 = vrot.lane.b32.xlu1 %v6110_v15, %s6501_s4 }
0x14d9   :  { %v6112_v49 = vpop.eup %6111 }
0x14da   :  { %1998 = vrot.lane.b32.xlu0 %v6112_v49, %s6501_s4  ;;  %v6114_v60 = vpop.eup %6113 }
0x14db   :  { %v6116_v46 = vpop.eup %6115  ;;  %v1951_v38 = vadd.f32 1.0, %v6114_v60 }
0x14dc   :  { %v1949_v7 = vadd.f32 1.0, %v6116_v46 }
0x14dd   :  { %6117 = vrcp.f32 %v1951_v38 }
0x14de   :  { %6119 = vrcp.f32 %v1949_v7  ;;  %v2132_v7 = vrot.slane %v7374_v28, 7 }
0x14e7   :  { %v6118_v9 = vpop.eup %6117 }
0x14e8   :  { %v6120_v26 = vpop.eup %6119 }
0x154a   :  { %v1997_v42 = vpop.permute.xlu1 %1996 }
0x154b   :  { %v7381_v33 = vmul.f32 %v6120_v26, %v1997_v42  ;;  %v2131_v26 = vrot.slane %v7371_v19, 7 }
0x154c   :  { %v1999_v55 = vpop.permute.xlu0 %1998 }
0x154d   :  { %v7379_v57 = vmul.f32 %v6118_v9, %v1999_v55 }
0x154f   :  { %v2016_v35 = vrot.slane %v7379_v57, 7 }
0x1551   :  { %v2017_v2 = vsel %vm536_vm1, %v2016_v35, %v7381_v33 }
0x1552   :  { %5050 = vmatmul.mubr.msk.f32.vlgmr.msra.gmra.mrb[16].mxu1 %vm136_vm0, %v2017_v2 }
0x1553   :  { %5633 = vmatpush1.bf16.msra.mxu1 %v7242_v8  ;;  %2417 = vmatprep.mubr.f32.mxu1 %v6500_v0 }
0x1554   :  { %5635 = vmatprep.subr.bf16.mxu1 %v7253_v48 }
0x1557   :  { %5637 = vmatpush1.bf16.msra.mxu1 %v7258_v1 }
0x1558   :  { %5639 = vmatprep.subr.bf16.mxu1 %v7264_v14 }
0x155b   :  { %5641 = vmatpush1.bf16.msra.mxu1 %v7266_v31 }
0x155c   :  { %5643 = vmatprep.subr.bf16.mxu1 %v7274_v36 }
0x155f   :  { %5645 = vmatpush1.bf16.msra.mxu1 %v7278_v21 }
0x1560   :  { %5663 = vmatprep.subr.bf16.mxu1 %v7237_v62 }
0x1625   :  { %v2086_v43 = vpop.f32.mrb[16].mxu1 }
0x1626   :  { %v2088_v39 = vpop.f32.mrb[17].mxu1  ;;  %v2101_v16 = vadd.f32 %v2086_v43, %v6927_v37  ;;  %v2093_v40 = vrot.slane %v2086_v43, 7 }
0x1627   :  { %v2094_v13 = vrot.slane %v2088_v39, 7  ;;  %v2102_v58 = vadd.f32 %v2088_v39, %v7360_v30 }
0x1628   :  { %v5053_v20 = vmul.f32 -1.442695, %v2101_v16  ;;  %v2099_v11 = vadd.f32 %v2093_v40, %v6906_v27 }
0x1629   :  { %6121 = vtanh.f32 %v2102_v58  ;;  %v2100_v63 = vadd.f32 %v2094_v13, %v7356_v34  ;;  %v5054_v28 = vmul.f32 -1.442695, %v2102_v58 }
0x162a   :  { %v5051_v59 = vmul.f32 -1.442695, %v2099_v11  ;;  %v2011_v11 = vrot.slane %v7379_v57, %v6820_v6 }
0x162b   :  { %6123 = vtanh.f32 %v2100_v63 }
0x162c   :  { %6125 = vpow2.f32 %v5053_v20  ;;  %v2013_v58 = vsel %vm515_vm2, %v2011_v11, 0.0 }
0x162d   :  { %6127 = vpow2.f32 %v5051_v59 }
0x1633   :  { %v6122_v61 = vpop.eup %6121 }
0x1634   :  { %2141 = vrot.lane.b32.xlu1 %v6122_v61, %s6501_s4  ;;  %v5052_v61 = vmul.f32 -1.442695, %v2100_v63  ;;  %v2007_v63 = vrot.slane %v7381_v33, %v6820_v6 }
0x1635   :  { %v6124_v24 = vpop.eup %6123 }
0x1636   :  { %2139 = vrot.lane.b32.xlu0 %v6124_v24, %s6501_s4  ;;  %v6126_v56 = vpop.eup %6125 }
0x1637   :  { %v2117_v12 = vadd.f32 1.0, %v6126_v56  ;;  %v6128_v5 = vpop.eup %6127 }
0x1638   :  { %v2115_v15 = vadd.f32 1.0, %v6128_v5 }
0x1639   :  { %6129 = vrcp.f32 %v2117_v12 }
0x163a   :  { %6131 = vrcp.f32 %v2115_v15 }
0x1643   :  { %v6130_v49 = vpop.eup %6129 }
0x1644   :  { %v6132_v60 = vpop.eup %6131  ;;  %v2136_v9 = vmul.f32 %v6130_v49, %v2132_v7 }
0x1645   :  { %v2135_v35 = vmul.f32 %v6132_v60, %v2131_v26 }
0x16a6   :  { %v2142_v54 = vpop.permute.xlu1 %2141 }
0x16a7   :  { %v2146_v45 = vmul.f32 %v6130_v49, %v2142_v54 }
0x16a8   :  { %v2140_v46 = vpop.permute.xlu0 %2139 }
0x16a9   :  { %2151 = vrot.lane.b32.xlu1 %v2146_v45, %s6501_s4  ;;  %v2145_v38 = vmul.f32 %v6132_v60, %v2140_v46  ;;  %v2012_v60 = vsel %vm515_vm2, %v2007_v63, 0.0 }
0x16ab   :  { %2149 = vrot.lane.b32.xlu0 %v2145_v38, %s6501_s4 }
0x171b   :  { %v2152_v42 = vpop.permute.xlu1 %2151 }
0x171c   :  { %v7405_v55 = vadd.f32 %v2152_v42, %v2136_v9 }
0x171d   :  { %v2150_v2 = vpop.permute.xlu0 %2149 }
0x171e   :  { %6133 = vtanh.f32 %v7405_v55  ;;  %v7409_v43 = vadd.f32 %v2150_v2, %v2135_v35 }
0x1720   :  { %6135 = vtanh.f32 %v7409_v43 }
0x1721   :  { %6137 = vpow2.f32 %v5054_v28 }
0x1722   :  { %6139 = vpow2.f32 %v5052_v61 }
0x1728   :  { %v6134_v39 = vpop.eup %6133 }
0x1729   :  { %2163 = vrot.lane.b32.xlu1 %v6134_v39, %s6501_s4 }
0x172a   :  { %v6136_v13 = vpop.eup %6135 }
0x172b   :  { %2161 = vrot.lane.b32.xlu0 %v6136_v13, %s6501_s4  ;;  %v6138_v24 = vpop.eup %6137 }
0x172c   :  { %v2118_v19 = vadd.f32 1.0, %v6138_v24  ;;  %v6140_v16 = vpop.eup %6139 }
0x172d   :  { %v2116_v40 = vadd.f32 1.0, %v6140_v16 }
0x172e   :  { %6141 = vrcp.f32 %v2118_v19 }
0x172f   :  { %6143 = vrcp.f32 %v2116_v40 }
0x1738   :  { %v6142_v20 = vpop.eup %6141 }
0x1739   :  { %v6144_v5 = vpop.eup %6143 }
0x179b   :  { %v2164_v59 = vpop.permute.xlu1 %2163 }
0x179c   :  { %v2168_v56 = vmul.f32 %v6142_v20, %v2164_v59 }
0x179d   :  { %v2162_v49 = vpop.permute.xlu0 %2161 }
0x179e   :  { %v2176_v12 = vrot.slane %v2168_v56, %v6799_v53  ;;  %v2167_v54 = vmul.f32 %v6144_v5, %v2162_v49 }
0x17a0   :  { %v7423_v15 = vsel %vm695_vm3, %v2176_v12, %v2013_v58  ;;  %v2172_v45 = vrot.slane %v2167_v54, %v6799_v53  ;;  %v2181_v57 = vrot.slane %v2167_v54, 1  ;;  %v2298_v54 = vrot.slane %v7409_v43, 7 }
0x17a2   :  { %v7430_v46 = vsel %vm695_vm3, %v2172_v45, %v2012_v60  ;;  %v2182_v38 = vsel %vm536_vm1, %v2168_v56, %v2181_v57 }
0x17a3   :  { %5055 = vmatmul.mubr.msk.f32.vlgmr.msra.gmra.mrb[10].mxu0 %vm136_vm0, %v2182_v38  ;;  %v2299_v38 = vrot.slane %v7405_v55, 7 }
0x17a4   :  { %5649 = vmatpush1.bf16.msra.mxu0 %v7242_v8  ;;  %2585 = vmatprep.mubr.f32.mxu0 %v6500_v0 }
0x17a5   :  { %5651 = vmatprep.subr.bf16.mxu0 %v7253_v48 }
0x17a8   :  { %5653 = vmatpush1.bf16.msra.mxu0 %v7258_v1 }
0x17a9   :  { %5655 = vmatprep.subr.bf16.mxu0 %v7264_v14 }
0x17ac   :  { %5657 = vmatpush1.bf16.msra.mxu0 %v7266_v31 }
0x17ad   :  { %5659 = vmatprep.subr.bf16.mxu0 %v7274_v36 }
0x17b0   :  { %5661 = vmatpush1.bf16.msra.mxu0 %v7278_v21 }
0x17b1   :  { %5679 = vmatprep.subr.bf16.mxu0 %v7237_v62 }
0x1876   :  { %v2251_v33 = vpop.f32.mrb[10].mxu0 }
0x1877   :  { %v2253_v7 = vpop.f32.mrb[11].mxu0  ;;  %v2258_v13 = vrot.slane %v2251_v33, 6  ;;  %v2260_v61 = vrot.slane %v2251_v33, 7 }
0x1878   :  { %v2259_v9 = vrot.slane %v2253_v7, 6  ;;  %v2261_v42 = vrot.slane %v2253_v7, 7 }
0x1879   :  { %v2266_v28 = vadd.f32 %v2258_v13, %v6906_v27  ;;  %v2268_v19 = vadd.f32 %v2260_v61, %v6927_v37 }
0x187a   :  { %v2267_v26 = vadd.f32 %v2259_v9, %v7356_v34  ;;  %v2269_v35 = vadd.f32 %v2261_v42, %v7360_v30 }
0x187b   :  { %v5056_v24 = vmul.f32 -1.442695, %v2266_v28  ;;  %v5058_v16 = vmul.f32 -1.442695, %v2268_v19 }
0x187c   :  { %6145 = vtanh.f32 %v2267_v26  ;;  %v5057_v43 = vmul.f32 -1.442695, %v2267_v26 }
0x187d   :  { %6147 = vtanh.f32 %v2269_v35 }
0x187e   :  { %6149 = vpow2.f32 %v5056_v24 }
0x187f   :  { %6151 = vpow2.f32 %v5058_v16 }
0x1886   :  { %v6146_v2 = vpop.eup %6145 }
0x1887   :  { %2306 = vrot.lane.b32.xlu0 %v6146_v2, %s6501_s4  ;;  %v6148_v39 = vpop.eup %6147 }
0x1888   :  { %2308 = vrot.lane.b32.xlu1 %v6148_v39, %s6501_s4  ;;  %v6150_v40 = vpop.eup %6149  ;;  %v5059_v39 = vmul.f32 -1.442695, %v2269_v35 }
0x1889   :  { %v2282_v20 = vadd.f32 1.0, %v6150_v40  ;;  %v6152_v11 = vpop.eup %6151 }
0x188a   :  { %v2284_v59 = vadd.f32 1.0, %v6152_v11 }
0x188b   :  { %6153 = vrcp.f32 %v2282_v20 }
0x188c   :  { %6155 = vrcp.f32 %v2284_v59 }
0x1895   :  { %v6154_v56 = vpop.eup %6153 }
0x1896   :  { %v6156_v5 = vpop.eup %6155  ;;  %v2302_v45 = vmul.f32 %v6154_v56, %v2298_v54 }
0x1897   :  { %v2303_v33 = vmul.f32 %v6156_v5, %v2299_v38 }
0x18f9   :  { %v2307_v12 = vpop.permute.xlu0 %2306 }
0x18fa   :  { %v2312_v58 = vmul.f32 %v6154_v56, %v2307_v12  ;;  %v2309_v63 = vpop.permute.xlu1 %2308 }
0x18fb   :  { %v2313_v49 = vmul.f32 %v6156_v5, %v2309_v63 }
0x18fc   :  { %2316 = vrot.lane.b32.xlu0 %v2312_v58, %s6501_s4 }
0x18fd   :  { %2318 = vrot.lane.b32.xlu1 %v2313_v49, %s6501_s4 }
0x196e   :  { %v2317_v57 = vpop.permute.xlu0 %2316 }
0x196f   :  { %v7452_v60 = vadd.f32 %v2317_v57, %v2302_v45  ;;  %v2319_v7 = vpop.permute.xlu1 %2318 }
0x1970   :  { %v7456_v9 = vadd.f32 %v2319_v7, %v2303_v33 }
0x1971   :  { %6157 = vtanh.f32 %v7452_v60 }
0x1972   :  { %6159 = vtanh.f32 %v7456_v9 }
0x1973   :  { %6161 = vpow2.f32 %v5057_v43 }
0x1974   :  { %6163 = vpow2.f32 %v5059_v39 }
0x197b   :  { %v6158_v42 = vpop.eup %6157 }
0x197c   :  { %2328 = vrot.lane.b32.xlu0 %v6158_v42, %s6501_s4  ;;  %v6160_v2 = vpop.eup %6159 }
0x197d   :  { %2330 = vrot.lane.b32.xlu1 %v6160_v2, %s6501_s4  ;;  %v6162_v13 = vpop.eup %6161 }
0x197e   :  { %v2283_v55 = vadd.f32 1.0, %v6162_v13  ;;  %v6164_v28 = vpop.eup %6163 }
0x197f   :  { %v2285_v61 = vadd.f32 1.0, %v6164_v28 }
0x1980   :  { %6165 = vrcp.f32 %v2283_v55 }
0x1981   :  { %6167 = vrcp.f32 %v2285_v61 }
0x198a   :  { %v6166_v24 = vpop.eup %6165 }
0x198b   :  { %v6168_v20 = vpop.eup %6167 }
0x19ee   :  { %v2329_v19 = vpop.permute.xlu0 %2328 }
0x19ef   :  { %v2334_v16 = vmul.f32 %v6166_v24, %v2329_v19  ;;  %v2331_v11 = vpop.permute.xlu1 %2330 }
0x19f0   :  { %v2335_v35 = vmul.f32 %v6168_v20, %v2331_v11  ;;  %v2466_v20 = vrot.slane %v7452_v60, 7 }
0x19f1   :  { %v2339_v40 = vrot.slane %v2334_v16, %v7011_v17  ;;  %v2348_v59 = vrot.slane %v2334_v16, 2 }
0x19f2   :  { %v2343_v56 = vrot.slane %v2335_v35, %v7011_v17  ;;  %v2349_v12 = vrot.slane %v2335_v35, 1 }
0x19f3   :  { %v7465_v26 = vsel %vm876_vm4, %v2339_v40, %v7430_v46 }
0x19f4   :  { %v7471_v58 = vsel %vm876_vm4, %v2343_v56, %v7423_v15  ;;  %v2350_v5 = vsel %vm536_vm1, %v2349_v12, %v2348_v59  ;;  %v2467_v56 = vrot.slane %v7456_v9, 7 }
0x19f5   :  { %5060 = vmatmul.mubr.msk.f32.vlgmr.msra.gmra.mrb[18].mxu1 %vm136_vm0, %v2350_v5 }
0x19f6   :  { %5665 = vmatpush1.bf16.msra.mxu1 %v7242_v8  ;;  %2753 = vmatprep.mubr.f32.mxu1 %v6500_v0 }
0x19f7   :  { %5667 = vmatprep.subr.bf16.mxu1 %v7253_v48 }
0x19fa   :  { %5669 = vmatpush1.bf16.msra.mxu1 %v7258_v1 }
0x19fb   :  { %5671 = vmatprep.subr.bf16.mxu1 %v7264_v14 }
0x19fe   :  { %5673 = vmatpush1.bf16.msra.mxu1 %v7266_v31 }
0x19ff   :  { %5675 = vmatprep.subr.bf16.mxu1 %v7274_v36 }
0x1a02   :  { %5677 = vmatpush1.bf16.msra.mxu1 %v7278_v21 }
0x1a03   :  { %5695 = vmatprep.subr.bf16.mxu1 %v7237_v62 }
0x1ac8   :  { %v2419_v17 = vpop.f32.mrb[18].mxu1 }
0x1ac9   :  { %v2421_v15 = vpop.f32.mrb[19].mxu1  ;;  %v2426_v38 = vrot.slane %v2419_v17, 5  ;;  %v2428_v62 = vrot.slane %v2419_v17, 6 }
0x1aca   :  { %v2427_v46 = vrot.slane %v2421_v15, 5  ;;  %v2429_v63 = vrot.slane %v2421_v15, 6 }
0x1acb   :  { %v2434_v33 = vadd.f32 %v2426_v38, %v6906_v27  ;;  %v2436_v42 = vadd.f32 %v2428_v62, %v6927_v37 }
0x1acc   :  { %v2435_v49 = vadd.f32 %v2427_v46, %v7356_v34  ;;  %v2437_v54 = vadd.f32 %v2429_v63, %v7360_v30 }
0x1acd   :  { %v5061_v7 = vmul.f32 -1.442695, %v2434_v33  ;;  %v5063_v2 = vmul.f32 -1.442695, %v2436_v42 }
0x1ace   :  { %6169 = vtanh.f32 %v2435_v49  ;;  %v5062_v60 = vmul.f32 -1.442695, %v2435_v49  ;;  %v5064_v63 = vmul.f32 -1.442695, %v2437_v54 }
0x1acf   :  { %6171 = vtanh.f32 %v2437_v54 }
0x1ad0   :  { %6173 = vpow2.f32 %v5061_v7 }
0x1ad1   :  { %6175 = vpow2.f32 %v5063_v2 }
0x1ad8   :  { %v6170_v45 = vpop.eup %6169 }
0x1ad9   :  { %2474 = vrot.lane.b32.xlu0 %v6170_v45, %s6501_s4  ;;  %v6172_v57 = vpop.eup %6171 }
0x1ada   :  { %2476 = vrot.lane.b32.xlu1 %v6172_v57, %s6501_s4  ;;  %v6174_v43 = vpop.eup %6173 }
0x1adb   :  { %v2450_v39 = vadd.f32 1.0, %v6174_v43  ;;  %v6176_v13 = vpop.eup %6175 }
0x1adc   :  { %v2452_v55 = vadd.f32 1.0, %v6176_v13 }
0x1add   :  { %6177 = vrcp.f32 %v2450_v39 }
0x1ade   :  { %6179 = vrcp.f32 %v2452_v55 }
0x1ae7   :  { %v6178_v28 = vpop.eup %6177 }
0x1ae8   :  { %v6180_v19 = vpop.eup %6179  ;;  %v2470_v11 = vmul.f32 %v6178_v28, %v2466_v20 }
0x1ae9   :  { %v2471_v12 = vmul.f32 %v6180_v19, %v2467_v56 }
0x1b4b   :  { %v2475_v61 = vpop.permute.xlu0 %2474 }
0x1b4c   :  { %v2480_v24 = vmul.f32 %v6178_v28, %v2475_v61  ;;  %v2477_v16 = vpop.permute.xlu1 %2476 }
0x1b4d   :  { %v2481_v40 = vmul.f32 %v6180_v19, %v2477_v16 }
0x1b4e   :  { %2484 = vrot.lane.b32.xlu0 %v2480_v24, %s6501_s4 }
0x1b4f   :  { %2486 = vrot.lane.b32.xlu1 %v2481_v40, %s6501_s4 }
0x1bc0   :  { %v2485_v35 = vpop.permute.xlu0 %2484 }
0x1bc1   :  { %v7493_v59 = vadd.f32 %v2485_v35, %v2470_v11  ;;  %v2487_v5 = vpop.permute.xlu1 %2486 }
0x1bc2   :  { %v7497_v17 = vadd.f32 %v2487_v5, %v2471_v12 }
0x1bc3   :  { %6181 = vtanh.f32 %v7493_v59 }
0x1bc4   :  { %6183 = vtanh.f32 %v7497_v17 }
0x1bc5   :  { %6185 = vpow2.f32 %v5062_v60 }
0x1bc6   :  { %6187 = vpow2.f32 %v5064_v63 }
0x1bcd   :  { %v6182_v15 = vpop.eup %6181 }
0x1bce   :  { %2496 = vrot.lane.b32.xlu0 %v6182_v15, %s6501_s4  ;;  %v6184_v46 = vpop.eup %6183 }
0x1bcf   :  { %2498 = vrot.lane.b32.xlu1 %v6184_v46, %s6501_s4  ;;  %v6186_v45 = vpop.eup %6185 }
0x1bd0   :  { %v2451_v9 = vadd.f32 1.0, %v6186_v45  ;;  %v6188_v57 = vpop.eup %6187 }
0x1bd1   :  { %v2453_v38 = vadd.f32 1.0, %v6188_v57 }
0x1bd2   :  { %6189 = vrcp.f32 %v2451_v9 }
0x1bd3   :  { %6191 = vrcp.f32 %v2453_v38 }
0x1bdc   :  { %v6190_v33 = vpop.eup %6189 }
0x1bdd   :  { %v6192_v2 = vpop.eup %6191 }
0x1c40   :  { %v2497_v62 = vpop.permute.xlu0 %2496 }
0x1c41   :  { %v2502_v7 = vmul.f32 %v6190_v33, %v2497_v62  ;;  %v2499_v43 = vpop.permute.xlu1 %2498 }
0x1c42   :  { %v2503_v54 = vmul.f32 %v6192_v2, %v2499_v43 }
0x1c43   :  { %v2507_v42 = vrot.slane %v2502_v7, %v7061_v50  ;;  %v2516_v39 = vrot.slane %v2502_v7, 3 }
0x1c44   :  { %v2511_v13 = vrot.slane %v2503_v54, %v7061_v50  ;;  %v2517_v55 = vrot.slane %v2503_v54, 2 }
0x1c45   :  { %v7506_v49 = vsel %vm1059_vm5, %v2507_v42, %v7465_v26  ;;  %v2634_v42 = vrot.slane %v7493_v59, 7 }
0x1c46   :  { %v7512_v28 = vsel %vm1059_vm5, %v2511_v13, %v7471_v58  ;;  %v2518_v61 = vsel %vm536_vm1, %v2517_v55, %v2516_v39  ;;  %v2635_v39 = vrot.slane %v7497_v17, 7 }
0x1c47   :  { %5065 = vmatmul.mubr.msk.f32.vlgmr.msra.gmra.mrb[12].mxu0 %vm136_vm0, %v2518_v61 }
0x1c48   :  { %5681 = vmatpush1.bf16.msra.mxu0 %v7242_v8  ;;  %2921 = vmatprep.mubr.f32.mxu0 %v6500_v0 }
0x1c49   :  { %5683 = vmatprep.subr.bf16.mxu0 %v7253_v48 }
0x1c4c   :  { %5685 = vmatpush1.bf16.msra.mxu0 %v7258_v1 }
0x1c4d   :  { %5687 = vmatprep.subr.bf16.mxu0 %v7264_v14 }
0x1c50   :  { %5689 = vmatpush1.bf16.msra.mxu0 %v7266_v31 }
0x1c51   :  { %5691 = vmatprep.subr.bf16.mxu0 %v7274_v36 }
0x1c54   :  { %5693 = vmatpush1.bf16.msra.mxu0 %v7278_v21 }
0x1d1a   :  { %v2587_v50 = vpop.f32.mrb[12].mxu0 }
0x1d1b   :  { %v2589_v26 = vpop.f32.mrb[13].mxu0  ;;  %v2594_v11 = vrot.slane %v2587_v50, 4  ;;  %v2596_v56 = vrot.slane %v2587_v50, 5 }
0x1d1c   :  { %v2595_v58 = vrot.slane %v2589_v26, 4  ;;  %v2597_v24 = vrot.slane %v2589_v26, 5 }
0x1d1d   :  { %v2602_v35 = vadd.f32 %v2594_v11, %v6906_v27  ;;  %v2604_v5 = vadd.f32 %v2596_v56, %v6927_v37 }
0x1d1e   :  { %v2603_v19 = vadd.f32 %v2595_v58, %v7356_v34  ;;  %v2605_v16 = vadd.f32 %v2597_v24, %v7360_v30 }
0x1d1f   :  { %v5066_v12 = vmul.f32 -1.442695, %v2602_v35  ;;  %v5068_v15 = vmul.f32 -1.442695, %v2604_v5 }
0x1d20   :  { %6193 = vtanh.f32 %v2603_v19  ;;  %v5067_v59 = vmul.f32 -1.442695, %v2603_v19  ;;  %v5069_v58 = vmul.f32 -1.442695, %v2605_v16 }
0x1d21   :  { %6195 = vtanh.f32 %v2605_v16 }
0x1d22   :  { %6197 = vpow2.f32 %v5066_v12 }
0x1d23   :  { %6199 = vpow2.f32 %v5068_v15 }
0x1d2a   :  { %v6194_v40 = vpop.eup %6193 }
0x1d2b   :  { %2642 = vrot.lane.b32.xlu0 %v6194_v40, %s6501_s4  ;;  %v6196_v20 = vpop.eup %6195 }
0x1d2c   :  { %2644 = vrot.lane.b32.xlu1 %v6196_v20, %s6501_s4  ;;  %v6198_v46 = vpop.eup %6197 }
0x1d2d   :  { %v2618_v60 = vadd.f32 1.0, %v6198_v46  ;;  %v6200_v63 = vpop.eup %6199 }
0x1d2e   :  { %v2620_v45 = vadd.f32 1.0, %v6200_v63 }
0x1d2f   :  { %6201 = vrcp.f32 %v2618_v60 }
0x1d30   :  { %6203 = vrcp.f32 %v2620_v45 }
0x1d39   :  { %v6202_v9 = vpop.eup %6201 }
0x1d3a   :  { %v6204_v33 = vpop.eup %6203  ;;  %v2638_v2 = vmul.f32 %v6202_v9, %v2634_v42 }
0x1d3b   :  { %v2639_v13 = vmul.f32 %v6204_v33, %v2635_v39 }
0x1d9d   :  { %v2643_v57 = vpop.permute.xlu0 %2642 }
0x1d9e   :  { %v2648_v38 = vmul.f32 %v6202_v9, %v2643_v57  ;;  %v2645_v62 = vpop.permute.xlu1 %2644 }
0x1d9f   :  { %v2649_v7 = vmul.f32 %v6204_v33, %v2645_v62 }
0x1da0   :  { %2652 = vrot.lane.b32.xlu0 %v2648_v38, %s6501_s4 }
0x1da1   :  { %2654 = vrot.lane.b32.xlu1 %v2649_v7, %s6501_s4 }
0x1e12   :  { %v2653_v43 = vpop.permute.xlu0 %2652 }
0x1e13   :  { %v7533_v54 = vadd.f32 %v2653_v43, %v2638_v2  ;;  %v2655_v55 = vpop.permute.xlu1 %2654 }
0x1e14   :  { %v7537_v61 = vadd.f32 %v2655_v55, %v2639_v13 }
0x1e15   :  { %6205 = vtanh.f32 %v7533_v54 }
0x1e16   :  { %6207 = vtanh.f32 %v7537_v61 }
0x1e17   :  { %6209 = vpow2.f32 %v5067_v59 }
0x1e18   :  { %6211 = vpow2.f32 %v5069_v58  ;;  %v2802_v58 = vrot.slane %v7533_v54, 7 }
0x1e1f   :  { %v6206_v50 = vpop.eup %6205 }
0x1e20   :  { %2664 = vrot.lane.b32.xlu0 %v6206_v50, %s6501_s4  ;;  %v6208_v26 = vpop.eup %6207 }
0x1e21   :  { %2666 = vrot.lane.b32.xlu1 %v6208_v26, %s6501_s4  ;;  %v6210_v24 = vpop.eup %6209 }
0x1e22   :  { %v2619_v17 = vadd.f32 1.0, %v6210_v24  ;;  %v6212_v40 = vpop.eup %6211 }
0x1e23   :  { %v2621_v20 = vadd.f32 1.0, %v6212_v40 }
0x1e24   :  { %6213 = vrcp.f32 %v2619_v17 }
0x1e25   :  { %6215 = vrcp.f32 %v2621_v20  ;;  %v2803_v20 = vrot.slane %v7537_v61, 7 }
0x1e2e   :  { %v6214_v11 = vpop.eup %6213 }
0x1e2f   :  { %v6216_v5 = vpop.eup %6215 }
0x1e92   :  { %v2665_v35 = vpop.permute.xlu0 %2664 }
0x1e93   :  { %v2670_v56 = vmul.f32 %v6214_v11, %v2665_v35  ;;  %v2667_v15 = vpop.permute.xlu1 %2666 }
0x1e94   :  { %v2671_v16 = vmul.f32 %v6216_v5, %v2667_v15 }
0x1e95   :  { %v2675_v12 = vrot.slane %v2670_v56, %v7110_v32  ;;  %v2684_v46 = vrot.slane %v2670_v56, 4 }
0x1e96   :  { %v2679_v60 = vrot.slane %v2671_v16, %v7110_v32  ;;  %v2685_v63 = vrot.slane %v2671_v16, 3 }
0x1e97   :  { %v7546_v19 = vsel %vm1242_vm6, %v2675_v12, %v7506_v49 }
0x1e98   :  { %v7552_v45 = vsel %vm1242_vm6, %v2679_v60, %v7512_v28  ;;  %v2686_v9 = vsel %vm536_vm1, %v2685_v63, %v2684_v46 }
0x1e99   :  { %5070 = vmatmul.mubr.msk.f32.vlgmr.msra.gmra.mrb[20].mxu1 %vm136_vm0, %v2686_v9 }
0x1e9a   :  { %5697 = vmatpush1.bf16.msra.mxu1 %v7242_v8  ;;  %3089 = vmatprep.mubr.f32.mxu1 %v6500_v0 }
0x1e9b   :  { %5699 = vmatprep.subr.bf16.mxu1 %v7253_v48 }
0x1e9e   :  { %5701 = vmatpush1.bf16.msra.mxu1 %v7258_v1 }
0x1e9f   :  { %5703 = vmatprep.subr.bf16.mxu1 %v7264_v14 }
0x1ea2   :  { %5705 = vmatpush1.bf16.msra.mxu1 %v7266_v31 }
0x1ea3   :  { %5707 = vmatprep.subr.bf16.mxu1 %v7274_v36 }
0x1ea6   :  { %5709 = vmatpush1.bf16.msra.mxu1 %v7278_v21 }
0x1f6c   :  { %v2755_v32 = vpop.f32.mrb[20].mxu1 }
0x1f6d   :  { %v2757_v49 = vpop.f32.mrb[21].mxu1  ;;  %v2762_v14 = vrot.slane %v2755_v32, 3  ;;  %v2764_v36 = vrot.slane %v2755_v32, 4 }
0x1f6e   :  { %v2763_v28 = vrot.slane %v2757_v49, 3  ;;  %v2765_v57 = vrot.slane %v2757_v49, 4 }
0x1f6f   :  { %v2770_v31 = vadd.f32 %v2762_v14, %v6906_v27  ;;  %v2772_v33 = vadd.f32 %v2764_v36, %v6927_v37 }
0x1f70   :  { %v2771_v8 = vadd.f32 %v2763_v28, %v7356_v34  ;;  %v2773_v38 = vadd.f32 %v2765_v57, %v7360_v30 }
0x1f71   :  { %v5071_v21 = vmul.f32 -1.442695, %v2770_v31  ;;  %v5073_v62 = vmul.f32 -1.442695, %v2772_v33 }
0x1f72   :  { %6217 = vtanh.f32 %v2771_v8  ;;  %v5072_v54 = vmul.f32 -1.442695, %v2771_v8  ;;  %v5074_v15 = vmul.f32 -1.442695, %v2773_v38 }
0x1f73   :  { %6219 = vtanh.f32 %v2773_v38 }
0x1f74   :  { %6221 = vpow2.f32 %v5071_v21 }
0x1f75   :  { %6223 = vpow2.f32 %v5073_v62 }
0x1f7c   :  { %v6218_v48 = vpop.eup %6217 }
0x1f7d   :  { %2810 = vrot.lane.b32.xlu0 %v6218_v48, %s6501_s4  ;;  %v6220_v1 = vpop.eup %6219 }
0x1f7e   :  { %2812 = vrot.lane.b32.xlu1 %v6220_v1, %s6501_s4  ;;  %v6222_v7 = vpop.eup %6221 }
0x1f7f   :  { %v2786_v42 = vadd.f32 1.0, %v6222_v7  ;;  %v6224_v2 = vpop.eup %6223 }
0x1f80   :  { %v2788_v43 = vadd.f32 1.0, %v6224_v2 }
0x1f81   :  { %6225 = vrcp.f32 %v2786_v42 }
0x1f82   :  { %6227 = vrcp.f32 %v2788_v43 }
0x1f8b   :  { %v6226_v39 = vpop.eup %6225 }
0x1f8c   :  { %v6228_v50 = vpop.eup %6227  ;;  %v2806_v24 = vmul.f32 %v6226_v39, %v2802_v58 }
0x1f8d   :  { %v2807_v11 = vmul.f32 %v6228_v50, %v2803_v20 }
0x1fef   :  { %v2811_v13 = vpop.permute.xlu0 %2810 }
0x1ff0   :  { %v2816_v55 = vmul.f32 %v6226_v39, %v2811_v13  ;;  %v2813_v26 = vpop.permute.xlu1 %2812 }
0x1ff1   :  { %v2817_v59 = vmul.f32 %v6228_v50, %v2813_v26 }
0x1ff2   :  { %2820 = vrot.lane.b32.xlu0 %v2816_v55, %s6501_s4 }
0x1ff3   :  { %2822 = vrot.lane.b32.xlu1 %v2817_v59, %s6501_s4 }
0x2064   :  { %v2821_v17 = vpop.permute.xlu0 %2820 }
0x2065   :  { %v7573_v40 = vadd.f32 %v2821_v17, %v2806_v24  ;;  %v2823_v35 = vpop.permute.xlu1 %2822 }
0x2066   :  { %v7577_v56 = vadd.f32 %v2823_v35, %v2807_v11 }
0x2067   :  { %6229 = vtanh.f32 %v7573_v40 }
0x2068   :  { %6231 = vtanh.f32 %v7577_v56 }
0x2069   :  { %6233 = vpow2.f32 %v5072_v54  ;;  %v2970_v54 = vrot.slane %v7573_v40, 7 }
0x206a   :  { %6235 = vpow2.f32 %v5074_v15 }
0x2071   :  { %v6230_v12 = vpop.eup %6229 }
0x2072   :  { %2832 = vrot.lane.b32.xlu0 %v6230_v12, %s6501_s4  ;;  %v6232_v5 = vpop.eup %6231 }
0x2073   :  { %2834 = vrot.lane.b32.xlu1 %v6232_v5, %s6501_s4  ;;  %v6234_v16 = vpop.eup %6233 }
0x2074   :  { %v2787_v61 = vadd.f32 1.0, %v6234_v16  ;;  %v6236_v46 = vpop.eup %6235 }
0x2075   :  { %v2789_v60 = vadd.f32 1.0, %v6236_v46  ;;  %v2971_v46 = vrot.slane %v7577_v56, 7 }
0x2076   :  { %6237 = vrcp.f32 %v2787_v61 }
0x2077   :  { %6239 = vrcp.f32 %v2789_v60 }
0x2080   :  { %v6238_v63 = vpop.eup %6237 }
0x2081   :  { %v6240_v28 = vpop.eup %6239 }
0x20e4   :  { %v2833_v9 = vpop.permute.xlu0 %2832 }
0x20e5   :  { %v2838_v32 = vmul.f32 %v6238_v63, %v2833_v9  ;;  %v2835_v57 = vpop.permute.xlu1 %2834 }
0x20e6   :  { %v2839_v38 = vmul.f32 %v6240_v28, %v2835_v57 }
0x20e7   :  { %v2843_v49 = vrot.slane %v2838_v32, %v7159_v22  ;;  %v2852_v48 = vrot.slane %v2838_v32, 5 }
0x20e8   :  { %v2847_v1 = vrot.slane %v2839_v38, %v7159_v22  ;;  %v2853_v14 = vrot.slane %v2839_v38, 4 }
0x20e9   :  { %v7586_v8 = vsel %vm1425_vm7, %v2843_v49, %v7546_v19 }
0x20ea   :  { %v7592_v31 = vsel %vm1425_vm7, %v2847_v1, %v7552_v45  ;;  %v2854_v36 = vsel %vm536_vm1, %v2853_v14, %v2852_v48 }
0x20eb   :  { %5075 = vmatmul.mubr.msk.f32.vlgmr.msra.gmra.mrb[14].mxu0 %vm136_vm0, %v2854_v36 }
0x21be   :  { %v2923_v21 = vpop.f32.mrb[14].mxu0 }
0x21bf   :  { %v2925_v33 = vpop.f32.mrb[15].mxu0  ;;  %v2930_v45 = vrot.slane %v2923_v21, 2  ;;  %v2932_v39 = vrot.slane %v2923_v21, 3 }
0x21c0   :  { %v2931_v62 = vrot.slane %v2925_v33, 2  ;;  %v2933_v7 = vrot.slane %v2925_v33, 3 }
0x21c1   :  { %v2938_v43 = vadd.f32 %v2930_v45, %v6906_v27  ;;  %v2940_v55 = vadd.f32 %v2932_v39, %v6927_v37 }
0x21c2   :  { %v2939_v19 = vadd.f32 %v2931_v62, %v7356_v34  ;;  %v2941_v42 = vadd.f32 %v2933_v7, %v7360_v30 }
0x21c3   :  { %v5076_v13 = vmul.f32 -1.442695, %v2938_v43  ;;  %v5078_v50 = vmul.f32 -1.442695, %v2940_v55 }
0x21c4   :  { %6241 = vtanh.f32 %v2939_v19  ;;  %v5077_v40 = vmul.f32 -1.442695, %v2939_v19  ;;  %v5079_v28 = vmul.f32 -1.442695, %v2941_v42 }
0x21c5   :  { %6243 = vtanh.f32 %v2941_v42 }
0x21c6   :  { %6245 = vpow2.f32 %v5076_v13 }
0x21c7   :  { %6247 = vpow2.f32 %v5078_v50 }
0x21ce   :  { %v6242_v22 = vpop.eup %6241 }
0x21cf   :  { %2978 = vrot.lane.b32.xlu0 %v6242_v22, %s6501_s4  ;;  %v6244_v2 = vpop.eup %6243 }
0x21d0   :  { %2980 = vrot.lane.b32.xlu1 %v6244_v2, %s6501_s4  ;;  %v6246_v26 = vpop.eup %6245 }
0x21d1   :  { %v2954_v59 = vadd.f32 1.0, %v6246_v26  ;;  %v6248_v58 = vpop.eup %6247 }
0x21d2   :  { %v2956_v24 = vadd.f32 1.0, %v6248_v58 }
0x21d3   :  { %6249 = vrcp.f32 %v2954_v59 }
0x21d4   :  { %6251 = vrcp.f32 %v2956_v24 }
0x21dd   :  { %v6250_v17 = vpop.eup %6249 }
0x21de   :  { %v6252_v35 = vpop.eup %6251  ;;  %v2974_v15 = vmul.f32 %v6250_v17, %v2970_v54 }
0x21df   :  { %v2975_v60 = vmul.f32 %v6252_v35, %v2971_v46 }
0x2241   :  { %v2979_v20 = vpop.permute.xlu0 %2978 }
0x2242   :  { %v2984_v11 = vmul.f32 %v6250_v17, %v2979_v20  ;;  %v2981_v12 = vpop.permute.xlu1 %2980 }
0x2243   :  { %v2985_v5 = vmul.f32 %v6252_v35, %v2981_v12 }
0x2244   :  { %2988 = vrot.lane.b32.xlu0 %v2984_v11, %s6501_s4 }
0x2245   :  { %2990 = vrot.lane.b32.xlu1 %v2985_v5, %s6501_s4 }
0x22b6   :  { %v2989_v16 = vpop.permute.xlu0 %2988 }
0x22b7   :  { %v7605_v61 = vadd.f32 %v2989_v16, %v2974_v15  ;;  %v2991_v63 = vpop.permute.xlu1 %2990 }
0x22b8   :  { %v7609_v9 = vadd.f32 %v2991_v63, %v2975_v60 }
0x22b9   :  { %6253 = vtanh.f32 %v7605_v61 }
0x22ba   :  { %6255 = vtanh.f32 %v7609_v9 }
0x22bb   :  { %6257 = vpow2.f32 %v5077_v40 }
0x22bc   :  { %6259 = vpow2.f32 %v5079_v28 }
0x22c3   :  { %v6254_v32 = vpop.eup %6253 }
0x22c4   :  { %3000 = vrot.lane.b32.xlu0 %v6254_v32, %s6501_s4  ;;  %v6256_v49 = vpop.eup %6255 }
0x22c5   :  { %3002 = vrot.lane.b32.xlu1 %v6256_v49, %s6501_s4  ;;  %v6258_v57 = vpop.eup %6257  ;;  %v3139_v49 = vrot.slane %v7609_v9, 7 }
0x22c6   :  { %v2955_v56 = vadd.f32 1.0, %v6258_v57  ;;  %v6260_v38 = vpop.eup %6259 }
0x22c7   :  { %v2957_v48 = vadd.f32 1.0, %v6260_v38  ;;  %v3244_v38 = vld [vmem:[%s8199_s8] sm:$0xff] }
0x22c8   :  { %6261 = vrcp.f32 %v2955_v56 }
0x22c9   :  { %6263 = vrcp.f32 %v2957_v48  ;;  %v3245_v48 = vld [vmem:[%s8199_s8 + $0x8] sm:$0xff] }
0x22ca   :  { %v5710_v9 = vpack.c.bf16 %v3245_v48, %v3244_v38 }
0x22cc   :  { %5711 = vmatprep.subr.bf16.mxu0 %v5710_v9 }
0x22cd   :  { %5713 = vmatpush3.bf16.msra.mxu0 %v5710_v9 }
0x22d2   :  { %v6262_v1 = vpop.eup %6261 }
0x22d3   :  { %v6264_v33 = vpop.eup %6263 }
0x2336   :  { %v3001_v14 = vpop.permute.xlu0 %3000 }
0x2337   :  { %v3006_v36 = vmul.f32 %v6262_v1, %v3001_v14  ;;  %v3003_v62 = vpop.permute.xlu1 %3002  ;;  %v3247_v1 = vld [vmem:[%s8199_s8 + $0x18] sm:$0xff]  ;;  %v3248_v14 = vld [vmem:[%s8199_s8 + $0x20] sm:$0xff] }
0x2338   :  { %v3007_v19 = vmul.f32 %v6264_v33, %v3003_v62  ;;  %v3249_v33 = vld [vmem:[%s8199_s8 + $0x28] sm:$0xff]  ;;  %v3216_v62 = vld [vmem:[#allocation8] sm:$0xff] }
0x2339   :  { %v3011_v21 = vrot.slane %v3006_v36, %v7201_v3  ;;  %v3020_v42 = vrot.slane %v3006_v36, 6  ;;  %v6510_v36 = vmov 0.0|0.0  }
0x233a   :  { %v3015_v22 = vrot.slane %v3007_v19, %v7201_v3  ;;  %v3021_v2 = vrot.slane %v3007_v19, 5  ;;  %5742 = vmatprep.subr.bf16.mxu1 %v6510_v36  ;;  %v3217_v19 = vld [vmem:[#allocation8 + $0x8] sm:$0xff] }
0x233b   :  { %v7618_v7 = vsel %vm1608_vm8, %v3011_v21, %v7586_v8 }
0x233c   :  { %v7624_v45 = vsel %vm1608_vm8, %v3015_v22, %v7592_v31  ;;  %v3022_v43 = vsel %vm536_vm1, %v3021_v2, %v3020_v42  ;;  %v7666_v42 = vpack.c.bf16 %v3217_v19, %v3216_v62  ;;  %v3218_v22 = vld [vmem:[#allocation8 + $0x10] sm:$0xff]  ;;  %v3219_v2 = vld [vmem:[#allocation8 + $0x18] sm:$0xff] }
0x233d   :  { %5080 = vmatmul.mubr.msk.f32.vlgmr.msra.gmra.mrb[22].mxu1 %vm136_vm0, %v3022_v43 }
0x233e   :  { %5251 = vmatprep.mubr.msk.f32.mxu1 %vm6511_vm10, %v6500_v0  ;;  %5744 = vmatpush3.bf16.msra.mxu1 %v7666_v42 }
0x233f   :  { %5745 = vmatprep.subr.bf16.mxu1 %v6510_v36 }
0x2410   :  { %v3091_v39 = vpop.f32.mrb[22].mxu1 }
0x2411   :  { %v3093_v13 = vpop.f32.mrb[23].mxu1  ;;  %v3098_v59 = vrot.slane %v3091_v39, 1  ;;  %v3100_v24 = vrot.slane %v3091_v39, 2  ;;  %v5718_v39 = vpack.c.bf16 %v3249_v33, %v3248_v14 }
0x2412   :  { %v3099_v55 = vrot.slane %v3093_v13, 1  ;;  %v3101_v50 = vrot.slane %v3093_v13, 2  ;;  %v3250_v13 = vld [vmem:[%s8199_s8 + $0x30] sm:$0xff] }
0x2413   :  { %v3106_v58 = vadd.f32 %v3098_v59, %v6906_v27 }
0x2414   :  { %v7629_v8 = vadd.f32 %v3099_v55, %v7356_v34  ;;  %v7633_v3 = vadd.f32 %v3101_v50, %v7360_v30  ;;  %v3108_v34 = vadd.f32 %v3100_v24, %v6927_v37  ;;  %v3138_v37 = vrot.slane %v7605_v61, 7  ;;  %v3246_v61 = vld [vmem:[%s8199_s8 + $0x10] sm:$0xff]  ;;  %v3251_v50 = vld [vmem:[%s8199_s8 + $0x38] sm:$0xff] }
0x2415   :  { %v5081_v17 = vmul.f32 -1.442695, %v3106_v58  ;;  %v5714_v21 = vpack.c.bf16 %v3247_v1, %v3246_v61  ;;  %v7672_v55 = vpack.c.bf16 %v3219_v2, %v3218_v22  ;;  %v5722_v59 = vpack.c.bf16 %v3251_v50, %v3250_v13  ;;  %v3252_v58 = vld [vmem:[%s8199_s8 + $0x40] sm:$0xff] }
0x2416   :  { %6265 = vtanh.f32 %v7629_v8  ;;  %v5083_v20 = vmul.f32 -1.442695, %v3108_v34  ;;  %v3222_v34 = vld [vmem:[#allocation8 + $0x30] sm:$0xff] }
0x2417   :  { %6267 = vtanh.f32 %v7633_v3  ;;  %5715 = vmatprep.subr.bf16.mxu0 %v5714_v21  ;;  %5747 = vmatpush3.bf16.msra.mxu1 %v7672_v55 }
0x2418   :  { %6269 = vpow2.f32 %v5081_v17  ;;  %5717 = vmatpush3.bf16.msra.mxu0 %v5714_v21  ;;  %v3253_v17 = vld [vmem:[%s8199_s8 + $0x48] sm:$0xff]  ;;  %5748 = vmatprep.subr.bf16.mxu1 %v6510_v36 }
0x2419   :  { %6271 = vpow2.f32 %v5083_v20  ;;  %5719 = vmatprep.subr.bf16.mxu0 %v5718_v39  ;;  %v3223_v20 = vld [vmem:[#allocation8 + $0x38] sm:$0xff] }
0x241c   :  { %5721 = vmatpush3.bf16.msra.mxu0 %v5718_v39 }
0x241d   :  { %5723 = vmatprep.subr.bf16.mxu0 %v5722_v59 }
0x2420   :  { %v6266_v31 = vpop.eup %6265  ;;  %5725 = vmatpush3.bf16.msra.mxu0 %v5722_v59 }
0x2421   :  { %3146 = vrot.lane.b32.xlu0 %v6266_v31, %s6501_s4  ;;  %v6268_v26 = vpop.eup %6267  ;;  %v3220_v31 = vld [vmem:[#allocation8 + $0x20] sm:$0xff] }
0x2422   :  { %3148 = vrot.lane.b32.xlu1 %v6268_v26, %s6501_s4  ;;  %v6270_v30 = vpop.eup %6269  ;;  %v3221_v26 = vld [vmem:[#allocation8 + $0x28] sm:$0xff] }
0x2423   :  { %v3122_v11 = vadd.f32 1.0, %v6270_v30  ;;  %v6272_v35 = vpop.eup %6271  ;;  %v7683_v24 = vpack.c.bf16 %v3221_v26, %v3220_v31  ;;  %v5726_v30 = vpack.c.bf16 %v3253_v17, %v3252_v58 }
0x2424   :  { %v3124_v12 = vadd.f32 1.0, %v6272_v35  ;;  %v3254_v35 = vld [vmem:[%s8199_s8 + $0x50] sm:$0xff] }
0x2425   :  { %6273 = vrcp.f32 %v3122_v11  ;;  %5750 = vmatpush3.bf16.msra.mxu1 %v7683_v24  ;;  %v7690_v11 = vpack.c.bf16 %v3223_v20, %v3222_v34  ;;  %5727 = vmatprep.subr.bf16.mxu0 %v5726_v30 }
0x2426   :  { %6275 = vrcp.f32 %v3124_v12  ;;  %v3255_v12 = vld [vmem:[%s8199_s8 + $0x58] sm:$0xff]  ;;  %5751 = vmatprep.subr.bf16.mxu1 %v6510_v36  ;;  %5729 = vmatpush3.bf16.msra.mxu0 %v5726_v30 }
0x2429   :  { %5753 = vmatpush3.bf16.msra.mxu1 %v7690_v11 }
0x242a   :  { %5754 = vmatprep.subr.bf16.mxu1 %v6510_v36 }
0x242c   :  { %5252 = vmatmul.mubr.f32.vlgmr.msra.gmra.mrb[24].mxu1 %v6500_v0 }
0x242d   :  { %5756 = vmatpush3.bf16.msra.mxu1 %v7666_v42  ;;  %5270 = vmatprep.mubr.msk.f32.mxu1 %vm6511_vm10, %v6500_v0 }
0x242e   :  { %5757 = vmatprep.subr.bf16.mxu1 %v6510_v36 }
0x242f   :  { %v6274_v5 = vpop.eup %6273 }
0x2430   :  { %v6276_v16 = vpop.eup %6275  ;;  %v3142_v60 = vmul.f32 %v6274_v5, %v3138_v37 }
0x2431   :  { %v3143_v40 = vmul.f32 %v6276_v16, %v3139_v49  ;;  %5759 = vmatpush3.bf16.msra.mxu1 %v7672_v55  ;;  %v3258_v49 = vld [vmem:[%s8199_s8 + $0x70] sm:$0xff] }
0x2432   :  { %5760 = vmatprep.subr.bf16.mxu1 %v6510_v36 }
0x2435   :  { %5762 = vmatpush3.bf16.msra.mxu1 %v7683_v24 }
0x2436   :  { %5763 = vmatprep.subr.bf16.mxu1 %v6510_v36 }
0x2439   :  { %5765 = vmatpush3.bf16.msra.mxu1 %v7690_v11 }
0x243a   :  { %5778 = vmatprep.subr.bf16.mxu1 %v6510_v36 }
0x2493   :  { %v3147_v54 = vpop.permute.xlu0 %3146 }
0x2494   :  { %v3152_v15 = vmul.f32 %v6274_v5, %v3147_v54  ;;  %v3149_v27 = vpop.permute.xlu1 %3148  ;;  %v5730_v5 = vpack.c.bf16 %v3255_v12, %v3254_v35  ;;  %v3256_v54 = vld [vmem:[%s8199_s8 + $0x60] sm:$0xff] }
0x2495   :  { %v3153_v46 = vmul.f32 %v6276_v16, %v3149_v27  ;;  %v5082_v27 = vmul.f32 -1.442695, %v7629_v8  ;;  %v7776_v12 = vld [vmem:[%s8202_s11] ss:$0 sm:$0xff] }
0x2496   :  { %3156 = vrot.lane.b32.xlu0 %v3152_v15, %s6501_s4  ;;  %v3257_v15 = vld [vmem:[%s8199_s8 + $0x68] sm:$0xff]  ;;  %5731 = vmatprep.subr.bf16.mxu0 %v5730_v5 }
0x2497   :  { %3158 = vrot.lane.b32.xlu1 %v3153_v46, %s6501_s4  ;;  %v5734_v16 = vpack.c.bf16 %v3257_v15, %v3256_v54  ;;  %5733 = vmatpush3.bf16.msra.mxu0 %v5730_v5  ;;  %v5084_v46 = vmul.f32 -1.442695, %v7633_v3 }
0x2499   :  { %5735 = vmatprep.subr.bf16.mxu0 %v5734_v16 }
0x249b   :  { %5737 = vmatpush3.bf16.msra.mxu0 %v5734_v16 }
0x24ff   :  { %v7742_v33 = vpop.f32.mrb[24].mxu1 }
0x2500   :  { %v5253_v62 = vpop.f32.mrb[25].mxu1 }
0x2508   :  { %v3157_v63 = vpop.permute.xlu0 %3156 }
0x2509   :  { %v3162_v32 = vadd.f32 %v3157_v63, %v3142_v60  ;;  %v3159_v28 = vpop.permute.xlu1 %3158 }
0x250a   :  { %v3163_v57 = vadd.f32 %v3159_v28, %v3143_v40  ;;  %v3259_v40 = vld [vmem:[%s8199_s8 + $0x78] sm:$0xff] }
0x250b   :  { %6277 = vtanh.f32 %v3162_v32  ;;  %v5738_v28 = vpack.c.bf16 %v3259_v40, %v3258_v49 }
0x250c   :  { %6279 = vtanh.f32 %v3163_v57 }
0x250d   :  { %6281 = vpow2.f32 %v5082_v27  ;;  %5739 = vmatprep.subr.bf16.mxu0 %v5738_v28 }
0x250e   :  { %6283 = vpow2.f32 %v5084_v46  ;;  %5741 = vmatpush3.bf16.msra.mxu0 %v5738_v28 }
0x250f   :  { %5766 = vmatprep.subr.bf16.mxu0 %v6510_v36 }
0x2515   :  { %v6278_v56 = vpop.eup %6277 }
0x2516   :  { %3168 = vrot.lane.b32.xlu0 %v6278_v56, %s6501_s4  ;;  %v6280_v43 = vpop.eup %6279 }
0x2517   :  { %3170 = vrot.lane.b32.xlu1 %v6280_v43, %s6501_s4  ;;  %v6282_v37 = vpop.eup %6281 }
0x2518   :  { %v3123_v60 = vadd.f32 1.0, %v6282_v37  ;;  %v6284_v63 = vpop.eup %6283  ;;  %v3453_v37 = vand.u32 127, %v126_v51 }
0x2519   :  { %v3125_v32 = vadd.f32 1.0, %v6284_v63 }
0x251a   :  { %6285 = vrcp.f32 %v3123_v60  ;;  %v7786_v60 = vld [vmem:[%s8205_s14] sm:$0x3]  ;;  %v7789_v63 = vsub.s32 %v3453_v37, %v6796_v52 }
0x251b   :  { %6287 = vrcp.f32 %v3125_v32  ;;  %v3225_v32 = vsub.f32 1.0, %v7786_v60 }
0x2524   :  { %v6286_v8 = vpop.eup %6285 }
0x2525   :  { %v6288_v38 = vpop.eup %6287 }
0x2588   :  { %v3169_v57 = vpop.permute.xlu0 %3168 }
0x2589   :  { %v3174_v3 = vmul.f32 %v6286_v8, %v3169_v57  ;;  %v3171_v48 = vpop.permute.xlu1 %3170  ;;  %v7794_v57 = vmul.f32 1e+12, %v3225_v32 }
0x258a   :  { %v3175_v9 = vmul.f32 %v6288_v38, %v3171_v48 }
0x258b   :  { %v3179_v56 = vrot.slane %v3174_v3, %v7321_v29 }
0x258c   :  { %v3183_v1 = vrot.slane %v3175_v9, %v7321_v29 }
0x258d   :  { %v7731_v61 = vsel %vm1791_vm9, %v3179_v56, %v7618_v7 }
0x258e   :  { %v7737_v14 = vsel %vm1791_vm9, %v3183_v1, %v7624_v45  ;;  %v6512_v45 = vmov 1966171168  }
0x258f   :  { %v5892_v21 = vpack.i.bf16 %v7737_v14, %v7731_v61  ;;  %v3407_v43 = vunpack.c.l.s4 %v6512_v45 }
0x2591   :  { %5893 = vrot.lane.b32.xlu0 %v5892_v21, %s6501_s4  ;;  %v3408_v39 = vunpack.c.0.s8 %v3407_v43 }
0x2593   :  { %v7759_v13 = vsub.s32 %v3408_v39, %v6796_v52 }
0x2595   :  { %v3412_v50 = vrot.slane %v7742_v33, %v7759_v13 }
0x2597   :  { %v3413_v31 = vcombine.high %v3412_v50, %v3412_v50  ;;  %v3420_v59 = vrot.slane %v3412_v50, %v7759_v13 }
0x2599   :  { %v3427_v26 = vrot.slane %v3413_v31, %v7759_v13  ;;  %v3431_v17 = vrot.slane %v3420_v59, %v6820_v6 }
0x259b   :  { %v3435_v58 = vrot.slane %v3427_v26, %v6820_v6 }
0x2603   :  { %v5894_v19 = vpop.permute.xlu0 %5893 }
0x2604   :  { %v5896_v22 = vunpack.i.h.bf16 %v5894_v19  ;;  %v5895_v7 = vunpack.i.l.bf16 %v5894_v19 }
0x2606   :  { %v3242_v2 = vsel %vm136_vm0, %v7328_v44, %v5895_v7  ;;  %v3243_v29 = vsel %vm136_vm0, %v7336_v18, %v5896_v22 }
0x2607   :  { %5232 = vmatprep.mubr.f32.mxu0 %v3242_v2 }
0x2608   :  { %5233 = vmatmul.mubr.f32.vlgmr.msra.gmra.mrb[16].mxu0 %v3243_v29 }
0x2609   :  { %5768 = vmatpush3.bf16.msra.mxu0 %v7666_v42  ;;  %5289 = vmatprep.mubr.msk.f32.mxu0 %vm6511_vm10, %v6500_v0 }
0x260a   :  { %5769 = vmatprep.subr.bf16.mxu0 %v6510_v36 }
0x260d   :  { %5771 = vmatpush3.bf16.msra.mxu0 %v7672_v55 }
0x260e   :  { %5772 = vmatprep.subr.bf16.mxu0 %v6510_v36 }
0x2611   :  { %5774 = vmatpush3.bf16.msra.mxu0 %v7683_v24 }
0x2612   :  { %5775 = vmatprep.subr.bf16.mxu0 %v6510_v36 }
0x2615   :  { %5777 = vmatpush3.bf16.msra.mxu0 %v7690_v11 }
0x2616   :  { %5790 = vmatprep.subr.bf16.mxu0 %v6510_v36 }
0x26db   :  { %v7767_v34 = vpop.f32.mrb[16].mxu0 }
0x26dc   :  { %v7769_v20 = vpop.f32.mrb[17].mxu0  ;;  %v3439_v30 = vadd.f32 %v7767_v34, %v3435_v58 }
0x26dd   :  { %v3438_v35 = vadd.f32 %v3431_v17, %v7769_v20 }
0x26de   :  { %6289 = vtanh.f32 %v3439_v30 }
0x26df   :  { %6291 = vtanh.f32 %v3438_v35 }
0x26e8   :  { %v6290_v5 = vpop.eup %6289 }
0x26e9   :  { %v6292_v54 = vpop.eup %6291  ;;  %v3443_v15 = vmul.f32 %v6290_v5, %v7776_v12 }
0x26ea   :  { %v3442_v16 = vmul.f32 %v6292_v54, %v7776_v12 }
0x26eb   :  { %v3447_v27 = vsel %vm136_vm0, %v3443_v15, 0.0 }
0x26ec   :  { %3448 = vadd.xlane.f32.xlu0 %v3447_v27  ;;  %v3444_v46 = vsel %vm136_vm0, %v3442_v16, 0.0 }
0x26ed   :  { %3445 = vadd.xlane.f32.xlu1 %v3444_v46 }
0x2779   :  { %v3449_v49 = vpop.xlane.xlu0 %3448 }
0x277a   :  { %v3461_v40 = vrot.slane %v3449_v49, %v7789_v63  ;;  %v3446_v28 = vpop.xlane.xlu1 %3445 }
0x277b   :  { %v3457_v8 = vrot.slane %v3446_v28, %v7789_v63 }
0x277d   :  { %v3462_v51 = vsel %vm536_vm1, %v3461_v40, %v3457_v8 }
0x277e   :  { %v3464_v3 = vmul.f32 %v3462_v51, %v7786_v60 }
0x2780   :  { %v3465_v56 = vsub.f32 %v3464_v3, %v7794_v57 }
0x2782   :  { %v3467_v52 = vsel %vm3466_vm11, %v3465_v56, -inf }
0x2783   :  { %3468 = vmax.xlane.f32.xlu0 %v3467_v52 }
0x2810   :  { %v3469_v38 = vpop.xlane.xlu0 %3468 }
0x2811   :  { %v3470_v48 = vsub.f32 %v3465_v56, %v3469_v38 }
0x2813   :  { %v3471_v9 = vmul.f32 1.442695, %v3470_v48 }
0x2815   :  { %6293 = vpow2.f32 %v3471_v9 }
0x281f   :  { %v6294_v1 = vpop.eup %6293 }
0x2820   :  { %v3473_v21 = vsel %vm3466_vm11, %v6294_v1, 0.0 }
0x2821   :  { %3474 = vadd.xlane.f32.xlu1 %v3473_v21 }
0x28ae   :  { %v3475_v62 = vpop.xlane.xlu1 %3474 }
0x28af   :  { %6295 = vrcp.f32 %v3475_v62 }
0x28b0   :  { %6297 = vtanh.f32 %v7742_v33 }
0x28b9   :  { %v6296_v19 = vpop.eup %6295 }
0x28ba   :  { %v3477_v22 = vmul.f32 %v6296_v19, %v6294_v1  ;;  %v6298_v29 = vpop.eup %6297 }
0x28bb   :  { %v3510_v45 = vrot.slane %v6298_v29, 1 }
0x28bc   :  { %v3488_v7 = vrot.slane %v3477_v22, %v6799_v53  ;;  %v3481_v2 = vrot.slane %v3477_v22, %v6820_v6 }
0x28be   :  { %3490 = vbcast.lane.b32.xlu0 %v3488_v7, 256  ;;  %3483 = vbcast.lane.b32.xlu1 %v3481_v2, 256 }
0x28c2   :  { %3511 = vrot.lane.b32.xlu0 %v6298_v29, %s6501_s4  ;;  %3513 = vrot.lane.b32.xlu1 %v3510_v45, %s6501_s4 }
0x2930   :  { %v3491_v43 = vpop.permute.xlu0 %3490  ;;  %v3484_v39 = vpop.permute.xlu1 %3483 }
0x2931   :  { %v3493_v50 = vmul.f32 %v3491_v43, %v7336_v18  ;;  %v3492_v33 = vmul.f32 %v3484_v39, %v7328_v44 }
0x2933   :  { %v3501_v31 = vsel %vm136_vm0, %v3493_v50, 0.0  ;;  %v3494_v26 = vsel %vm136_vm0, %v3492_v33, 0.0 }
0x2934   :  { %v3502_v59 = vrot.slane %v3501_v31, 4  ;;  %v3495_v58 = vrot.slane %v3494_v26, 4  ;;  %v3514_v32 = vpop.permute.xlu1 %3513  ;;  %v3512_v40 = vpop.permute.xlu0 %3511 }
0x2936   :  { %v3503_v17 = vadd.f32 %v3502_v59, %v3501_v31  ;;  %v3496_v30 = vadd.f32 %v3495_v58, %v3494_v26 }
0x2938   :  { %v3504_v35 = vrot.slane %v3503_v17, 2  ;;  %v3497_v5 = vrot.slane %v3496_v30, 2 }
0x293a   :  { %v3498_v54 = vadd.f32 %v3497_v5, %v3496_v30  ;;  %v3505_v15 = vadd.f32 %v3504_v35, %v3503_v17 }
0x293c   :  { %v3499_v16 = vrot.slane %v3498_v54, 1  ;;  %v3506_v27 = vrot.slane %v3505_v15, 1 }
0x293e   :  { %v3500_v46 = vadd.f32 %v3499_v16, %v3498_v54  ;;  %v3507_v37 = vadd.f32 %v3506_v27, %v3505_v15 }
0x2940   :  { %v3518_v49 = vadd.f32 %v3514_v32, %v3507_v37  ;;  %v3517_v28 = vadd.f32 %v3512_v40, %v3500_v46 }
0x2942   :  { %v3526_v8 = vrot.slane %v3518_v49, 7 }
0x2944   :  { %v7811_v51 = vsel %vm536_vm1, %v3526_v8, %v3517_v28 }
0x2945   :  { %5271 = vmatmul.mubr.msk.f32.vlgmr.msra.gmra.mrb[26].mxu1 %vm136_vm0, %v7811_v51 }
0x2946   :  { %5780 = vmatpush3.bf16.msra.mxu1 %v7666_v42  ;;  %5308 = vmatprep.mubr.msk.f32.mxu1 %vm6511_vm10, %v6500_v0 }
0x2947   :  { %5781 = vmatprep.subr.bf16.mxu1 %v6510_v36 }
0x294a   :  { %5783 = vmatpush3.bf16.msra.mxu1 %v7672_v55 }
0x294b   :  { %5784 = vmatprep.subr.bf16.mxu1 %v6510_v36 }
0x294e   :  { %5786 = vmatpush3.bf16.msra.mxu1 %v7683_v24 }
0x294f   :  { %5787 = vmatprep.subr.bf16.mxu1 %v6510_v36 }
0x2952   :  { %5789 = vmatpush3.bf16.msra.mxu1 %v7690_v11 }
0x2953   :  { %5802 = vmatprep.subr.bf16.mxu1 %v6510_v36 }
0x2a18   :  { %v3599_v3 = vpop.f32.mrb[26].mxu1 }
0x2a19   :  { %v3610_v56 = vrot.slane %v3599_v3, %v7759_v13  ;;  %v5272_v52 = vpop.f32.mrb[27].mxu1 }
0x2a1b   :  { %v3611_v38 = vcombine.high %v3610_v56, %v3610_v56  ;;  %v3618_v48 = vrot.slane %v3610_v56, %v7759_v13 }
0x2a1d   :  { %v3625_v9 = vrot.slane %v3611_v38, %v7759_v13  ;;  %v3629_v1 = vrot.slane %v3618_v48, %v6820_v6 }
0x2a1f   :  { %v3633_v21 = vrot.slane %v3625_v9, %v6820_v6  ;;  %v3636_v62 = vadd.f32 %v3629_v1, %v7769_v20 }
0x2a21   :  { %v3637_v19 = vadd.f32 %v7767_v34, %v3633_v21  ;;  %6299 = vtanh.f32 %v3636_v62 }
0x2a23   :  { %6301 = vtanh.f32 %v3637_v19 }
0x2a2b   :  { %v6300_v22 = vpop.eup %6299 }
0x2a2c   :  { %v3640_v7 = vmul.f32 %v6300_v22, %v7776_v12 }
0x2a2d   :  { %v6302_v2 = vpop.eup %6301 }
0x2a2e   :  { %v3642_v29 = vsel %vm136_vm0, %v3640_v7, 0.0  ;;  %v3641_v45 = vmul.f32 %v6302_v2, %v7776_v12 }
0x2a2f   :  { %3643 = vadd.xlane.f32.xlu1 %v3642_v29 }
0x2a30   :  { %v3645_v43 = vsel %vm136_vm0, %v3641_v45, 0.0 }
0x2a31   :  { %3646 = vadd.xlane.f32.xlu0 %v3645_v43 }
0x2abc   :  { %v3644_v39 = vpop.xlane.xlu1 %3643 }
0x2abd   :  { %v3653_v33 = vrot.slane %v3644_v39, %v7789_v63 }
0x2abe   :  { %v3647_v50 = vpop.xlane.xlu0 %3646 }
0x2abf   :  { %v3657_v31 = vrot.slane %v3647_v50, %v7789_v63 }
0x2ac1   :  { %v3658_v26 = vsel %vm536_vm1, %v3657_v31, %v3653_v33 }
0x2ac2   :  { %v3660_v59 = vmul.f32 %v3658_v26, %v7786_v60 }
0x2ac4   :  { %v3661_v58 = vsub.f32 %v3660_v59, %v7794_v57 }
0x2ac6   :  { %v3662_v17 = vsel %vm3466_vm11, %v3661_v58, -inf }
0x2ac7   :  { %3663 = vmax.xlane.f32.xlu0 %v3662_v17 }
0x2b54   :  { %v3664_v30 = vpop.xlane.xlu0 %3663 }
0x2b55   :  { %v3665_v35 = vsub.f32 %v3661_v58, %v3664_v30 }
0x2b57   :  { %v3666_v5 = vmul.f32 1.442695, %v3665_v35 }
0x2b59   :  { %6303 = vpow2.f32 %v3666_v5 }
0x2b63   :  { %v6304_v54 = vpop.eup %6303 }
0x2b64   :  { %v3668_v15 = vsel %vm3466_vm11, %v6304_v54, 0.0 }
0x2b65   :  { %3669 = vadd.xlane.f32.xlu1 %v3668_v15 }
0x2bf2   :  { %v3670_v16 = vpop.xlane.xlu1 %3669 }
0x2bf3   :  { %6305 = vrcp.f32 %v3670_v16 }
0x2bf4   :  { %6307 = vtanh.f32 %v3599_v3 }
0x2bfd   :  { %v6306_v27 = vpop.eup %6305 }
0x2bfe   :  { %v3672_v46 = vmul.f32 %v6306_v27, %v6304_v54  ;;  %v6308_v49 = vpop.eup %6307 }
0x2bff   :  { %v3705_v40 = vrot.slane %v6308_v49, 1 }
0x2c00   :  { %v3683_v37 = vrot.slane %v3672_v46, %v6799_v53  ;;  %v3676_v32 = vrot.slane %v3672_v46, %v6820_v6 }
0x2c02   :  { %3685 = vbcast.lane.b32.xlu0 %v3683_v37, 256  ;;  %3678 = vbcast.lane.b32.xlu1 %v3676_v32, 256 }
0x2c06   :  { %3706 = vrot.lane.b32.xlu0 %v6308_v49, %s6501_s4  ;;  %3708 = vrot.lane.b32.xlu1 %v3705_v40, %s6501_s4 }
0x2c74   :  { %v3686_v28 = vpop.permute.xlu0 %3685  ;;  %v3679_v8 = vpop.permute.xlu1 %3678 }
0x2c75   :  { %v3688_v56 = vmul.f32 %v3686_v28, %v7336_v18  ;;  %v3687_v3 = vmul.f32 %v3679_v8, %v7328_v44 }
0x2c77   :  { %v3696_v52 = vsel %vm136_vm0, %v3688_v56, 0.0  ;;  %v3689_v38 = vsel %vm136_vm0, %v3687_v3, 0.0 }
0x2c78   :  { %v3697_v48 = vrot.slane %v3696_v52, 4  ;;  %v3690_v9 = vrot.slane %v3689_v38, 4  ;;  %v3709_v39 = vpop.permute.xlu1 %3708  ;;  %v3707_v33 = vpop.permute.xlu0 %3706 }
0x2c7a   :  { %v3698_v1 = vadd.f32 %v3697_v48, %v3696_v52  ;;  %v3691_v21 = vadd.f32 %v3690_v9, %v3689_v38 }
0x2c7c   :  { %v3699_v62 = vrot.slane %v3698_v1, 2  ;;  %v3692_v19 = vrot.slane %v3691_v21, 2 }
0x2c7e   :  { %v3693_v22 = vadd.f32 %v3692_v19, %v3691_v21  ;;  %v3700_v7 = vadd.f32 %v3699_v62, %v3698_v1 }
0x2c80   :  { %v3694_v2 = vrot.slane %v3693_v22, 1  ;;  %v3701_v29 = vrot.slane %v3700_v7, 1 }
0x2c82   :  { %v3695_v45 = vadd.f32 %v3694_v2, %v3693_v22  ;;  %v3702_v43 = vadd.f32 %v3701_v29, %v3700_v7 }
0x2c84   :  { %v3713_v50 = vadd.f32 %v3709_v39, %v3702_v43  ;;  %v3712_v31 = vadd.f32 %v3707_v33, %v3695_v45 }
0x2c86   :  { %v3720_v26 = vrot.slane %v3713_v50, 7 }
0x2c88   :  { %v7852_v59 = vsel %vm536_vm1, %v3720_v26, %v3712_v31 }
0x2c89   :  { %5290 = vmatmul.mubr.msk.f32.vlgmr.msra.gmra.mrb[18].mxu0 %vm136_vm0, %v7852_v59 }
0x2c8a   :  { %5792 = vmatpush3.bf16.msra.mxu0 %v7666_v42  ;;  %5327 = vmatprep.mubr.msk.f32.mxu0 %vm6511_vm10, %v6500_v0 }
0x2c8b   :  { %5793 = vmatprep.subr.bf16.mxu0 %v6510_v36 }
0x2c8e   :  { %5795 = vmatpush3.bf16.msra.mxu0 %v7672_v55 }
0x2c8f   :  { %5796 = vmatprep.subr.bf16.mxu0 %v6510_v36 }
0x2c92   :  { %5798 = vmatpush3.bf16.msra.mxu0 %v7683_v24 }
0x2c93   :  { %5799 = vmatprep.subr.bf16.mxu0 %v6510_v36 }
0x2c96   :  { %5801 = vmatpush3.bf16.msra.mxu0 %v7690_v11 }
0x2c97   :  { %5814 = vmatprep.subr.bf16.mxu0 %v6510_v36 }
0x2d5c   :  { %v3793_v58 = vpop.f32.mrb[18].mxu0 }
0x2d5d   :  { %v3804_v17 = vrot.slane %v3793_v58, %v7759_v13  ;;  %v5291_v30 = vpop.f32.mrb[19].mxu0 }
0x2d5f   :  { %v3805_v35 = vcombine.high %v3804_v17, %v3804_v17  ;;  %v3812_v5 = vrot.slane %v3804_v17, %v7759_v13 }
0x2d61   :  { %v3819_v54 = vrot.slane %v3805_v35, %v7759_v13  ;;  %v3823_v15 = vrot.slane %v3812_v5, %v6820_v6 }
0x2d63   :  { %v3827_v16 = vrot.slane %v3819_v54, %v6820_v6  ;;  %v3830_v27 = vadd.f32 %v3823_v15, %v7769_v20 }
0x2d65   :  { %v3831_v46 = vadd.f32 %v7767_v34, %v3827_v16  ;;  %6309 = vtanh.f32 %v3830_v27 }
0x2d67   :  { %6311 = vtanh.f32 %v3831_v46 }
0x2d6f   :  { %v6310_v37 = vpop.eup %6309 }
0x2d70   :  { %v3834_v32 = vmul.f32 %v6310_v37, %v7776_v12 }
0x2d71   :  { %v6312_v49 = vpop.eup %6311 }
0x2d72   :  { %v3836_v40 = vsel %vm136_vm0, %v3834_v32, 0.0  ;;  %v3835_v28 = vmul.f32 %v6312_v49, %v7776_v12 }
0x2d73   :  { %3837 = vadd.xlane.f32.xlu1 %v3836_v40 }
0x2d74   :  { %v3839_v8 = vsel %vm136_vm0, %v3835_v28, 0.0 }
0x2d75   :  { %3840 = vadd.xlane.f32.xlu0 %v3839_v8 }
0x2e00   :  { %v3838_v56 = vpop.xlane.xlu1 %3837 }
0x2e01   :  { %v3847_v52 = vrot.slane %v3838_v56, %v7789_v63 }
0x2e02   :  { %v3841_v3 = vpop.xlane.xlu0 %3840 }
0x2e03   :  { %v3851_v38 = vrot.slane %v3841_v3, %v7789_v63 }
0x2e05   :  { %v3852_v48 = vsel %vm536_vm1, %v3851_v38, %v3847_v52 }
0x2e06   :  { %v3854_v9 = vmul.f32 %v3852_v48, %v7786_v60 }
0x2e08   :  { %v3855_v1 = vsub.f32 %v3854_v9, %v7794_v57 }
0x2e0a   :  { %v3856_v21 = vsel %vm3466_vm11, %v3855_v1, -inf }
0x2e0b   :  { %3857 = vmax.xlane.f32.xlu0 %v3856_v21 }
0x2e98   :  { %v3858_v62 = vpop.xlane.xlu0 %3857 }
0x2e99   :  { %v3859_v19 = vsub.f32 %v3855_v1, %v3858_v62 }
0x2e9b   :  { %v3860_v22 = vmul.f32 1.442695, %v3859_v19 }
0x2e9d   :  { %6313 = vpow2.f32 %v3860_v22 }
0x2ea7   :  { %v6314_v7 = vpop.eup %6313 }
0x2ea8   :  { %v3862_v2 = vsel %vm3466_vm11, %v6314_v7, 0.0 }
0x2ea9   :  { %3863 = vadd.xlane.f32.xlu1 %v3862_v2 }
0x2f36   :  { %v3864_v29 = vpop.xlane.xlu1 %3863 }
0x2f37   :  { %6315 = vrcp.f32 %v3864_v29 }
0x2f38   :  { %6317 = vtanh.f32 %v3793_v58 }
0x2f41   :  { %v6316_v45 = vpop.eup %6315 }
0x2f42   :  { %v3866_v43 = vmul.f32 %v6316_v45, %v6314_v7  ;;  %v6318_v33 = vpop.eup %6317 }
0x2f43   :  { %v3899_v31 = vrot.slane %v6318_v33, 1 }
0x2f44   :  { %v3877_v39 = vrot.slane %v3866_v43, %v6799_v53  ;;  %v3870_v50 = vrot.slane %v3866_v43, %v6820_v6 }
0x2f46   :  { %3879 = vbcast.lane.b32.xlu0 %v3877_v39, 256  ;;  %3872 = vbcast.lane.b32.xlu1 %v3870_v50, 256 }
0x2f4a   :  { %3900 = vrot.lane.b32.xlu0 %v6318_v33, %s6501_s4  ;;  %3902 = vrot.lane.b32.xlu1 %v3899_v31, %s6501_s4 }
0x2fb8   :  { %v3880_v26 = vpop.permute.xlu0 %3879  ;;  %v3873_v17 = vpop.permute.xlu1 %3872 }
0x2fb9   :  { %v3882_v30 = vmul.f32 %v3880_v26, %v7336_v18  ;;  %v3881_v58 = vmul.f32 %v3873_v17, %v7328_v44 }
0x2fbb   :  { %v3890_v35 = vsel %vm136_vm0, %v3882_v30, 0.0  ;;  %v3883_v5 = vsel %vm136_vm0, %v3881_v58, 0.0 }
0x2fbc   :  { %v3891_v54 = vrot.slane %v3890_v35, 4  ;;  %v3884_v15 = vrot.slane %v3883_v5, 4  ;;  %v3903_v3 = vpop.permute.xlu1 %3902  ;;  %v3901_v38 = vpop.permute.xlu0 %3900 }
0x2fbe   :  { %v3892_v16 = vadd.f32 %v3891_v54, %v3890_v35  ;;  %v3885_v27 = vadd.f32 %v3884_v15, %v3883_v5 }
0x2fc0   :  { %v3893_v46 = vrot.slane %v3892_v16, 2  ;;  %v3886_v37 = vrot.slane %v3885_v27, 2 }
0x2fc2   :  { %v3887_v32 = vadd.f32 %v3886_v37, %v3885_v27  ;;  %v3894_v49 = vadd.f32 %v3893_v46, %v3892_v16 }
0x2fc4   :  { %v3888_v40 = vrot.slane %v3887_v32, 1  ;;  %v3895_v28 = vrot.slane %v3894_v49, 1 }
0x2fc6   :  { %v3889_v8 = vadd.f32 %v3888_v40, %v3887_v32  ;;  %v3896_v56 = vadd.f32 %v3895_v28, %v3894_v49 }
0x2fc8   :  { %v3907_v52 = vadd.f32 %v3903_v3, %v3896_v56  ;;  %v3906_v48 = vadd.f32 %v3901_v38, %v3889_v8 }
0x2fca   :  { %v3914_v9 = vrot.slane %v3907_v52, 7 }
0x2fcc   :  { %v7893_v1 = vsel %vm536_vm1, %v3914_v9, %v3906_v48 }
0x2fcd   :  { %5309 = vmatmul.mubr.msk.f32.vlgmr.msra.gmra.mrb[28].mxu1 %vm136_vm0, %v7893_v1 }
0x2fce   :  { %5804 = vmatpush3.bf16.msra.mxu1 %v7666_v42  ;;  %5346 = vmatprep.mubr.msk.f32.mxu1 %vm6511_vm10, %v6500_v0 }
0x2fcf   :  { %5805 = vmatprep.subr.bf16.mxu1 %v6510_v36 }
0x2fd2   :  { %5807 = vmatpush3.bf16.msra.mxu1 %v7672_v55 }
0x2fd3   :  { %5808 = vmatprep.subr.bf16.mxu1 %v6510_v36 }
0x2fd6   :  { %5810 = vmatpush3.bf16.msra.mxu1 %v7683_v24 }
0x2fd7   :  { %5811 = vmatprep.subr.bf16.mxu1 %v6510_v36 }
0x2fda   :  { %5813 = vmatpush3.bf16.msra.mxu1 %v7690_v11 }
0x2fdb   :  { %5826 = vmatprep.subr.bf16.mxu1 %v6510_v36 }
0x30a0   :  { %v3987_v21 = vpop.f32.mrb[28].mxu1 }
0x30a1   :  { %v3998_v62 = vrot.slane %v3987_v21, %v7759_v13  ;;  %v5310_v19 = vpop.f32.mrb[29].mxu1 }
0x30a3   :  { %v3999_v22 = vcombine.high %v3998_v62, %v3998_v62  ;;  %v4006_v7 = vrot.slane %v3998_v62, %v7759_v13 }
0x30a5   :  { %v4013_v2 = vrot.slane %v3999_v22, %v7759_v13  ;;  %v4017_v29 = vrot.slane %v4006_v7, %v6820_v6 }
0x30a7   :  { %v4021_v45 = vrot.slane %v4013_v2, %v6820_v6  ;;  %v4024_v43 = vadd.f32 %v4017_v29, %v7769_v20 }
0x30a9   :  { %v4025_v39 = vadd.f32 %v7767_v34, %v4021_v45  ;;  %6319 = vtanh.f32 %v4024_v43 }
0x30ab   :  { %6321 = vtanh.f32 %v4025_v39 }
0x30b3   :  { %v6320_v50 = vpop.eup %6319 }
0x30b4   :  { %v4028_v33 = vmul.f32 %v6320_v50, %v7776_v12 }
0x30b5   :  { %v6322_v31 = vpop.eup %6321 }
0x30b6   :  { %v4030_v26 = vsel %vm136_vm0, %v4028_v33, 0.0  ;;  %v4029_v17 = vmul.f32 %v6322_v31, %v7776_v12 }
0x30b7   :  { %4031 = vadd.xlane.f32.xlu1 %v4030_v26 }
0x30b8   :  { %v4033_v30 = vsel %vm136_vm0, %v4029_v17, 0.0 }
0x30b9   :  { %4034 = vadd.xlane.f32.xlu0 %v4033_v30 }
0x3144   :  { %v4032_v58 = vpop.xlane.xlu1 %4031 }
0x3145   :  { %v4041_v5 = vrot.slane %v4032_v58, %v7789_v63 }
0x3146   :  { %v4035_v35 = vpop.xlane.xlu0 %4034 }
0x3147   :  { %v4045_v54 = vrot.slane %v4035_v35, %v7789_v63 }
0x3149   :  { %v4046_v15 = vsel %vm536_vm1, %v4045_v54, %v4041_v5 }
0x314a   :  { %v4048_v16 = vmul.f32 %v4046_v15, %v7786_v60 }
0x314c   :  { %v4049_v27 = vsub.f32 %v4048_v16, %v7794_v57 }
0x314e   :  { %v4050_v46 = vsel %vm3466_vm11, %v4049_v27, -inf }
0x314f   :  { %4051 = vmax.xlane.f32.xlu0 %v4050_v46 }
0x31dc   :  { %v4052_v37 = vpop.xlane.xlu0 %4051 }
0x31dd   :  { %v4053_v32 = vsub.f32 %v4049_v27, %v4052_v37 }
0x31df   :  { %v4054_v49 = vmul.f32 1.442695, %v4053_v32 }
0x31e1   :  { %6323 = vpow2.f32 %v4054_v49 }
0x31eb   :  { %v6324_v40 = vpop.eup %6323 }
0x31ec   :  { %v4056_v28 = vsel %vm3466_vm11, %v6324_v40, 0.0 }
0x31ed   :  { %4057 = vadd.xlane.f32.xlu1 %v4056_v28 }
0x327a   :  { %v4058_v8 = vpop.xlane.xlu1 %4057 }
0x327b   :  { %6325 = vrcp.f32 %v4058_v8 }
0x327c   :  { %6327 = vtanh.f32 %v3987_v21 }
0x3285   :  { %v6326_v56 = vpop.eup %6325 }
0x3286   :  { %v4060_v3 = vmul.f32 %v6326_v56, %v6324_v40  ;;  %v6328_v48 = vpop.eup %6327 }
0x3287   :  { %v4093_v9 = vrot.slane %v6328_v48, 1 }
0x3288   :  { %v4071_v52 = vrot.slane %v4060_v3, %v6799_v53  ;;  %v4064_v38 = vrot.slane %v4060_v3, %v6820_v6 }
0x328a   :  { %4073 = vbcast.lane.b32.xlu0 %v4071_v52, 256  ;;  %4066 = vbcast.lane.b32.xlu1 %v4064_v38, 256 }
0x328e   :  { %4094 = vrot.lane.b32.xlu0 %v6328_v48, %s6501_s4  ;;  %4096 = vrot.lane.b32.xlu1 %v4093_v9, %s6501_s4 }
0x32fc   :  { %v4074_v62 = vpop.permute.xlu0 %4073  ;;  %v4067_v19 = vpop.permute.xlu1 %4066 }
0x32fd   :  { %v4076_v22 = vmul.f32 %v4074_v62, %v7336_v18  ;;  %v4075_v21 = vmul.f32 %v4067_v19, %v7328_v44 }
0x32ff   :  { %v4084_v7 = vsel %vm136_vm0, %v4076_v22, 0.0  ;;  %v4077_v2 = vsel %vm136_vm0, %v4075_v21, 0.0 }
0x3300   :  { %v4085_v29 = vrot.slane %v4084_v7, 4  ;;  %v4078_v45 = vrot.slane %v4077_v2, 4  ;;  %v4097_v5 = vpop.permute.xlu1 %4096  ;;  %v4095_v15 = vpop.permute.xlu0 %4094 }
0x3302   :  { %v4086_v43 = vadd.f32 %v4085_v29, %v4084_v7  ;;  %v4079_v39 = vadd.f32 %v4078_v45, %v4077_v2 }
0x3304   :  { %v4087_v50 = vrot.slane %v4086_v43, 2  ;;  %v4080_v33 = vrot.slane %v4079_v39, 2 }
0x3306   :  { %v4081_v31 = vadd.f32 %v4080_v33, %v4079_v39  ;;  %v4088_v26 = vadd.f32 %v4087_v50, %v4086_v43 }
0x3308   :  { %v4082_v17 = vrot.slane %v4081_v31, 1  ;;  %v4089_v30 = vrot.slane %v4088_v26, 1 }
0x330a   :  { %v4083_v58 = vadd.f32 %v4082_v17, %v4081_v31  ;;  %v4090_v35 = vadd.f32 %v4089_v30, %v4088_v26 }
0x330c   :  { %v4101_v54 = vadd.f32 %v4097_v5, %v4090_v35  ;;  %v4100_v16 = vadd.f32 %v4095_v15, %v4083_v58 }
0x330e   :  { %v4108_v27 = vrot.slane %v4101_v54, 7 }
0x3310   :  { %v7934_v46 = vsel %vm536_vm1, %v4108_v27, %v4100_v16 }
0x3311   :  { %5328 = vmatmul.mubr.msk.f32.vlgmr.msra.gmra.mrb[20].mxu0 %vm136_vm0, %v7934_v46 }
0x3312   :  { %5816 = vmatpush3.bf16.msra.mxu0 %v7666_v42  ;;  %5365 = vmatprep.mubr.msk.f32.mxu0 %vm6511_vm10, %v6500_v0 }
0x3313   :  { %5817 = vmatprep.subr.bf16.mxu0 %v6510_v36 }
0x3316   :  { %5819 = vmatpush3.bf16.msra.mxu0 %v7672_v55 }
0x3317   :  { %5820 = vmatprep.subr.bf16.mxu0 %v6510_v36 }
0x331a   :  { %5822 = vmatpush3.bf16.msra.mxu0 %v7683_v24 }
0x331b   :  { %5823 = vmatprep.subr.bf16.mxu0 %v6510_v36 }
0x331e   :  { %5825 = vmatpush3.bf16.msra.mxu0 %v7690_v11 }
0x331f   :  { %5838 = vmatprep.subr.bf16.mxu0 %v6510_v36 }
0x33e4   :  { %v4181_v37 = vpop.f32.mrb[20].mxu0 }
0x33e5   :  { %v4192_v32 = vrot.slane %v4181_v37, %v7759_v13  ;;  %v5329_v49 = vpop.f32.mrb[21].mxu0 }
0x33e7   :  { %v4193_v40 = vcombine.high %v4192_v32, %v4192_v32  ;;  %v4200_v28 = vrot.slane %v4192_v32, %v7759_v13 }
0x33e9   :  { %v4207_v8 = vrot.slane %v4193_v40, %v7759_v13  ;;  %v4211_v56 = vrot.slane %v4200_v28, %v6820_v6 }
0x33eb   :  { %v4215_v3 = vrot.slane %v4207_v8, %v6820_v6  ;;  %v4218_v52 = vadd.f32 %v4211_v56, %v7769_v20 }
0x33ed   :  { %v4219_v38 = vadd.f32 %v7767_v34, %v4215_v3  ;;  %6329 = vtanh.f32 %v4218_v52 }
0x33ef   :  { %6331 = vtanh.f32 %v4219_v38 }
0x33f7   :  { %v6330_v48 = vpop.eup %6329 }
0x33f8   :  { %v4222_v9 = vmul.f32 %v6330_v48, %v7776_v12 }
0x33f9   :  { %v6332_v62 = vpop.eup %6331 }
0x33fa   :  { %v4224_v19 = vsel %vm136_vm0, %v4222_v9, 0.0  ;;  %v4223_v22 = vmul.f32 %v6332_v62, %v7776_v12 }
0x33fb   :  { %4225 = vadd.xlane.f32.xlu1 %v4224_v19 }
0x33fc   :  { %v4227_v21 = vsel %vm136_vm0, %v4223_v22, 0.0 }
0x33fd   :  { %4228 = vadd.xlane.f32.xlu0 %v4227_v21 }
0x3488   :  { %v4226_v7 = vpop.xlane.xlu1 %4225 }
0x3489   :  { %v4235_v29 = vrot.slane %v4226_v7, %v7789_v63 }
0x348a   :  { %v4229_v2 = vpop.xlane.xlu0 %4228 }
0x348b   :  { %v4239_v45 = vrot.slane %v4229_v2, %v7789_v63 }
0x348d   :  { %v4240_v43 = vsel %vm536_vm1, %v4239_v45, %v4235_v29 }
0x348e   :  { %v4242_v39 = vmul.f32 %v4240_v43, %v7786_v60 }
0x3490   :  { %v4243_v50 = vsub.f32 %v4242_v39, %v7794_v57 }
0x3492   :  { %v4244_v33 = vsel %vm3466_vm11, %v4243_v50, -inf }
0x3493   :  { %4245 = vmax.xlane.f32.xlu0 %v4244_v33 }
0x3520   :  { %v4246_v31 = vpop.xlane.xlu0 %4245 }
0x3521   :  { %v4247_v26 = vsub.f32 %v4243_v50, %v4246_v31 }
0x3523   :  { %v4248_v17 = vmul.f32 1.442695, %v4247_v26 }
0x3525   :  { %6333 = vpow2.f32 %v4248_v17 }
0x352f   :  { %v6334_v30 = vpop.eup %6333 }
0x3530   :  { %v4250_v58 = vsel %vm3466_vm11, %v6334_v30, 0.0 }
0x3531   :  { %4251 = vadd.xlane.f32.xlu1 %v4250_v58 }
0x35be   :  { %v4252_v35 = vpop.xlane.xlu1 %4251 }
0x35bf   :  { %6335 = vrcp.f32 %v4252_v35 }
0x35c0   :  { %6337 = vtanh.f32 %v4181_v37 }
0x35c9   :  { %v6336_v5 = vpop.eup %6335 }
0x35ca   :  { %v4254_v54 = vmul.f32 %v6336_v5, %v6334_v30  ;;  %v6338_v27 = vpop.eup %6337 }
0x35cb   :  { %v4287_v32 = vrot.slane %v6338_v27, 1 }
0x35cc   :  { %v4265_v15 = vrot.slane %v4254_v54, %v6799_v53  ;;  %v4258_v16 = vrot.slane %v4254_v54, %v6820_v6 }
0x35ce   :  { %4267 = vbcast.lane.b32.xlu0 %v4265_v15, 256  ;;  %4260 = vbcast.lane.b32.xlu1 %v4258_v16, 256 }
0x35d2   :  { %4288 = vrot.lane.b32.xlu0 %v6338_v27, %s6501_s4  ;;  %4290 = vrot.lane.b32.xlu1 %v4287_v32, %s6501_s4 }
0x3640   :  { %v4268_v49 = vpop.permute.xlu0 %4267  ;;  %v4261_v40 = vpop.permute.xlu1 %4260 }
0x3641   :  { %v4270_v28 = vmul.f32 %v4268_v49, %v7336_v18  ;;  %v4269_v37 = vmul.f32 %v4261_v40, %v7328_v44 }
0x3643   :  { %v4278_v8 = vsel %vm136_vm0, %v4270_v28, 0.0  ;;  %v4271_v56 = vsel %vm136_vm0, %v4269_v37, 0.0 }
0x3644   :  { %v4279_v3 = vrot.slane %v4278_v8, 4  ;;  %v4272_v52 = vrot.slane %v4271_v56, 4  ;;  %v4291_v45 = vpop.permute.xlu1 %4290  ;;  %v4289_v39 = vpop.permute.xlu0 %4288 }
0x3646   :  { %v4280_v38 = vadd.f32 %v4279_v3, %v4278_v8  ;;  %v4273_v48 = vadd.f32 %v4272_v52, %v4271_v56 }
0x3648   :  { %v4281_v9 = vrot.slane %v4280_v38, 2  ;;  %v4274_v62 = vrot.slane %v4273_v48, 2 }
0x364a   :  { %v4275_v19 = vadd.f32 %v4274_v62, %v4273_v48  ;;  %v4282_v22 = vadd.f32 %v4281_v9, %v4280_v38 }
0x364c   :  { %v4276_v21 = vrot.slane %v4275_v19, 1  ;;  %v4283_v7 = vrot.slane %v4282_v22, 1 }
0x364e   :  { %v4277_v2 = vadd.f32 %v4276_v21, %v4275_v19  ;;  %v4284_v29 = vadd.f32 %v4283_v7, %v4282_v22 }
0x3650   :  { %v4295_v43 = vadd.f32 %v4291_v45, %v4284_v29  ;;  %v4294_v50 = vadd.f32 %v4289_v39, %v4277_v2 }
0x3652   :  { %v4302_v33 = vrot.slane %v4295_v43, 7 }
0x3654   :  { %v7975_v31 = vsel %vm536_vm1, %v4302_v33, %v4294_v50 }
0x3655   :  { %5347 = vmatmul.mubr.msk.f32.vlgmr.msra.gmra.mrb[30].mxu1 %vm136_vm0, %v7975_v31 }
0x3656   :  { %5828 = vmatpush3.bf16.msra.mxu1 %v7666_v42  ;;  %5384 = vmatprep.mubr.msk.f32.mxu1 %vm6511_vm10, %v6500_v0 }
0x3657   :  { %5829 = vmatprep.subr.bf16.mxu1 %v6510_v36 }
0x365a   :  { %5831 = vmatpush3.bf16.msra.mxu1 %v7672_v55 }
0x365b   :  { %5832 = vmatprep.subr.bf16.mxu1 %v6510_v36 }
0x365e   :  { %5834 = vmatpush3.bf16.msra.mxu1 %v7683_v24 }
0x365f   :  { %5835 = vmatprep.subr.bf16.mxu1 %v6510_v36 }
0x3662   :  { %5837 = vmatpush3.bf16.msra.mxu1 %v7690_v11 }
0x3728   :  { %v4375_v26 = vpop.f32.mrb[30].mxu1 }
0x3729   :  { %v4386_v17 = vrot.slane %v4375_v26, %v7759_v13  ;;  %v5348_v30 = vpop.f32.mrb[31].mxu1 }
0x372b   :  { %v4387_v42 = vcombine.high %v4386_v17, %v4386_v17  ;;  %v4394_v58 = vrot.slane %v4386_v17, %v7759_v13 }
0x372d   :  { %v4401_v35 = vrot.slane %v4387_v42, %v7759_v13  ;;  %v4405_v5 = vrot.slane %v4394_v58, %v6820_v6 }
0x372f   :  { %v4409_v55 = vrot.slane %v4401_v35, %v6820_v6  ;;  %v4412_v54 = vadd.f32 %v4405_v5, %v7769_v20 }
0x3731   :  { %v4413_v24 = vadd.f32 %v7767_v34, %v4409_v55  ;;  %6339 = vtanh.f32 %v4412_v54 }
0x3733   :  { %6341 = vtanh.f32 %v4413_v24 }
0x373b   :  { %v6340_v11 = vpop.eup %6339 }
0x373c   :  { %v4416_v15 = vmul.f32 %v6340_v11, %v7776_v12 }
0x373d   :  { %v6342_v16 = vpop.eup %6341 }
0x373e   :  { %v4418_v27 = vsel %vm136_vm0, %v4416_v15, 0.0  ;;  %v4417_v32 = vmul.f32 %v6342_v16, %v7776_v12 }
0x373f   :  { %4419 = vadd.xlane.f32.xlu1 %v4418_v27 }
0x3740   :  { %v4421_v49 = vsel %vm136_vm0, %v4417_v32, 0.0 }
0x3741   :  { %4422 = vadd.xlane.f32.xlu0 %v4421_v49 }
0x37cc   :  { %v4420_v40 = vpop.xlane.xlu1 %4419 }
0x37cd   :  { %v4429_v37 = vrot.slane %v4420_v40, %v7789_v63 }
0x37ce   :  { %v4423_v28 = vpop.xlane.xlu0 %4422 }
0x37cf   :  { %v4433_v8 = vrot.slane %v4423_v28, %v7789_v63 }
0x37d1   :  { %v4434_v56 = vsel %vm536_vm1, %v4433_v8, %v4429_v37 }
0x37d2   :  { %v4436_v3 = vmul.f32 %v4434_v56, %v7786_v60 }
0x37d4   :  { %v4437_v52 = vsub.f32 %v4436_v3, %v7794_v57 }
0x37d6   :  { %v4438_v38 = vsel %vm3466_vm11, %v4437_v52, -inf }
0x37d7   :  { %4439 = vmax.xlane.f32.xlu0 %v4438_v38 }
0x3864   :  { %v4440_v48 = vpop.xlane.xlu0 %4439 }
0x3865   :  { %v4441_v9 = vsub.f32 %v4437_v52, %v4440_v48 }
0x3867   :  { %v4442_v62 = vmul.f32 1.442695, %v4441_v9 }
0x3869   :  { %6343 = vpow2.f32 %v4442_v62 }
0x3873   :  { %v6344_v19 = vpop.eup %6343 }
0x3874   :  { %v4444_v22 = vsel %vm3466_vm11, %v6344_v19, 0.0 }
0x3875   :  { %4445 = vadd.xlane.f32.xlu1 %v4444_v22 }
0x3902   :  { %v4446_v21 = vpop.xlane.xlu1 %4445 }
0x3903   :  { %6345 = vrcp.f32 %v4446_v21 }
0x3904   :  { %6347 = vtanh.f32 %v4375_v26 }
0x390d   :  { %v6346_v7 = vpop.eup %6345 }
0x390e   :  { %v4448_v2 = vmul.f32 %v6346_v7, %v6344_v19  ;;  %v6348_v43 = vpop.eup %6347 }
0x390f   :  { %v4481_v39 = vrot.slane %v6348_v43, 1 }
0x3910   :  { %v4459_v29 = vrot.slane %v4448_v2, %v6799_v53  ;;  %v4452_v45 = vrot.slane %v4448_v2, %v6820_v6 }
0x3912   :  { %4461 = vbcast.lane.b32.xlu0 %v4459_v29, 256  ;;  %4454 = vbcast.lane.b32.xlu1 %v4452_v45, 256 }
0x3916   :  { %4482 = vrot.lane.b32.xlu0 %v6348_v43, %s6501_s4  ;;  %4484 = vrot.lane.b32.xlu1 %v4481_v39, %s6501_s4 }
0x3984   :  { %v4462_v50 = vpop.permute.xlu0 %4461  ;;  %v4455_v33 = vpop.permute.xlu1 %4454 }
0x3985   :  { %v4464_v17 = vmul.f32 %v4462_v50, %v7336_v18  ;;  %v4463_v26 = vmul.f32 %v4455_v33, %v7328_v44 }
0x3987   :  { %v4472_v30 = vsel %vm136_vm0, %v4464_v17, 0.0  ;;  %v4465_v42 = vsel %vm136_vm0, %v4463_v26, 0.0 }
0x3988   :  { %v4473_v58 = vrot.slane %v4472_v30, 4  ;;  %v4466_v35 = vrot.slane %v4465_v42, 4  ;;  %v4485_v40 = vpop.permute.xlu1 %4484  ;;  %v4483_v37 = vpop.permute.xlu0 %4482 }
0x398a   :  { %v4474_v5 = vadd.f32 %v4473_v58, %v4472_v30  ;;  %v4467_v55 = vadd.f32 %v4466_v35, %v4465_v42 }
0x398c   :  { %v4475_v54 = vrot.slane %v4474_v5, 2  ;;  %v4468_v24 = vrot.slane %v4467_v55, 2 }
0x398e   :  { %v4469_v11 = vadd.f32 %v4468_v24, %v4467_v55  ;;  %v4476_v15 = vadd.f32 %v4475_v54, %v4474_v5 }
0x3990   :  { %v4470_v16 = vrot.slane %v4469_v11, 1  ;;  %v4477_v27 = vrot.slane %v4476_v15, 1 }
0x3992   :  { %v4471_v32 = vadd.f32 %v4470_v16, %v4469_v11  ;;  %v4478_v49 = vadd.f32 %v4477_v27, %v4476_v15 }
0x3994   :  { %v4489_v28 = vadd.f32 %v4485_v40, %v4478_v49  ;;  %v4488_v8 = vadd.f32 %v4483_v37, %v4471_v32 }
0x3996   :  { %v4496_v56 = vrot.slane %v4489_v28, 7 }
0x3998   :  { %v8015_v3 = vsel %vm536_vm1, %v4496_v56, %v4488_v8 }
0x3999   :  { %5366 = vmatmul.mubr.msk.f32.vlgmr.msra.gmra.mrb[22].mxu0 %vm136_vm0, %v8015_v3 }
0x399a   :  { %5419 = vmatprep.mubr.msk.f32.mxu0 %vm6511_vm10, %v6500_v0 }
0x3a6c   :  { %v4569_v52 = vpop.f32.mrb[22].mxu0 }
0x3a6d   :  { %v4580_v38 = vrot.slane %v4569_v52, %v7759_v13  ;;  %v5367_v48 = vpop.f32.mrb[23].mxu0 }
0x3a6f   :  { %v4581_v9 = vcombine.high %v4580_v38, %v4580_v38  ;;  %v4588_v62 = vrot.slane %v4580_v38, %v7759_v13 }
0x3a71   :  { %v4595_v19 = vrot.slane %v4581_v9, %v7759_v13  ;;  %v4599_v22 = vrot.slane %v4588_v62, %v6820_v6 }
0x3a73   :  { %v4603_v21 = vrot.slane %v4595_v19, %v6820_v6  ;;  %v4606_v7 = vadd.f32 %v4599_v22, %v7769_v20 }
0x3a75   :  { %v4607_v2 = vadd.f32 %v7767_v34, %v4603_v21  ;;  %6349 = vtanh.f32 %v4606_v7 }
0x3a77   :  { %6351 = vtanh.f32 %v4607_v2 }
0x3a7f   :  { %v6350_v0 = vpop.eup %6349 }
0x3a80   :  { %v4610_v29 = vmul.f32 %v6350_v0, %v7776_v12 }
0x3a81   :  { %v6352_v45 = vpop.eup %6351 }
0x3a82   :  { %v4612_v43 = vsel %vm136_vm0, %v4610_v29, 0.0  ;;  %v4611_v39 = vmul.f32 %v6352_v45, %v7776_v12 }
0x3a83   :  { %4613 = vadd.xlane.f32.xlu1 %v4612_v43 }
0x3a84   :  { %v4615_v50 = vsel %vm136_vm0, %v4611_v39, 0.0 }
0x3a85   :  { %4616 = vadd.xlane.f32.xlu0 %v4615_v50 }
0x3b10   :  { %v4614_v33 = vpop.xlane.xlu1 %4613 }
0x3b11   :  { %v4623_v26 = vrot.slane %v4614_v33, %v7789_v63 }
0x3b12   :  { %v4617_v17 = vpop.xlane.xlu0 %4616 }
0x3b13   :  { %v4627_v30 = vrot.slane %v4617_v17, %v7789_v63 }
0x3b15   :  { %v4628_v42 = vsel %vm536_vm1, %v4627_v30, %v4623_v26 }
0x3b16   :  { %v4630_v58 = vmul.f32 %v4628_v42, %v7786_v60 }
0x3b18   :  { %v4631_v35 = vsub.f32 %v4630_v58, %v7794_v57 }
0x3b1a   :  { %v4632_v5 = vsel %vm3466_vm11, %v4631_v35, -inf }
0x3b1b   :  { %4633 = vmax.xlane.f32.xlu0 %v4632_v5 }
0x3ba8   :  { %v4634_v12 = vpop.xlane.xlu0 %4633 }
0x3ba9   :  { %v4635_v55 = vsub.f32 %v4631_v35, %v4634_v12 }
0x3bab   :  { %v4636_v54 = vmul.f32 1.442695, %v4635_v55 }
0x3bad   :  { %6353 = vpow2.f32 %v4636_v54 }
0x3bb7   :  { %v6354_v24 = vpop.eup %6353 }
0x3bb8   :  { %v4638_v11 = vsel %vm3466_vm11, %v6354_v24, 0.0 }
0x3bb9   :  { %4639 = vadd.xlane.f32.xlu1 %v4638_v11 }
0x3c46   :  { %v4640_v15 = vpop.xlane.xlu1 %4639 }
0x3c47   :  { %6355 = vrcp.f32 %v4640_v15 }
0x3c48   :  { %6357 = vtanh.f32 %v4569_v52 }
0x3c51   :  { %v6356_v16 = vpop.eup %6355 }
0x3c52   :  { %v4642_v27 = vmul.f32 %v6356_v16, %v6354_v24  ;;  %v6358_v49 = vpop.eup %6357 }
0x3c53   :  { %v4675_v40 = vrot.slane %v6358_v49, 1 }
0x3c54   :  { %v4653_v60 = vrot.slane %v4642_v27, %v6799_v53  ;;  %v4646_v32 = vrot.slane %v4642_v27, %v6820_v6  ;;  %v6372_v27 = vld [vmem:[%s8202_s11] ss:$0 sm:$0xff] }
0x3c56   :  { %4655 = vbcast.lane.b32.xlu0 %v4653_v60, 256  ;;  %4648 = vbcast.lane.b32.xlu1 %v4646_v32, 256 }
0x3c5a   :  { %4676 = vrot.lane.b32.xlu0 %v6358_v49, %s6501_s4  ;;  %4678 = vrot.lane.b32.xlu1 %v4675_v40, %s6501_s4 }
0x3cc8   :  { %v4656_v28 = vpop.permute.xlu0 %4655  ;;  %v4649_v37 = vpop.permute.xlu1 %4648 }
0x3cc9   :  { %v4658_v8 = vmul.f32 %v4656_v28, %v7336_v18  ;;  %v4657_v56 = vmul.f32 %v4649_v37, %v7328_v44 }
0x3ccb   :  { %v4666_v52 = vsel %vm136_vm0, %v4658_v8, 0.0  ;;  %v4659_v38 = vsel %vm136_vm0, %v4657_v56, 0.0  ;;  %v6373_v56 = vld [vmem:[%s8205_s14] sm:$0x3] }
0x3ccc   :  { %v4667_v48 = vrot.slane %v4666_v52, 4  ;;  %v4660_v9 = vrot.slane %v4659_v38, 4  ;;  %v4679_v39 = vpop.permute.xlu1 %4678  ;;  %v4677_v33 = vpop.permute.xlu0 %4676 }
0x3cce   :  { %v4668_v62 = vadd.f32 %v4667_v48, %v4666_v52  ;;  %v4661_v19 = vadd.f32 %v4660_v9, %v4659_v38  ;;  %v8075_v9 = vld [vmem:[%s8204_s13] sm:$0x3] }
0x3cd0   :  { %v4669_v22 = vrot.slane %v4668_v62, 2  ;;  %v4662_v21 = vrot.slane %v4661_v19, 2 }
0x3cd2   :  { %v4663_v7 = vadd.f32 %v4662_v21, %v4661_v19  ;;  %v4670_v2 = vadd.f32 %v4669_v22, %v4668_v62 }
0x3cd4   :  { %v4664_v0 = vrot.slane %v4663_v7, 1  ;;  %v4671_v29 = vrot.slane %v4670_v2, 1 }
0x3cd6   :  { %v4665_v45 = vadd.f32 %v4664_v0, %v4663_v7  ;;  %v4672_v43 = vadd.f32 %v4671_v29, %v4670_v2  ;;  %v3196_v2 = vrot.slane %v8075_v9, %v6799_v53 }
0x3cd8   :  { %v4683_v50 = vadd.f32 %v4679_v39, %v4672_v43  ;;  %v4682_v17 = vadd.f32 %v4677_v33, %v4665_v45 }
0x3cda   :  { %v4690_v26 = vrot.slane %v4683_v50, 7 }
0x3cdc   :  { %v8048_v30 = vsel %vm536_vm1, %v4690_v26, %v4682_v17 }
0x3cdd   :  { %5385 = vmatmul.mubr.msk.f32.vlgmr.msra.gmra.mrb[32].mxu1 %vm136_vm0, %v8048_v30 }
0x3db0   :  { %v4763_v42 = vpop.f32.mrb[32].mxu1 }
0x3db1   :  { %v4774_v58 = vrot.slane %v4763_v42, %v7759_v13  ;;  %v5386_v35 = vpop.f32.mrb[33].mxu1 }
0x3db3   :  { %v4775_v5 = vcombine.high %v4774_v58, %v4774_v58  ;;  %v4782_v12 = vrot.slane %v4774_v58, %v7759_v13 }
0x3db5   :  { %v4789_v55 = vrot.slane %v4775_v5, %v7759_v13  ;;  %v4793_v54 = vrot.slane %v4782_v12, %v6820_v6  ;;  %v4897_v12 = vld [vmem:[%s8201_s10 + $0x8] sm:$0xff] }
0x3db7   :  { %v4797_v24 = vrot.slane %v4789_v55, %v6820_v6  ;;  %v4800_v11 = vadd.f32 %v4793_v54, %v7769_v20 }
0x3db9   :  { %v4801_v15 = vadd.f32 %v7767_v34, %v4797_v24  ;;  %6359 = vtanh.f32 %v4800_v11 }
0x3dbb   :  { %6361 = vtanh.f32 %v4801_v15  ;;  %v4898_v15 = vld [vmem:[%s8201_s10 + $0x10] sm:$0xff] }
0x3dbc   :  { %6363 = vtanh.f32 %v4763_v42 }
0x3dc3   :  { %v6360_v16 = vpop.eup %6359 }
0x3dc4   :  { %v4804_v60 = vmul.f32 %v6372_v27, %v6360_v16  ;;  %v4899_v16 = vld [vmem:[%s8201_s10 + $0x18] sm:$0xff] }
0x3dc5   :  { %v6362_v32 = vpop.eup %6361 }
0x3dc6   :  { %v4806_v49 = vsel %vm136_vm0, %v4804_v60, 0.0  ;;  %v4805_v13 = vmul.f32 %v6372_v27, %v6362_v32  ;;  %v5842_v27 = vpack.c.bf16 %v4899_v16, %v4898_v15 }
0x3dc7   :  { %4807 = vadd.xlane.f32.xlu1 %v4806_v49 }
0x3dc8   :  { %v4809_v40 = vsel %vm136_vm0, %v4805_v13, 0.0  ;;  %v4901_v13 = vld [vmem:[%s8201_s10 + $0x28] sm:$0xff] }
0x3dc9   :  { %4810 = vadd.xlane.f32.xlu0 %v4809_v40 }
0x3e54   :  { %v4808_v28 = vpop.xlane.xlu1 %4807 }
0x3e55   :  { %v4817_v34 = vrot.slane %v4808_v28, %v7789_v63 }
0x3e56   :  { %v4811_v20 = vpop.xlane.xlu0 %4810 }
0x3e57   :  { %v4821_v37 = vrot.slane %v4811_v20, %v7789_v63  ;;  %v3189_v63 = vrot.slane %v8075_v9, %v6820_v6  ;;  %v4903_v20 = vld [vmem:[%s8201_s10 + $0x38] sm:$0xff] }
0x3e59   :  { %v4822_v8 = vsel %vm536_vm1, %v4821_v37, %v4817_v34  ;;  %v4904_v37 = vld [vmem:[%s8201_s10 + $0x40] sm:$0xff] }
0x3e5a   :  { %v4824_v52 = vmul.f32 %v6373_v56, %v4822_v8  ;;  %v4905_v8 = vld [vmem:[%s8201_s10 + $0x48] sm:$0xff] }
0x3e5b   :  { %v5851_v56 = vpack.c.bf16 %v4905_v8, %v4904_v37 }
0x3e5c   :  { %v4825_v38 = vsub.f32 %v4824_v52, %v7794_v57  ;;  %v8082_v57 = vpop.eup %6363  ;;  %v4907_v52 = vld [vmem:[%s8201_s10 + $0x58] sm:$0xff] }
0x3e5d   :  { %v4869_v62 = vrot.slane %v8082_v57, 1 }
0x3e5e   :  { %v4826_v48 = vsel %vm3466_vm11, %v4825_v38, -inf }
0x3e5f   :  { %4827 = vmax.xlane.f32.xlu0 %v4826_v48  ;;  %v4908_v48 = vld [vmem:[%s8201_s10 + $0x60] sm:$0xff] }
0x3e75   :  { %3191 = vbcast.lane.b32.xlu0 %v3189_v63, 256  ;;  %v4909_v63 = vld [vmem:[%s8201_s10 + $0x68] sm:$0xff] }
0x3e79   :  { %3521 = vperm.xlu0 %5887, %v8075_v9  }
0x3e7d   :  { %5898 = vset.pattern.permute.xlu0 %v6505_v41 }
0x3e7e   :  { %3909 = vperm.xlu0 %5898, %v8075_v9  }
0x3e82   :  { %5901 = vset.pattern.permute.xlu0 %v6507_v25 }
0x3e83   :  { %4491 = vperm.xlu0 %5901, %v8075_v9  }
0x3e87   :  { %4872 = vrot.lane.b32.xlu0 %v4869_v62, %s6501_s4  ;;  %v5857_v62 = vpack.c.bf16 %v4909_v63, %v4908_v48 }
0x3e88   :  { %5904 = vset.pattern.permute.xlu0 %v6509_v4 }
0x3eec   :  { %v4828_v19 = vpop.xlane.xlu0 %4827 }
0x3eed   :  { %v4829_v22 = vsub.f32 %v4825_v38, %v4828_v19 }
0x3eef   :  { %v4830_v21 = vmul.f32 1.442695, %v4829_v22 }
0x3ef0   :  { %v3192_v25 = vpop.permute.xlu0 %3191 }
0x3ef1   :  { %6365 = vpow2.f32 %v4830_v21  ;;  %v3200_v0 = vmul.f32 %v3192_v25, %v7731_v61  ;;  %v4896_v61 = vld [vmem:[%s8201_s10] sm:$0xff] }
0x3ef2   :  { %v5839_v55 = vpack.c.bf16 %v4897_v12, %v4896_v61 }
0x3ef3   :  { %v3202_v29 = vsel %vm136_vm0, %v3200_v0, 0.0 }
0x3ef4   :  { %v3203_v45 = vrot.slane %v3202_v29, 4  ;;  %5840 = vmatpush3.bf16.msra.mxu0 %v5839_v55 }
0x3ef5   :  { %5841 = vmatprep.subr.bf16.mxu0 %v6510_v36 }
0x3ef6   :  { %v3204_v39 = vadd.f32 %v3203_v45, %v3202_v29 }
0x3ef8   :  { %v3205_v17 = vrot.slane %v3204_v39, 2  ;;  %5843 = vmatpush3.bf16.msra.mxu0 %v5842_v27  ;;  %v3522_v45 = vpop.permute.xlu0 %3521 }
0x3ef9   :  { %5844 = vmatprep.subr.bf16.mxu0 %v6510_v36 }
0x3efa   :  { %v3206_v42 = vadd.f32 %v3205_v17, %v3204_v39  ;;  %v3529_v17 = vmul.f32 %v7811_v51, %v3522_v45 }
0x3efb   :  { %v6366_v7 = vpop.eup %6365 }
0x3efc   :  { %v4832_v41 = vsel %vm3466_vm11, %v6366_v7, 0.0  ;;  %v3207_v54 = vrot.slane %v3206_v42, 1 }
0x3efd   :  { %4833 = vadd.xlane.f32.xlu1 %v4832_v41 }
0x3efe   :  { %v3208_v60 = vadd.f32 %v3207_v54, %v3206_v42 }
0x3f0e   :  { %3198 = vbcast.lane.b32.xlu1 %v3196_v2, 256 }
0x3f12   :  { %3715 = vperm.xlu1 %5897, %v8075_v9  }
0x3f16   :  { %5899 = vset.pattern.permute.xlu1 %v6502_v10 }
0x3f17   :  { %4103 = vperm.xlu1 %5899, %v8075_v9  }
0x3f1b   :  { %5900 = vset.pattern.permute.xlu1 %v6506_v47 }
0x3f8a   :  { %v4834_v43 = vpop.xlane.xlu1 %4833 }
0x3f8b   :  { %6367 = vrcp.f32 %v4834_v43 }
0x3f8e   :  { %v3199_v50 = vpop.permute.xlu1 %3198 }
0x3f8f   :  { %v3201_v33 = vmul.f32 %v3199_v50, %v7737_v14 }
0x3f91   :  { %v3209_v26 = vsel %vm136_vm0, %v3201_v33, 0.0 }
0x3f92   :  { %v3210_v10 = vrot.slane %v3209_v26, 4  ;;  %v3716_v22 = vpop.permute.xlu1 %3715 }
0x3f93   :  { %v3723_v50 = vmul.f32 %v7852_v59, %v3716_v22 }
0x3f94   :  { %v3211_v58 = vadd.f32 %v3210_v10, %v3209_v26  ;;  %v3910_v26 = vpop.permute.xlu0 %3909 }
0x3f95   :  { %v6368_v35 = vpop.eup %6367 }
0x3f96   :  { %v3212_v47 = vrot.slane %v3211_v58, 2  ;;  %v4836_v5 = vmul.f32 %v6368_v35, %v6366_v7  ;;  %v4104_v21 = vpop.permute.xlu1 %4103  ;;  %v3917_v35 = vmul.f32 %v7893_v1, %v3910_v26 }
0x3f97   :  { %v4111_v61 = vmul.f32 %v7934_v46, %v4104_v21 }
0x3f98   :  { %v3213_v14 = vadd.f32 %v3212_v47, %v3211_v58  ;;  %v4847_v24 = vrot.slane %v4836_v5, %v6799_v53  ;;  %v4840_v49 = vrot.slane %v4836_v5, %v6820_v6  ;;  %v4900_v53 = vld [vmem:[%s8201_s10 + $0x20] sm:$0xff]  ;;  %v4902_v6 = vld [vmem:[%s8201_s10 + $0x30] sm:$0xff]  ;;  %v4492_v47 = vpop.permute.xlu0 %4491 }
0x3f99   :  { %v5845_v40 = vpack.c.bf16 %v4901_v13, %v4900_v53  ;;  %v5848_v34 = vpack.c.bf16 %v4903_v20, %v4902_v6  ;;  %v4499_v27 = vmul.f32 %v8015_v3, %v4492_v47 }
0x3f9a   :  { %v3214_v11 = vrot.slane %v3213_v14, 1  ;;  %4849 = vbcast.lane.b32.xlu1 %v4847_v24, 256 }
0x3f9b   :  { %5846 = vmatpush3.bf16.msra.mxu0 %v5845_v40 }
0x3f9c   :  { %v3215_v32 = vadd.f32 %v3214_v11, %v3213_v14  ;;  %5847 = vmatprep.subr.bf16.mxu0 %v6510_v36  ;;  %v4873_v51 = vpop.permute.xlu0 %4872 }
0x3f9e   :  { %4842 = vbcast.lane.b32.xlu1 %v4840_v49, 256  ;;  %v4891_v28 = vsel %vm536_vm1, %v3215_v32, %v3208_v60 }
0x3f9f   :  { %4892 = vrot.lane.b32.xlu0 %v4891_v28, %s6501_s4  ;;  %5849 = vmatpush3.bf16.msra.mxu0 %v5848_v34 }
0x3fa0   :  { %5850 = vmatprep.subr.bf16.mxu0 %v6510_v36 }
0x3fa2   :  { %4297 = vperm.xlu1 %5900, %v8075_v9  }
0x3fa3   :  { %5852 = vmatpush3.bf16.msra.mxu0 %v5851_v56 }
0x3fa4   :  { %5853 = vmatprep.subr.bf16.mxu0 %v6510_v36 }
0x3fa6   :  { %5902 = vset.pattern.permute.xlu1 %v6508_v23  ;;  %v4906_v23 = vld [vmem:[%s8201_s10 + $0x50] sm:$0xff] }
0x3fa7   :  { %4685 = vperm.xlu1 %5902, %v8075_v9   ;;  %v5854_v38 = vpack.c.bf16 %v4907_v52, %v4906_v23 }
0x3fa9   :  { %5855 = vmatpush3.bf16.msra.mxu0 %v5854_v38 }
0x3faa   :  { %5856 = vmatprep.subr.bf16.mxu0 %v6510_v36 }
0x3fab   :  { %5903 = vset.pattern.permute.xlu1 %v6509_v4  ;;  %v4910_v4 = vld [vmem:[%s8201_s10 + $0x70] sm:$0xff] }
0x3fac   :  { %4879 = vperm.xlu1 %5903, %v8075_v9   ;;  %v4911_v9 = vld [vmem:[%s8201_s10 + $0x78] sm:$0xff]  ;;  %s6513_s10 = smov [#allocation10]  }
0x3fad   :  { %5858 = vmatpush3.bf16.msra.mxu0 %v5857_v62  ;;  %v5860_v19 = vpack.c.bf16 %v4911_v9, %v4910_v4 }
0x3fae   :  { %5859 = vmatprep.subr.bf16.mxu0 %v6510_v36 }
0x3fb0   :  { %4870 = vrot.lane.b32.xlu1 %v8082_v57, %s6501_s4  ;;  %s4991_s4 = sshll.u32 %s6513_s10, 4  ;;  %s4992_s4 = int_to_ptr.vmem [resolvable:$true] %s4991_s4 }
0x3fb1   :  { %5861 = vmatpush3.bf16.msra.mxu0 %v5860_v19  ;;  %s6462_s5 = scalar_lea.vmem %s4992_s4, 32  ;;  %p6467_p5 = scmp.lt.s32.totalorder %s4992_s4, %s4992_s4 }
0x3fb2   :  { %p6463_p4 = scmp.ne.s32.totalorder %s4992_s4, %s6462_s5  ;;  %p6468_p6 = scmp.lt.s32.totalorder %s6462_s5, %s6462_s5 }
0x3fb4   :  { %p6469_p7 = por %p6468_p6, %p6467_p5 }
0x3fb6   :  { %p6470_p8 = pnand %p6469_p7, %p6463_p4 }
0x400c   :  { %v4850_v7 = vpop.permute.xlu1 %4849 }
0x400d   :  { %v4852_v41 = vmul.f32 %v4850_v7, %v7336_v18  ;;  %v3724_v18 = vadd.f32 %v3723_v50, %v3529_v17 }
0x400f   :  { %v4860_v57 = vsel %vm136_vm0, %v4852_v41, 0.0  ;;  %v3918_v5 = vadd.f32 %v3917_v35, %v3724_v18 }
0x4010   :  { %v4843_v2 = vpop.permute.xlu1 %4842  ;;  %v4861_v25 = vrot.slane %v4860_v57, 4 }
0x4011   :  { %v4851_v36 = vmul.f32 %v4843_v2, %v7328_v44  ;;  %v4112_v14 = vadd.f32 %v4111_v61, %v3918_v5  ;;  %v4893_v6 = vpop.permute.xlu0 %4892 }
0x4012   :  { %v4862_v29 = vadd.f32 %v4861_v25, %v4860_v57 }
0x4013   :  { %v4853_v0 = vsel %vm136_vm0, %v4851_v36, 0.0 }
0x4014   :  { %v4854_v43 = vrot.slane %v4853_v0, 4  ;;  %v4863_v39 = vrot.slane %v4862_v29, 2 }
0x4016   :  { %v4855_v33 = vadd.f32 %v4854_v43, %v4853_v0  ;;  %v4864_v10 = vadd.f32 %v4863_v39, %v4862_v29 }
0x4018   :  { %v4856_v58 = vrot.slane %v4855_v33, 2  ;;  %v4865_v44 = vrot.slane %v4864_v10, 1 }
0x401a   :  { %v4857_v55 = vadd.f32 %v4856_v58, %v4855_v33  ;;  %v4866_v59 = vadd.f32 %v4865_v44, %v4864_v10 }
0x401c   :  { %v4858_v24 = vrot.slane %v4857_v55, 1  ;;  %v4877_v16 = vadd.f32 %v4873_v51, %v4866_v59 }
0x401e   :  { %v4859_v60 = vadd.f32 %v4858_v24, %v4857_v55  ;;  %v4884_v46 = vrot.slane %v4877_v16, 7 }
0x4021   :  { %v4298_v42 = vpop.permute.xlu1 %4297 }
0x4022   :  { %v4305_v54 = vmul.f32 %v7975_v31, %v4298_v42 }
0x4024   :  { %v4306_v11 = vadd.f32 %v4305_v54, %v4112_v14 }
0x4026   :  { %v4686_v12 = vpop.permute.xlu1 %4685  ;;  %v4500_v1 = vadd.f32 %v4499_v27, %v4306_v11 }
0x4027   :  { %v4693_v32 = vmul.f32 %v8048_v30, %v4686_v12 }
0x4029   :  { %v4694_v40 = vadd.f32 %v4693_v32, %v4500_v1 }
0x402b   :  { %v4880_v15 = vpop.permute.xlu1 %4879 }
0x402f   :  { %v4871_v49 = vpop.permute.xlu1 %4870 }
0x4030   :  { %v4876_v53 = vadd.f32 %v4871_v49, %v4859_v60 }
0x4032   :  { %v4885_v13 = vsel %vm536_vm1, %v4884_v46, %v4876_v53 }
0x4033   :  { %v4887_v31 = vmul.f32 %v4885_v13, %v4880_v15 }
0x4035   :  { %v4888_v28 = vadd.f32 %v4887_v31, %v4694_v40 }
0x4037   :  { %v4895_v20 = vsel %vm136_vm0, %v4888_v28, %v4893_v6 }
0x4038   :  { %5420 = vmatmul.mubr.f32.vlgmr.msra.gmra.mrb[24].mxu0 %v4895_v20 }
0x410b   :  { %v4978_v34 = vpop.f32.mrb[24].mxu0 }
0x410c   :  { %6369 = vtanh.f32 %v4978_v34  ;;  %v5421_v37 = vpop.f32.mrb[25].mxu0 }
0x4116   :  { %v6370_v3 = vpop.eup %6369 }
0x4117   :  { %4984 = vst.msk [vmem:[#allocation10] sm:$0x3] %vm4983_vm12, %v6370_v3 }
0x4118   :  { %6473 = shalt.err (!%p6470_p8)
}
0x4119   :  { %s6474_s21 = scalar_lea.hbm %s8206_s15, 32 }
0x411a   :  { %p6475_p9 = scmp.ne.s32.totalorder %s8206_s15, %s6474_s21  ;;  %p6478_p10 = scmp.lt.u32.totalorder %s6474_s21, %s8206_s15 }
0x411c   :  { %p6480_p11 = pnand %p6478_p10, %p6475_p9 }
0x411e   :  { %6483 = shalt.err (!%p6480_p11)
}
0x411f   :  { %4994 = dma.vmem_to_hbm [thread:$0]  %s4992_s4, 32, %s8206_s15, [#allocation4]  }
0x4120   :  { %6490 = dma.done.wait [#allocation4], 32  }
0x4121   :  { %6491 = vsyncadd [#allocation4], 4294967264 }
0x4122   :  { %4998 = vsyncpa [#allocation3], 1 }
0x4123   :  { %4999 = vsyncpa [#allocation6], 1 }
0x4124   :  { %5000 = vsyncpa [#allocation9], 1 }
0x4125   :  { %5001 = vsyncpa [#allocation4], 1 }

</bundles_post_ra>
